<compile_context>
chip_gen: v7x
topology: tpu7x:2x2x1
jax: 0.10.0
libtpu: 0.0.40
codegen_flags: <defaults>
</compile_context>

<pallas_src>
import functools

import jax
import jax.numpy as jnp
from jax import lax
from jax.experimental import pallas as pl
from jax.experimental.pallas import tpu as pltpu


_SQRT_2_OVER_PI = 0.7978845608028654


def _gelu_tanh(x):
    return 0.5 * x * (1.0 + jnp.tanh(_SQRT_2_OVER_PI * (x + 0.044715 * x * x * x)))


def _lpi_kernel(x_ref, w1_ref, b1_ref, w2_ref, b2_ref, o_ref, pad_ref, *,
                H, W, KH, KW):
    """One batch image per grid step, NHWC layout.

    x_ref:   (1, H, W, C)        input image (channel-last)
    w1_ref:  (KH*KW, C)          depthwise conv1 weights (BN scale folded in)
    b1_ref:  (1, C)              folded BN shift
    w2_ref:  (KH*KW, C)          depthwise conv2 weights
    b2_ref:  (1, C)              conv2 bias
    o_ref:   (1, H, W, C)        output image
    pad_ref: (H+KH-1, W+KW-1, C) zero-padded halo scratch (VMEM)
    """
    C = o_ref.shape[-1]
    ph, pw = (KH - 1) // 2, (KW - 1) // 2

    # Zero the halo every step (scratch is per-core; do NOT rely on
    # program_id == 0 under "parallel" megacore partitioning).
    pad_ref[...] = jnp.zeros_like(pad_ref)

    def dwconv(w_ref, b_ref):
        acc = None
        for ky in range(KH):
            for kx in range(KW):
                tap = pad_ref[ky:ky + H, kx:kx + W, :] * w_ref[ky * KW + kx, :]
                acc = tap if acc is None else acc + tap
        return acc + b_ref[0, :]

    # depthwise conv #1 with BatchNorm folded into (w1, b1), then GELU.
    pad_ref[ph:ph + H, pw:pw + W, :] = x_ref[0].astype(jnp.float32)
    y = _gelu_tanh(dwconv(w1_ref, b1_ref))

    # depthwise conv #2 (+ bias).
    pad_ref[ph:ph + H, pw:pw + W, :] = y
    o_ref[0] = dwconv(w2_ref, b2_ref).astype(o_ref.dtype)


def lpi_forward(x, H, W, conv1_weight, bn_gamma, bn_beta, bn_mean, bn_var,
                conv2_weight, conv2_bias, bn_eps=1e-5):
    """Equivalent of LPI.forward(x, H, W) with eval-mode BatchNorm.

    x:            (B, N, C) tokens, N == H*W
    conv1_weight: (C, 1, KH, KW)   depthwise (groups == C, no bias)
    conv2_weight: (C, 1, KH, KW)   depthwise (groups == C)
    conv2_bias:   (C,)
    bn_*:         (C,)             BatchNorm2d affine params + running stats
    """
    B, N, C = x.shape
    assert N == H * W, "sequence length must equal H*W"
    KH, KW = int(conv1_weight.shape[2]), int(conv1_weight.shape[3])
    assert KH % 2 == 1 and KW % 2 == 1, "odd kernel sizes only"
    assert conv2_weight.shape == (C, 1, KH, KW)

    # Fold eval-mode BN into conv1:  y = conv1(x)*scale + shift
    scale = (bn_gamma / jnp.sqrt(bn_var + bn_eps)).astype(jnp.float32)       # (C,)
    w1 = conv1_weight[:, 0].astype(jnp.float32) * scale[:, None, None]        # (C,KH,KW)
    b1 = (bn_beta - bn_mean * scale).astype(jnp.float32)                      # (C,)
    w2 = conv2_weight[:, 0].astype(jnp.float32)                               # (C,KH,KW)
    b2 = conv2_bias.astype(jnp.float32)

    # (C, KH, KW) -> (KH*KW, C): tap-major, channels on the lane axis.
    w1k = jnp.transpose(w1, (1, 2, 0)).reshape(KH * KW, C)
    w2k = jnp.transpose(w2, (1, 2, 0)).reshape(KH * KW, C)
    b1k = b1.reshape(1, C)
    b2k = b2.reshape(1, C)

    # (B, N, C) token tensor IS the NHWC view of the NCHW image -> free reshape.
    img = x.reshape(B, H, W, C).astype(jnp.float32)

    kernel = functools.partial(_lpi_kernel, H=H, W=W, KH=KH, KW=KW)

    out = pl.pallas_call(
        kernel,
        out_shape=jax.ShapeDtypeStruct((B, H, W, C), jnp.float32),
        grid=(B,),
        in_specs=[
            pl.BlockSpec((1, H, W, C), lambda b: (b, 0, 0, 0)),
            pl.BlockSpec((KH * KW, C), lambda b: (0, 0)),
            pl.BlockSpec((1, C), lambda b: (0, 0)),
            pl.BlockSpec((KH * KW, C), lambda b: (0, 0)),
            pl.BlockSpec((1, C), lambda b: (0, 0)),
        ],
        out_specs=pl.BlockSpec((1, H, W, C), lambda b: (b, 0, 0, 0)),
        scratch_shapes=[pltpu.VMEM((H + KH - 1, W + KW - 1, C), jnp.float32)],
        compiler_params=pltpu.CompilerParams(
            dimension_semantics=("parallel",)),
        # NOTE: for very large H*W*C one would tile H with a halo and/or raise
        # vmem_limit_bytes; typical XCiT feature maps fit comfortably per step.
    )(img, w1k, b1k, w2k, b2k)

    # Free reshape back to token-major (B, N, C).
    return out.reshape(B, N, C).astype(x.dtype)


def _reference(x, H, W, conv1_weight, bn_gamma, bn_beta, bn_mean, bn_var,
               conv2_weight, conv2_bias, bn_eps=1e-5):
    """Pure-JAX transcription of LPI.forward (eval-mode BN, tanh GELU)."""
    B, N, C = x.shape
    KH, KW = conv1_weight.shape[2], conv1_weight.shape[3]
    ph, pw = (KH - 1) // 2, (KW - 1) // 2
    dn = ("NCHW", "OIHW", "NCHW")

    img = jnp.transpose(x, (0, 2, 1)).reshape(B, C, H, W)
    y = lax.conv_general_dilated(
        img, conv1_weight, (1, 1), ((ph, ph), (pw, pw)),
        dimension_numbers=dn, feature_group_count=C,
        precision=lax.Precision.HIGHEST)
    scale = bn_gamma / jnp.sqrt(bn_var + bn_eps)
    y = (y - bn_mean[None, :, None, None]) * scale[None, :, None, None] \
        + bn_beta[None, :, None, None]
    y = _gelu_tanh(y)
    y = lax.conv_general_dilated(
        y, conv2_weight, (1, 1), ((ph, ph), (pw, pw)),
        dimension_numbers=dn, feature_group_count=C,
        precision=lax.Precision.HIGHEST)
    y = y + conv2_bias[None, :, None, None]
    return y.reshape(B, C, N).transpose(0, 2, 1)


if __name__ == "__main__":
    B, H, W, C = 2, 16, 16, 128
    N = H * W

    key = jax.random.PRNGKey(0)
    ks = jax.random.split(key, 8)
    x = jax.random.normal(ks[0], (B, N, C), jnp.float32)
    conv1_w = 0.2 * jax.random.normal(ks[1], (C, 1, 3, 3), jnp.float32)
    bn_gamma = 1.0 + 0.1 * jax.random.normal(ks[2], (C,), jnp.float32)
    bn_beta = 0.1 * jax.random.normal(ks[3], (C,), jnp.float32)
    bn_mean = 0.1 * jax.random.normal(ks[4], (C,), jnp.float32)
    bn_var = jnp.abs(jax.random.normal(ks[5], (C,), jnp.float32)) + 0.5
    conv2_w = 0.2 * jax.random.normal(ks[6], (C, 1, 3, 3), jnp.float32)
    conv2_b = 0.1 * jax.random.normal(ks[7], (C,), jnp.float32)

    out = lpi_forward(x, H, W, conv1_w, bn_gamma, bn_beta, bn_mean, bn_var,
                      conv2_w, conv2_b)
    out = jax.block_until_ready(out)

    ref = _reference(x, H, W, conv1_w, bn_gamma, bn_beta, bn_mean, bn_var,
                     conv2_w, conv2_b)
    assert out.shape == (B, N, C), out.shape
    max_err = float(jnp.max(jnp.abs(out - ref)))
    assert jnp.allclose(out, ref, atol=2e-4, rtol=2e-4), max_err
    print("KERNEL_OK")
</pallas_src>

<mosaic_0001>
module attributes {stable_mosaic.version = 11 : i64} {
  func.func @_lpi_kernel(%arg0: i32, %arg1: memref<1x16x16x128xf32, #tpu.memory_space<vmem>>, %arg2: memref<9x128xf32, #tpu.memory_space<vmem>>, %arg3: memref<1x128xf32, #tpu.memory_space<vmem>>, %arg4: memref<9x128xf32, #tpu.memory_space<vmem>>, %arg5: memref<1x128xf32, #tpu.memory_space<vmem>>, %arg6: memref<1x16x16x128xf32, #tpu.memory_space<vmem>>, %arg7: memref<18x18x128xf32, #tpu.memory_space<vmem>>) attributes {dimension_semantics = [#tpu.dimension_semantics<parallel>], iteration_bounds = array<i64: 2>, scalar_prefetch = 0 : i64, scratch_operands = 1 : i64, tpu.core_type = #tpu.core_type<tc>, window_params = [{transform_indices = @transform_0, window_bounds = array<i64: 1, 16, 16, 128>}, {pipeline_mode = #tpu.pipeline_mode<synchronous>, transform_indices = @transform_1, window_bounds = array<i64: 9, 128>}, {pipeline_mode = #tpu.pipeline_mode<synchronous>, transform_indices = @transform_2, window_bounds = array<i64: 1, 128>}, {pipeline_mode = #tpu.pipeline_mode<synchronous>, transform_indices = @transform_3, window_bounds = array<i64: 9, 128>}, {pipeline_mode = #tpu.pipeline_mode<synchronous>, transform_indices = @transform_4, window_bounds = array<i64: 1, 128>}, {transform_indices = @transform_5, window_bounds = array<i64: 1, 16, 16, 128>}]} {
    %cst = arith.constant 0.000000e+00 : f32
    %0 = vector.broadcast %cst : f32 to vector<18x18x128xf32>
    %c0 = arith.constant 0 : index
    %c0_0 = arith.constant 0 : index
    %c0_1 = arith.constant 0 : index
    %1 = vector.load %arg7[%c0, %c0_0, %c0_1] : memref<18x18x128xf32, #tpu.memory_space<vmem>>, vector<18x18x128xf32>
    tpu.vector_store %arg7[%c0, %c0_0, %c0_1], %0 {strides = array<i32>} : memref<18x18x128xf32, #tpu.memory_space<vmem>>, vector<18x18x128xf32>,
    %c0_2 = arith.constant 0 : index
    %c0_3 = arith.constant 0 : index
    %c0_4 = arith.constant 0 : index
    %c0_5 = arith.constant 0 : index
    %2 = vector.load %arg1[%c0_2, %c0_3, %c0_4, %c0_5] : memref<1x16x16x128xf32, #tpu.memory_space<vmem>>, vector<1x16x16x128xf32>
    %3 = vector.shape_cast %2 : vector<1x16x16x128xf32> to vector<16x16x128xf32>
    %c1 = arith.constant 1 : index
    %c1_6 = arith.constant 1 : index
    %c0_7 = arith.constant 0 : index
    %4 = vector.load %arg7[%c1, %c1_6, %c0_7] : memref<18x18x128xf32, #tpu.memory_space<vmem>>, vector<16x16x128xf32>
    tpu.vector_store %arg7[%c1, %c1_6, %c0_7], %3 {strides = array<i32>} : memref<18x18x128xf32, #tpu.memory_space<vmem>>, vector<16x16x128xf32>,
    %c0_8 = arith.constant 0 : index
    %c0_9 = arith.constant 0 : index
    %c0_10 = arith.constant 0 : index
    %5 = vector.load %arg7[%c0_8, %c0_9, %c0_10] : memref<18x18x128xf32, #tpu.memory_space<vmem>>, vector<16x16x128xf32>
    %c0_11 = arith.constant 0 : index
    %c0_12 = arith.constant 0 : index
    %6 = vector.load %arg2[%c0_11, %c0_12] : memref<9x128xf32, #tpu.memory_space<vmem>>, vector<1x128xf32>
    %7 = vector.shape_cast %6 : vector<1x128xf32> to vector<128xf32>
    %8 = vector.shape_cast %7 : vector<128xf32> to vector<1x1x128xf32>
    %9 = vector.broadcast %8 : vector<1x1x128xf32> to vector<16x16x128xf32>
    %10 = arith.mulf %5, %9 : vector<16x16x128xf32>
    %c0_13 = arith.constant 0 : index
    %c1_14 = arith.constant 1 : index
    %c0_15 = arith.constant 0 : index
    %11 = vector.load %arg7[%c0_13, %c1_14, %c0_15] : memref<18x18x128xf32, #tpu.memory_space<vmem>>, vector<16x16x128xf32>
    %c1_16 = arith.constant 1 : index
    %c0_17 = arith.constant 0 : index
    %12 = vector.load %arg2[%c1_16, %c0_17] : memref<9x128xf32, #tpu.memory_space<vmem>>, vector<1x128xf32>
    %13 = vector.shape_cast %12 : vector<1x128xf32> to vector<128xf32>
    %14 = vector.shape_cast %13 : vector<128xf32> to vector<1x1x128xf32>
    %15 = vector.broadcast %14 : vector<1x1x128xf32> to vector<16x16x128xf32>
    %16 = arith.mulf %11, %15 : vector<16x16x128xf32>
    %17 = arith.addf %10, %16 : vector<16x16x128xf32>
    %c0_18 = arith.constant 0 : index
    %c2 = arith.constant 2 : index
    %c0_19 = arith.constant 0 : index
    %18 = vector.load %arg7[%c0_18, %c2, %c0_19] : memref<18x18x128xf32, #tpu.memory_space<vmem>>, vector<16x16x128xf32>
    %c2_20 = arith.constant 2 : index
    %c0_21 = arith.constant 0 : index
    %19 = vector.load %arg2[%c2_20, %c0_21] : memref<9x128xf32, #tpu.memory_space<vmem>>, vector<1x128xf32>
    %20 = vector.shape_cast %19 : vector<1x128xf32> to vector<128xf32>
    %21 = vector.shape_cast %20 : vector<128xf32> to vector<1x1x128xf32>
    %22 = vector.broadcast %21 : vector<1x1x128xf32> to vector<16x16x128xf32>
    %23 = arith.mulf %18, %22 : vector<16x16x128xf32>
    %24 = arith.addf %17, %23 : vector<16x16x128xf32>
    %c1_22 = arith.constant 1 : index
    %c0_23 = arith.constant 0 : index
    %c0_24 = arith.constant 0 : index
    %25 = vector.load %arg7[%c1_22, %c0_23, %c0_24] : memref<18x18x128xf32, #tpu.memory_space<vmem>>, vector<16x16x128xf32>
    %c3 = arith.constant 3 : index
    %c0_25 = arith.constant 0 : index
    %26 = vector.load %arg2[%c3, %c0_25] : memref<9x128xf32, #tpu.memory_space<vmem>>, vector<1x128xf32>
    %27 = vector.shape_cast %26 : vector<1x128xf32> to vector<128xf32>
    %28 = vector.shape_cast %27 : vector<128xf32> to vector<1x1x128xf32>
    %29 = vector.broadcast %28 : vector<1x1x128xf32> to vector<16x16x128xf32>
    %30 = arith.mulf %25, %29 : vector<16x16x128xf32>
    %31 = arith.addf %24, %30 : vector<16x16x128xf32>
    %c1_26 = arith.constant 1 : index
    %c1_27 = arith.constant 1 : index
    %c0_28 = arith.constant 0 : index
    %32 = vector.load %arg7[%c1_26, %c1_27, %c0_28] : memref<18x18x128xf32, #tpu.memory_space<vmem>>, vector<16x16x128xf32>
    %c4 = arith.constant 4 : index
    %c0_29 = arith.constant 0 : index
    %33 = vector.load %arg2[%c4, %c0_29] : memref<9x128xf32, #tpu.memory_space<vmem>>, vector<1x128xf32>
    %34 = vector.shape_cast %33 : vector<1x128xf32> to vector<128xf32>
    %35 = vector.shape_cast %34 : vector<128xf32> to vector<1x1x128xf32>
    %36 = vector.broadcast %35 : vector<1x1x128xf32> to vector<16x16x128xf32>
    %37 = arith.mulf %32, %36 : vector<16x16x128xf32>
    %38 = arith.addf %31, %37 : vector<16x16x128xf32>
    %c1_30 = arith.constant 1 : index
    %c2_31 = arith.constant 2 : index
    %c0_32 = arith.constant 0 : index
    %39 = vector.load %arg7[%c1_30, %c2_31, %c0_32] : memref<18x18x128xf32, #tpu.memory_space<vmem>>, vector<16x16x128xf32>
    %c5 = arith.constant 5 : index
    %c0_33 = arith.constant 0 : index
    %40 = vector.load %arg2[%c5, %c0_33] : memref<9x128xf32, #tpu.memory_space<vmem>>, vector<1x128xf32>
    %41 = vector.shape_cast %40 : vector<1x128xf32> to vector<128xf32>
    %42 = vector.shape_cast %41 : vector<128xf32> to vector<1x1x128xf32>
    %43 = vector.broadcast %42 : vector<1x1x128xf32> to vector<16x16x128xf32>
    %44 = arith.mulf %39, %43 : vector<16x16x128xf32>
    %45 = arith.addf %38, %44 : vector<16x16x128xf32>
    %c2_34 = arith.constant 2 : index
    %c0_35 = arith.constant 0 : index
    %c0_36 = arith.constant 0 : index
    %46 = vector.load %arg7[%c2_34, %c0_35, %c0_36] : memref<18x18x128xf32, #tpu.memory_space<vmem>>, vector<16x16x128xf32>
    %c6 = arith.constant 6 : index
    %c0_37 = arith.constant 0 : index
    %47 = vector.load %arg2[%c6, %c0_37] : memref<9x128xf32, #tpu.memory_space<vmem>>, vector<1x128xf32>
    %48 = vector.shape_cast %47 : vector<1x128xf32> to vector<128xf32>
    %49 = vector.shape_cast %48 : vector<128xf32> to vector<1x1x128xf32>
    %50 = vector.broadcast %49 : vector<1x1x128xf32> to vector<16x16x128xf32>
    %51 = arith.mulf %46, %50 : vector<16x16x128xf32>
    %52 = arith.addf %45, %51 : vector<16x16x128xf32>
    %c2_38 = arith.constant 2 : index
    %c1_39 = arith.constant 1 : index
    %c0_40 = arith.constant 0 : index
    %53 = vector.load %arg7[%c2_38, %c1_39, %c0_40] : memref<18x18x128xf32, #tpu.memory_space<vmem>>, vector<16x16x128xf32>
    %c7 = arith.constant 7 : index
    %c0_41 = arith.constant 0 : index
    %54 = vector.load %arg2[%c7, %c0_41] : memref<9x128xf32, #tpu.memory_space<vmem>>, vector<1x128xf32>
    %55 = vector.shape_cast %54 : vector<1x128xf32> to vector<128xf32>
    %56 = vector.shape_cast %55 : vector<128xf32> to vector<1x1x128xf32>
    %57 = vector.broadcast %56 : vector<1x1x128xf32> to vector<16x16x128xf32>
    %58 = arith.mulf %53, %57 : vector<16x16x128xf32>
    %59 = arith.addf %52, %58 : vector<16x16x128xf32>
    %c2_42 = arith.constant 2 : index
    %c2_43 = arith.constant 2 : index
    %c0_44 = arith.constant 0 : index
    %60 = vector.load %arg7[%c2_42, %c2_43, %c0_44] : memref<18x18x128xf32, #tpu.memory_space<vmem>>, vector<16x16x128xf32>
    %c8 = arith.constant 8 : index
    %c0_45 = arith.constant 0 : index
    %61 = vector.load %arg2[%c8, %c0_45] : memref<9x128xf32, #tpu.memory_space<vmem>>, vector<1x128xf32>
    %62 = vector.shape_cast %61 : vector<1x128xf32> to vector<128xf32>
    %63 = vector.shape_cast %62 : vector<128xf32> to vector<1x1x128xf32>
    %64 = vector.broadcast %63 : vector<1x1x128xf32> to vector<16x16x128xf32>
    %65 = arith.mulf %60, %64 : vector<16x16x128xf32>
    %66 = arith.addf %59, %65 : vector<16x16x128xf32>
    %c0_46 = arith.constant 0 : index
    %c0_47 = arith.constant 0 : index
    %67 = vector.load %arg3[%c0_46, %c0_47] : memref<1x128xf32, #tpu.memory_space<vmem>>, vector<1x128xf32>
    %68 = vector.shape_cast %67 : vector<1x128xf32> to vector<128xf32>
    %69 = vector.shape_cast %68 : vector<128xf32> to vector<1x1x128xf32>
    %70 = vector.broadcast %69 : vector<1x1x128xf32> to vector<16x16x128xf32>
    %71 = arith.addf %66, %70 : vector<16x16x128xf32>
    %cst_48 = arith.constant 5.000000e-01 : f32
    %72 = vector.broadcast %cst_48 : f32 to vector<16x16x128xf32>
    %73 = arith.mulf %72, %71 : vector<16x16x128xf32>
    %cst_49 = arith.constant 4.471500e-02 : f32
    %74 = vector.broadcast %cst_49 : f32 to vector<16x16x128xf32>
    %75 = arith.mulf %74, %71 : vector<16x16x128xf32>
    %76 = arith.mulf %75, %71 : vector<16x16x128xf32>
    %77 = arith.mulf %76, %71 : vector<16x16x128xf32>
    %78 = arith.addf %71, %77 : vector<16x16x128xf32>
    %cst_50 = arith.constant 0.797884583 : f32
    %79 = vector.broadcast %cst_50 : f32 to vector<16x16x128xf32>
    %80 = arith.mulf %79, %78 : vector<16x16x128xf32>
    %81 = math.tanh %80 : vector<16x16x128xf32>
    %cst_51 = arith.constant 1.000000e+00 : f32
    %82 = vector.broadcast %cst_51 : f32 to vector<16x16x128xf32>
    %83 = arith.addf %82, %81 : vector<16x16x128xf32>
    %84 = arith.mulf %73, %83 : vector<16x16x128xf32>
    %c1_52 = arith.constant 1 : index
    %c1_53 = arith.constant 1 : index
    %c0_54 = arith.constant 0 : index
    %85 = vector.load %arg7[%c1_52, %c1_53, %c0_54] : memref<18x18x128xf32, #tpu.memory_space<vmem>>, vector<16x16x128xf32>
    tpu.vector_store %arg7[%c1_52, %c1_53, %c0_54], %84 {strides = array<i32>} : memref<18x18x128xf32, #tpu.memory_space<vmem>>, vector<16x16x128xf32>,
    %c0_55 = arith.constant 0 : index
    %c0_56 = arith.constant 0 : index
    %c0_57 = arith.constant 0 : index
    %86 = vector.load %arg7[%c0_55, %c0_56, %c0_57] : memref<18x18x128xf32, #tpu.memory_space<vmem>>, vector<16x16x128xf32>
    %c0_58 = arith.constant 0 : index
    %c0_59 = arith.constant 0 : index
    %87 = vector.load %arg4[%c0_58, %c0_59] : memref<9x128xf32, #tpu.memory_space<vmem>>, vector<1x128xf32>
    %88 = vector.shape_cast %87 : vector<1x128xf32> to vector<128xf32>
    %89 = vector.shape_cast %88 : vector<128xf32> to vector<1x1x128xf32>
    %90 = vector.broadcast %89 : vector<1x1x128xf32> to vector<16x16x128xf32>
    %91 = arith.mulf %86, %90 : vector<16x16x128xf32>
    %c0_60 = arith.constant 0 : index
    %c1_61 = arith.constant 1 : index
    %c0_62 = arith.constant 0 : index
    %92 = vector.load %arg7[%c0_60, %c1_61, %c0_62] : memref<18x18x128xf32, #tpu.memory_space<vmem>>, vector<16x16x128xf32>
    %c1_63 = arith.constant 1 : index
    %c0_64 = arith.constant 0 : index
    %93 = vector.load %arg4[%c1_63, %c0_64] : memref<9x128xf32, #tpu.memory_space<vmem>>, vector<1x128xf32>
    %94 = vector.shape_cast %93 : vector<1x128xf32> to vector<128xf32>
    %95 = vector.shape_cast %94 : vector<128xf32> to vector<1x1x128xf32>
    %96 = vector.broadcast %95 : vector<1x1x128xf32> to vector<16x16x128xf32>
    %97 = arith.mulf %92, %96 : vector<16x16x128xf32>
    %98 = arith.addf %91, %97 : vector<16x16x128xf32>
    %c0_65 = arith.constant 0 : index
    %c2_66 = arith.constant 2 : index
    %c0_67 = arith.constant 0 : index
    %99 = vector.load %arg7[%c0_65, %c2_66, %c0_67] : memref<18x18x128xf32, #tpu.memory_space<vmem>>, vector<16x16x128xf32>
    %c2_68 = arith.constant 2 : index
    %c0_69 = arith.constant 0 : index
    %100 = vector.load %arg4[%c2_68, %c0_69] : memref<9x128xf32, #tpu.memory_space<vmem>>, vector<1x128xf32>
    %101 = vector.shape_cast %100 : vector<1x128xf32> to vector<128xf32>
    %102 = vector.shape_cast %101 : vector<128xf32> to vector<1x1x128xf32>
    %103 = vector.broadcast %102 : vector<1x1x128xf32> to vector<16x16x128xf32>
    %104 = arith.mulf %99, %103 : vector<16x16x128xf32>
    %105 = arith.addf %98, %104 : vector<16x16x128xf32>
    %c1_70 = arith.constant 1 : index
    %c0_71 = arith.constant 0 : index
    %c0_72 = arith.constant 0 : index
    %106 = vector.load %arg7[%c1_70, %c0_71, %c0_72] : memref<18x18x128xf32, #tpu.memory_space<vmem>>, vector<16x16x128xf32>
    %c3_73 = arith.constant 3 : index
    %c0_74 = arith.constant 0 : index
    %107 = vector.load %arg4[%c3_73, %c0_74] : memref<9x128xf32, #tpu.memory_space<vmem>>, vector<1x128xf32>
    %108 = vector.shape_cast %107 : vector<1x128xf32> to vector<128xf32>
    %109 = vector.shape_cast %108 : vector<128xf32> to vector<1x1x128xf32>
    %110 = vector.broadcast %109 : vector<1x1x128xf32> to vector<16x16x128xf32>
    %111 = arith.mulf %106, %110 : vector<16x16x128xf32>
    %112 = arith.addf %105, %111 : vector<16x16x128xf32>
    %c1_75 = arith.constant 1 : index
    %c1_76 = arith.constant 1 : index
    %c0_77 = arith.constant 0 : index
    %113 = vector.load %arg7[%c1_75, %c1_76, %c0_77] : memref<18x18x128xf32, #tpu.memory_space<vmem>>, vector<16x16x128xf32>
    %c4_78 = arith.constant 4 : index
    %c0_79 = arith.constant 0 : index
    %114 = vector.load %arg4[%c4_78, %c0_79] : memref<9x128xf32, #tpu.memory_space<vmem>>, vector<1x128xf32>
    %115 = vector.shape_cast %114 : vector<1x128xf32> to vector<128xf32>
    %116 = vector.shape_cast %115 : vector<128xf32> to vector<1x1x128xf32>
    %117 = vector.broadcast %116 : vector<1x1x128xf32> to vector<16x16x128xf32>
    %118 = arith.mulf %113, %117 : vector<16x16x128xf32>
    %119 = arith.addf %112, %118 : vector<16x16x128xf32>
    %c1_80 = arith.constant 1 : index
    %c2_81 = arith.constant 2 : index
    %c0_82 = arith.constant 0 : index
    %120 = vector.load %arg7[%c1_80, %c2_81, %c0_82] : memref<18x18x128xf32, #tpu.memory_space<vmem>>, vector<16x16x128xf32>
    %c5_83 = arith.constant 5 : index
    %c0_84 = arith.constant 0 : index
    %121 = vector.load %arg4[%c5_83, %c0_84] : memref<9x128xf32, #tpu.memory_space<vmem>>, vector<1x128xf32>
    %122 = vector.shape_cast %121 : vector<1x128xf32> to vector<128xf32>
    %123 = vector.shape_cast %122 : vector<128xf32> to vector<1x1x128xf32>
    %124 = vector.broadcast %123 : vector<1x1x128xf32> to vector<16x16x128xf32>
    %125 = arith.mulf %120, %124 : vector<16x16x128xf32>
    %126 = arith.addf %119, %125 : vector<16x16x128xf32>
    %c2_85 = arith.constant 2 : index
    %c0_86 = arith.constant 0 : index
    %c0_87 = arith.constant 0 : index
    %127 = vector.load %arg7[%c2_85, %c0_86, %c0_87] : memref<18x18x128xf32, #tpu.memory_space<vmem>>, vector<16x16x128xf32>
    %c6_88 = arith.constant 6 : index
    %c0_89 = arith.constant 0 : index
    %128 = vector.load %arg4[%c6_88, %c0_89] : memref<9x128xf32, #tpu.memory_space<vmem>>, vector<1x128xf32>
    %129 = vector.shape_cast %128 : vector<1x128xf32> to vector<128xf32>
    %130 = vector.shape_cast %129 : vector<128xf32> to vector<1x1x128xf32>
    %131 = vector.broadcast %130 : vector<1x1x128xf32> to vector<16x16x128xf32>
    %132 = arith.mulf %127, %131 : vector<16x16x128xf32>
    %133 = arith.addf %126, %132 : vector<16x16x128xf32>
    %c2_90 = arith.constant 2 : index
    %c1_91 = arith.constant 1 : index
    %c0_92 = arith.constant 0 : index
    %134 = vector.load %arg7[%c2_90, %c1_91, %c0_92] : memref<18x18x128xf32, #tpu.memory_space<vmem>>, vector<16x16x128xf32>
    %c7_93 = arith.constant 7 : index
    %c0_94 = arith.constant 0 : index
    %135 = vector.load %arg4[%c7_93, %c0_94] : memref<9x128xf32, #tpu.memory_space<vmem>>, vector<1x128xf32>
    %136 = vector.shape_cast %135 : vector<1x128xf32> to vector<128xf32>
    %137 = vector.shape_cast %136 : vector<128xf32> to vector<1x1x128xf32>
    %138 = vector.broadcast %137 : vector<1x1x128xf32> to vector<16x16x128xf32>
    %139 = arith.mulf %134, %138 : vector<16x16x128xf32>
    %140 = arith.addf %133, %139 : vector<16x16x128xf32>
    %c2_95 = arith.constant 2 : index
    %c2_96 = arith.constant 2 : index
    %c0_97 = arith.constant 0 : index
    %141 = vector.load %arg7[%c2_95, %c2_96, %c0_97] : memref<18x18x128xf32, #tpu.memory_space<vmem>>, vector<16x16x128xf32>
    %c8_98 = arith.constant 8 : index
    %c0_99 = arith.constant 0 : index
    %142 = vector.load %arg4[%c8_98, %c0_99] : memref<9x128xf32, #tpu.memory_space<vmem>>, vector<1x128xf32>
    %143 = vector.shape_cast %142 : vector<1x128xf32> to vector<128xf32>
    %144 = vector.shape_cast %143 : vector<128xf32> to vector<1x1x128xf32>
    %145 = vector.broadcast %144 : vector<1x1x128xf32> to vector<16x16x128xf32>
    %146 = arith.mulf %141, %145 : vector<16x16x128xf32>
    %147 = arith.addf %140, %146 : vector<16x16x128xf32>
    %c0_100 = arith.constant 0 : index
    %c0_101 = arith.constant 0 : index
    %148 = vector.load %arg5[%c0_100, %c0_101] : memref<1x128xf32, #tpu.memory_space<vmem>>, vector<1x128xf32>
    %149 = vector.shape_cast %148 : vector<1x128xf32> to vector<128xf32>
    %150 = vector.shape_cast %149 : vector<128xf32> to vector<1x1x128xf32>
    %151 = vector.broadcast %150 : vector<1x1x128xf32> to vector<16x16x128xf32>
    %152 = arith.addf %147, %151 : vector<16x16x128xf32>
    %c0_102 = arith.constant 0 : index
    %c0_103 = arith.constant 0 : index
    %c0_104 = arith.constant 0 : index
    %c0_105 = arith.constant 0 : index
    %153 = vector.load %arg6[%c0_102, %c0_103, %c0_104, %c0_105] : memref<1x16x16x128xf32, #tpu.memory_space<vmem>>, vector<1x16x16x128xf32>
    %154 = vector.shape_cast %153 : vector<1x16x16x128xf32> to vector<16x16x128xf32>
    %155 = vector.shape_cast %152 : vector<16x16x128xf32> to vector<1x16x16x128xf32>
    tpu.vector_store %arg6[%c0_102, %c0_103, %c0_104, %c0_105], %155 {strides = array<i32>} : memref<1x16x16x128xf32, #tpu.memory_space<vmem>>, vector<1x16x16x128xf32>,
    return
  }
  func.func @transform_0(%arg0: i32) -> (i32, i32, i32, i32) {
    %c0_i32 = arith.constant 0 : i32
    %c0_i32_0 = arith.constant 0 : i32
    %c0_i32_1 = arith.constant 0 : i32
    %c0_i32_2 = arith.constant 0 : i32
    return %arg0, %c0_i32, %c0_i32_0, %c0_i32_1 : i32, i32, i32, i32
  }
  func.func @transform_1(%arg0: i32) -> (i32, i32) {
    %c0_i32 = arith.constant 0 : i32
    %c0_i32_0 = arith.constant 0 : i32
    %c0_i32_1 = arith.constant 0 : i32
    return %c0_i32, %c0_i32_0 : i32, i32
  }
  func.func @transform_2(%arg0: i32) -> (i32, i32) {
    %c0_i32 = arith.constant 0 : i32
    %c0_i32_0 = arith.constant 0 : i32
    %c0_i32_1 = arith.constant 0 : i32
    return %c0_i32, %c0_i32_0 : i32, i32
  }
  func.func @transform_3(%arg0: i32) -> (i32, i32) {
    %c0_i32 = arith.constant 0 : i32
    %c0_i32_0 = arith.constant 0 : i32
    %c0_i32_1 = arith.constant 0 : i32
    return %c0_i32, %c0_i32_0 : i32, i32
  }
  func.func @transform_4(%arg0: i32) -> (i32, i32) {
    %c0_i32 = arith.constant 0 : i32
    %c0_i32_0 = arith.constant 0 : i32
    %c0_i32_1 = arith.constant 0 : i32
    return %c0_i32, %c0_i32_0 : i32, i32
  }
  func.func @transform_5(%arg0: i32) -> (i32, i32, i32, i32) {
    %c0_i32 = arith.constant 0 : i32
    %c0_i32_0 = arith.constant 0 : i32
    %c0_i32_1 = arith.constant 0 : i32
    %c0_i32_2 = arith.constant 0 : i32
    return %arg0, %c0_i32, %c0_i32_0, %c0_i32_1 : i32, i32, i32, i32
  }
}

</mosaic_0001>

<bundles_post_ra>
// kernel: tpu_custom_call.1
= control target key start
LH: loop header
LB: loop body
LE: loop exit
PB: predicated region body
PF: predicated region fallthrough
CT: control target
= control target key end

     0   :  { %10 = vsyncpa [#allocation4], 0  ;;  %s4696_s0 = inlined_call_operand.hbm [shape: f32[2,16,16,128], index: 0, kind: input, shape index: {}]   ;;  %s4697_s1 = inlined_call_operand.hbm [shape: f32[9,128], index: 1, kind: input, shape index: {}]   ;;  %s4698_s2 = inlined_call_operand.vmem [shape: f32[1,128], index: 2, kind: input, shape index: {}]   ;;  %s4699_s3 = inlined_call_operand.hbm [shape: f32[9,128], index: 3, kind: input, shape index: {}]   ;;  %s4700_s4 = inlined_call_operand.vmem [shape: f32[1,128], index: 4, kind: input, shape index: {}]   ;;  %s4701_s5 = inlined_call_operand.hbm [shape: f32[2,16,16,128], index: 5, kind: output, shape index: {}]  }
   0x1   :  { %12 = vsyncpa [#allocation4 + $0x1], 0 }
   0x2   :  { %13 = vsyncpa [#allocation7], 0 }
   0x3   :  { %14 = vsyncpa [#allocation5], 0 }
   0x4   :  { %16 = vsyncpa [#allocation5 + $0x1], 0  ;;  %s3086_s18 = smov 0   ;;  %s3088_s19 = smov 0  }
   0x5   :  { %s3090_s20 = smov 0   ;;  %s3092_s21 = smov 0  }
   0x6 LB: > { %s3107_s22 = sadd.s32 4294967295, %s3045_s21   ;;  %s2682_s23 = sadd.s32 4294967294, %s3045_s21   ;;  %s3045_s21 = sphi %s3092_s21, %s4812_s21   ;;  %s3041_s20 = sphi %s3090_s20, %s4811_s20   ;;  %s3037_s19 = sphi %s3088_s19, %s4810_s19   ;;  %s3033_s18 = sphi %s3086_s18, %s4809_s18  }
   0x7   : > { %p42_p0 = scmp.ne.s32.totalorder %s3037_s19, %s3033_s18  ;;  %p4702_p1 = scmp.eq.s32.totalorder %s3107_s22, 0 }
   0x8   : > { %p156_p3 = scmp.eq.s32.totalorder %s2682_s23, 1  ;;  %p2683_p5 = scmp.ge.s32.totalorder %s3045_s21, 1 }
   0x9   : > { %p3116_p4 = por %p4702_p1, %p42_p0  ;;  %p163_p7 = scmp.lt.s32.totalorder %s3045_s21, 3 }
   0xa   : > { %p3121_p6 = por %p156_p3, %p42_p0  ;;  %s3047_s27 = smov [#allocation6]  }
   0xb   : > { %s4722_s24 = scalar_select %p3116_p4, 1, 0 }
   0xc   : > { %s4723_s25 = scalar_select %p3121_p6, 1, 0 }
   0xd   : > { %p3126_p8 = pnand %p2683_p5, %p163_p7  ;;  %s175_s28 = sshll.u32 %s3047_s27, 4  ;;  %s3130_s28 = int_to_ptr.vmem [resolvable:$true] %s175_s28 }
   0xe   : > { %s3048_s30 = smov [#allocation8]   ;;  %s2889_s9 = scalar_lea.hbm %s4697_s1, 256 }
   0xf   : > { %p2734_p9 = pneg %p3126_p8  ;;  %s191_s6 = sshll.u32 %s3048_s30, 4  ;;  %s3141_s6 = int_to_ptr.vmem [resolvable:$true] %s191_s6 }
  0x10   : > { %p2890_p12 = scmp.ne.s32.totalorder %s4697_s1, %s2889_s9  ;;  %p2896_p5 = scmp.lt.u32.totalorder %s2889_s9, %s4697_s1 }
  0x11   : > { %p3137_p11 = pnand %p2734_p9, %p4702_p1 }
  0x13   : > { %p2891_p13 = pneg %p3137_p11 }
  0x15   : > { %p2892_p0 = pnand %p2891_p13, %p2890_p12 }
  0x17   : > { %p2893_p3 = pneg %p2892_p0 }
  0x19   : > { %p2898_p7 = pnand %p2896_p5, %p2893_p3 }
  0x1b   : > { %2901 = shalt.err (!%p2898_p7)
}
  0x1c   : > { %s2902_s14 = scalar_lea.vmem %s3130_s28, 256  ;;  %p2910_p2 = scmp.lt.s32.totalorder %s3130_s28, %s3130_s28 }
  0x1d   : > { %p2903_p9 = scmp.ne.s32.totalorder %s3130_s28, %s2902_s14  ;;  %p2911_p12 = scmp.lt.s32.totalorder %s2902_s14, %s2902_s14 }
  0x1f   : > { %p2905_p10 = pnand %p2903_p9, %p2891_p13  ;;  %p2912_p0 = por %p2911_p12, %p2910_p2 }
  0x21   : > { %p2906_p1 = pneg %p2905_p10 }
  0x23   : > { %p2913_p6 = pnand %p2912_p0, %p2906_p1 }
  0x25   : > { %2916 = shalt.err (!%p2913_p6)
}
  0x26   : > { %s3049_s15 = smov 128   ;;  %s3050_s16 = smov 8  }
  0x27   : > { %2737 = dma.hbm_to_vmem [thread:$0]  (!%p3137_p11), %s4697_s1, 256, %s3130_s28, [#allocation7], %s3049_s15, %s3049_s15, %s3050_s16  }
  0x28   : > { %s2917_s7 = scalar_lea.hbm %s4699_s3, 256 }
  0x29   : > { %p2918_p1 = scmp.ne.s32.totalorder %s4699_s3, %s2917_s7  ;;  %p2924_p10 = scmp.lt.u32.totalorder %s2917_s7, %s4699_s3 }
  0x2b   : > { %p2920_p2 = pnand %p2918_p1, %p2891_p13 }
  0x2d   : > { %p2921_p6 = pneg %p2920_p2 }
  0x2f   : > { %p2926_p3 = pnand %p2924_p10, %p2921_p6 }
  0x31   : > { %2929 = shalt.err (!%p2926_p3)
}
  0x32   : > { %s2930_s28 = scalar_lea.vmem %s3141_s6, 256  ;;  %p2938_p12 = scmp.lt.s32.totalorder %s3141_s6, %s3141_s6 }
  0x33   : > { %p2931_p5 = scmp.ne.s32.totalorder %s3141_s6, %s2930_s28  ;;  %p2939_p0 = scmp.lt.s32.totalorder %s2930_s28, %s2930_s28 }
  0x35   : > { %p2933_p7 = pnand %p2931_p5, %p2891_p13  ;;  %p2940_p1 = por %p2939_p0, %p2938_p12 }
  0x37   : > { %p2934_p9 = pneg %p2933_p7 }
  0x39   : > { %p2941_p2 = pnand %p2940_p1, %p2934_p9 }
  0x3b   : > { %2944 = shalt.err (!%p2941_p2)
}
  0x3c   : > { %2740 = dma.hbm_to_vmem [thread:$0]  (!%p3137_p11), %s4699_s3, 256, %s3141_s6, [#allocation7], %s3049_s15, %s3049_s15, %s3050_s16  }
  0x3d   : > { %s3202_s29 = sadd.s32 1, %s3045_s21   ;;  %s29_s14 = sadd.s32 1, %s3041_s20 }
  0x3e   : > { %s26_s17 = ssub.s32 %s3045_s21, %s3202_s29  ;;  %p36_p13 = scmp.ne.s32.totalorder %s3041_s20, %s3037_s19 }
  0x3f   : > { %p27_p6 = scmp.eq.s32.totalorder %s26_s17, 0  ;;  %p37_p10 = scmp.eq.s32.totalorder %s3045_s21, 0 }
  0x40   : > { %p4726_p3 = scmp.eq.s32.totalorder %s3107_s22, 1  ;;  %p2751_p7 = scmp.lt.s32.totalorder %s3045_s21, 2 }
  0x41   : > { %s3218_s27 = scalar_select %p27_p6, %s3041_s20, %s29_s14  }
  0x42   : > { %p3212_p5 = por %p4726_p3, %p36_p13  ;;  %p38_p9 = por %p37_p10, %p36_p13 }
  0x43   : > { %s208_s30 = sand.u32 1, %s3041_s20   ;;  %s2720_s6 = sshll.u32 %s3045_s21, 12 }
  0x44   : > { %s4727_s23 = scalar_select %p3212_p5, 1, 0 }
  0x45   : > { %s2687_s7 = sshll.u32 %s208_s30, 8  ;;  %s3225_s10 = scalar_lea.hbm %s4696_s0, %s2720_s6 }
  0x46   : > { %s212_s11 = scalar_lea.vmem [#allocation3], %s2687_s7  ;;  %p3229_p11 = pnand %p2751_p7, %p38_p9 }
  0x47   : > { %s219_s28 = sshll.u32 %s212_s11, 4  ;;  %s3233_s13 = scalar_lea.sflag [#allocation4], %s208_s30  ;;  %s3227_s28 = int_to_ptr.vmem [resolvable:$true] %s219_s28 }
  0x48   : > { %s2945_s14 = scalar_lea.hbm %s3225_s10, 4096  ;;  %p2947_p0 = pneg %p3229_p11 }
  0x49   : > { %p2946_p12 = scmp.ne.s32.totalorder %s3225_s10, %s2945_s14  ;;  %s2950_s6 = scalar_lea.hbm %s4696_s0, 8192 }
  0x4a   : > { %p2951_p13 = scmp.lt.u32.totalorder %s3225_s10, %s4696_s0  ;;  %p2952_p6 = scmp.lt.u32.totalorder %s2950_s6, %s2945_s14 }
  0x4b   : > { %p2948_p1 = pnand %p2947_p0, %p2946_p12  ;;  %p2954_p3 = scmp.lt.u32.totalorder %s2945_s14, %s3225_s10 }
  0x4c   : > { %p2953_p10 = por %p2952_p6, %p2951_p13 }
  0x4d   : > { %p2949_p2 = pneg %p2948_p1 }
  0x4e   : > { %p2955_p7 = por %p2954_p3, %p2953_p10 }
  0x50   : > { %p2956_p9 = pnand %p2955_p7, %p2949_p2 }
  0x52   : > { %2959 = shalt.err (!%p2956_p9)
}
  0x53   : > { %s2960_s30 = scalar_lea.vmem %s3227_s28, 4096  ;;  %s3051_s11 = smov [#allocation3]  }
  0x54   : > { %p2961_p12 = scmp.ne.s32.totalorder %s3227_s28, %s2960_s30  ;;  %s2965_s17 = sshll.u32 %s3051_s11, 4  ;;  %s2966_s17 = int_to_ptr.vmem [resolvable:$false] %s2965_s17 }
  0x55   : > { %s2967_s7 = scalar_lea.vmem %s2966_s17, 8192  ;;  %p2968_p4 = scmp.lt.s32.totalorder %s3227_s28, %s2966_s17 }
  0x56   : > { %p2963_p1 = pnand %p2961_p12, %p2947_p0  ;;  %p2969_p13 = scmp.lt.s32.totalorder %s2967_s7, %s2960_s30 }
  0x58   : > { %p2964_p5 = pneg %p2963_p1  ;;  %p2970_p6 = por %p2969_p13, %p2968_p4 }
  0x5a   : > { %p2971_p10 = pnand %p2970_p6, %p2964_p5 }
  0x5c   : > { %2974 = shalt.err (!%p2971_p10)
}
  0x5d   : > { %2744 = dma.hbm_to_vmem [thread:$0]  (!%p3229_p11), %s3225_s10, 4096, %s3227_s28, %s3233_s13, %s3049_s15, %s3049_s15, %s3050_s16  }
  0x5e   : > { %231 = sbr.rel (%p3126_p8) target bundleno = 524 (0x20c), region = 40 }
  0x65   : > { %s3267_s14 = sand.u32 1, %s3037_s19   ;;  %p4729_p4 = scmp.ne.s32.totalorder %s4722_s24, 0 }
  0x66   : > { %s2691_s6 = sshll.u32 %s3267_s14, 8  ;;  %s234_s8 = scalar_lea.sflag [#allocation4], %s3267_s14 }
  0x67   : > { %s3273_s12 = scalar_lea.vmem [#allocation3], %s2691_s6 }
  0x68   : > { %3020 = dma.done.wait (%p4729_p4), %s234_s8, 4096  }
  0x69   : > { %3022 = vsyncadd (%p4729_p4), %s234_s8, 4294963200  ;;  %p4730_p5 = scmp.eq.s32.totalorder %s3107_s22, 0 }
  0x6b   : > { %3024 = dma.done.wait (%p4730_p5), [#allocation7], 512   ;;  %p4731_p8 = pmov %p4730_p5 }
  0x6c   : > { %v3052_v0 = vmov 0.0   ;;  %v3283_v1 = vld [vmem:[#allocation6] ss:$0 sm:$0xff]  ;;  %v3285_v2 = vld [vmem:[#allocation6 + $0x1] ss:$0 sm:$0xff]  ;;  %v327_v17 = vld [vmem:[%s3273_s12 + $0x8] sm:$0xff] }
  0x6d   : > { %3026 = vsyncadd (%p4731_p8), [#allocation7], 4294966784  ;;  %272 = vst [vmem:[#allocation2] sm:$0xff] %v3052_v0  ;;  %v3287_v3 = vld [vmem:[#allocation6 + $0x2] ss:$0 sm:$0xff]  ;;  %v428_v4 = vmul.f32 0.0, %v3283_v1 }
  0x6e   : > { %273 = vst [vmem:[#allocation2 + $0x8] sm:$0xff] %v3052_v0  ;;  %274 = vst [vmem:[#allocation2 + $0x10] sm:$0x3] %v3052_v0  ;;  %v326_v13 = vld [vmem:[%s3273_s12] sm:$0xff]  ;;  %v328_v18 = vld [vmem:[%s3273_s12 + $0x10] sm:$0xff]  ;;  %s4279_s13 = scalar_lea.vmem [#allocation9], %s2691_s6 }
  0x6f   : > { %275 = vst [vmem:[#allocation2 + $0x18] sm:$0xff] %v3052_v0  ;;  %276 = vst [vmem:[#allocation2 + $0x20] sm:$0xff] %v3052_v0  ;;  %v3297_v21 = vld [vmem:[#allocation6 + $0x7] ss:$0 sm:$0xff]  ;;  %v3300_v22 = vmul.f32 %v3285_v2, %v328_v18  ;;  %v3302_v23 = vld [vmem:[#allocation6 + $0x4] ss:$0 sm:$0xff] }
  0x70   : > { %277 = vst [vmem:[#allocation2 + $0x28] sm:$0x3] %v3052_v0  ;;  %278 = vst [vmem:[#allocation2 + $0x30] sm:$0xff] %v3052_v0  ;;  %v3304_v24 = vld [vmem:[#allocation6 + $0x6] ss:$0 sm:$0xff]  ;;  %v329_v25 = vld [vmem:[%s3273_s12 + $0x18] sm:$0xff]  ;;  %v3312_v28 = vmul.f32 %v3302_v23, %v328_v18  ;;  %v3315_v29 = vmul.f32 %v3297_v21, %v328_v18 }
  0x71   : > { %279 = vst [vmem:[#allocation2 + $0x38] sm:$0xff] %v3052_v0  ;;  %280 = vst [vmem:[#allocation2 + $0x40] sm:$0x3] %v3052_v0  ;;  %v330_v30 = vld [vmem:[%s3273_s12 + $0x20] sm:$0xff]  ;;  %v331_v31 = vld [vmem:[%s3273_s12 + $0x28] sm:$0xff]  ;;  %v3321_v33 = vmul.f32 0.0, %v3304_v24  ;;  %v3330_v36 = vmul.f32 %v3285_v2, %v329_v25  ;;  %v3339_v41 = vmul.f32 %v3302_v23, %v329_v25  ;;  %v3342_v42 = vmul.f32 %v3297_v21, %v329_v25 }
  0x72   : > { %281 = vst [vmem:[#allocation2 + $0x48] sm:$0xff] %v3052_v0  ;;  %282 = vst [vmem:[#allocation2 + $0x50] sm:$0xff] %v3052_v0  ;;  %v332_v32 = vld [vmem:[%s3273_s12 + $0x30] sm:$0xff]  ;;  %v3332_v37 = vld [vmem:[#allocation6 + $0x8] ss:$0 sm:$0xff]  ;;  %v3348_v44 = vmul.f32 %v3285_v2, %v330_v30  ;;  %v3356_v48 = vmul.f32 %v3302_v23, %v330_v30  ;;  %v3359_v49 = vmul.f32 %v3297_v21, %v330_v30  ;;  %s2721_s11 = sshll.u32 %s3107_s22, 12 }
  0x73   : > { %283 = vst [vmem:[#allocation2 + $0x58] sm:$0x3] %v3052_v0  ;;  %284 = vst [vmem:[#allocation2 + $0x60] sm:$0xff] %v3052_v0  ;;  %v333_v38 = vld [vmem:[%s3273_s12 + $0x38] sm:$0xff]  ;;  %v334_v39 = vld [vmem:[%s3273_s12 + $0x40] sm:$0xff]  ;;  %v3362_v50 = vmul.f32 %v3285_v2, %v331_v31  ;;  %v3365_v51 = vmul.f32 %v3302_v23, %v331_v31  ;;  %v3378_v55 = vmul.f32 %v3297_v21, %v331_v31  ;;  %s2590_s17 = sshll.u32 %s4279_s13, 4  ;;  %s4649_s8 = scalar_lea.hbm %s4701_s5, %s2721_s11  ;;  %s4651_s17 = int_to_ptr.vmem [resolvable:$true] %s2590_s17 }
  0x74   : > { %285 = vst [vmem:[#allocation2 + $0x68] sm:$0xff] %v3052_v0  ;;  %286 = vst [vmem:[#allocation2 + $0x70] sm:$0x3] %v3052_v0  ;;  %v3336_v40 = vld [vmem:[#allocation6 + $0x3] ss:$0 sm:$0xff]  ;;  %v335_v45 = vld [vmem:[%s3273_s12 + $0x48] sm:$0xff]  ;;  %v3381_v56 = vmul.f32 %v3285_v2, %v332_v32  ;;  %v3384_v57 = vmul.f32 %v3302_v23, %v332_v32  ;;  %v3387_v58 = vmul.f32 %v3297_v21, %v332_v32 }
  0x75   : > { %287 = vst [vmem:[#allocation2 + $0x78] sm:$0xff] %v3052_v0  ;;  %288 = vst [vmem:[#allocation2 + $0x80] sm:$0xff] %v3052_v0  ;;  %v460_v5 = vld [vmem:[#allocation2 + $0x1] sm:$0xff]  ;;  %v461_v6 = vld [vmem:[#allocation2 + $0x9] sm:$0xff]  ;;  %s2975_s24 = scalar_lea.vmem %s4651_s17, 4096  ;;  %p4806_p0 = scmp.ne.s32.totalorder %s4727_s23, 0 }
  0x76   : > { %289 = vst [vmem:[#allocation2 + $0x88] sm:$0x3] %v3052_v0  ;;  %290 = vst [vmem:[#allocation2 + $0x90] sm:$0xff] %v3052_v0  ;;  %v561_v7 = vld [vmem:[#allocation2 + $0x2] sm:$0xff]  ;;  %v497_v8 = vmul.f32 %v3285_v2, %v460_v5  ;;  %v498_v9 = vmul.f32 %v3285_v2, %v461_v6  ;;  %v562_v10 = vld [vmem:[#allocation2 + $0xa] sm:$0xff]  ;;  %v3410_v5 = vmul.f32 %v3297_v21, %v333_v38  ;;  %p2976_p11 = scmp.ne.s32.totalorder %s4651_s17, %s2975_s24  ;;  %s3053_s22 = smov [#allocation9]  }
  0x77   : > { %291 = vst [vmem:[#allocation2 + $0x98] sm:$0xff] %v3052_v0  ;;  %292 = vst [vmem:[#allocation2 + $0xa0] sm:$0x3] %v3052_v0  ;;  %v598_v11 = vmul.f32 %v3287_v3, %v561_v7  ;;  %v599_v12 = vmul.f32 %v3287_v3, %v562_v10  ;;  %v336_v46 = vld [vmem:[%s3273_s12 + $0x50] sm:$0xff]  ;;  %v3353_v47 = vld [vmem:[%s3273_s12 + $0x58] sm:$0xff]  ;;  %v3413_v6 = vmul.f32 %v3285_v2, %v334_v39  ;;  %s2979_s26 = sshll.u32 %s3053_s22, 4  ;;  %s2980_s26 = int_to_ptr.vmem [resolvable:$false] %s2979_s26 }
  0x78   : > { %293 = vst [vmem:[#allocation2 + $0xa8] sm:$0xff] %v3052_v0  ;;  %294 = vst [vmem:[#allocation2 + $0xb0] sm:$0xff] %v3052_v0  ;;  %v529_v14 = vadd.f32 %v497_v8, %v428_v4  ;;  %v530_v15 = vadd.f32 %v498_v9, %v428_v4  ;;  %v3369_v52 = vld [vmem:[%s3273_s12 + $0x60] sm:$0xff]  ;;  %v3372_v53 = vld [vmem:[%s3273_s12 + $0x68] sm:$0xff]  ;;  %v3407_v4 = vmul.f32 %v3302_v23, %v333_v38  ;;  %p2977_p2 = pnand %p2976_p11, %p4806_p0  ;;  %s2981_s15 = scalar_lea.vmem %s2980_s26, 8192 }
  0x79   : > { %295 = vst [vmem:[#allocation2 + $0xb8] sm:$0x3] %v3052_v0  ;;  %296 = vst [vmem:[#allocation2 + $0xc0] sm:$0xff] %v3052_v0  ;;  %v3375_v54 = vld [vmem:[%s3273_s12 + $0x70] sm:$0xff]  ;;  %v3393_v59 = vld [vmem:[%s3273_s12 + $0x78] sm:$0xff]  ;;  %v3426_v10 = vmul.f32 %v3302_v23, %v334_v39  ;;  %p2982_p7 = scmp.lt.s32.totalorder %s4651_s17, %s2980_s26  ;;  %p2983_p9 = scmp.lt.s32.totalorder %s2981_s15, %s2975_s24 }
  0x7a   : > { %297 = vst [vmem:[#allocation2 + $0xc8] sm:$0xff] %v3052_v0  ;;  %298 = vst [vmem:[#allocation2 + $0xd0] sm:$0x3] %v3052_v0  ;;  %v3307_v26 = vadd.f32 %v598_v11, %v529_v14  ;;  %v3309_v27 = vadd.f32 %v599_v12, %v530_v15  ;;  %v3396_v60 = vld [vmem:[%s3273_s12 + $0x80] sm:$0xff]  ;;  %v3399_v61 = vld [vmem:[%s3273_s12 + $0x88] sm:$0xff]  ;;  %v3429_v11 = vmul.f32 %v3297_v21, %v334_v39  ;;  %p2978_p3 = pneg %p2977_p2 }
  0x7b   : > { %299 = vst [vmem:[#allocation2 + $0xd8] sm:$0xff] %v3052_v0  ;;  %300 = vst [vmem:[#allocation2 + $0xe0] sm:$0xff] %v3052_v0  ;;  %v3401_v63 = vld [vmem:[#allocation6 + $0x5] ss:$0 sm:$0xff]  ;;  %v3419_v7 = vld [vmem:[%s3273_s12 + $0x90] sm:$0xff]  ;;  %v3432_v12 = vmul.f32 %v3285_v2, %v335_v45  ;;  %p2984_p12 = por %p2983_p9, %p2982_p7 }
  0x7c   : > { %301 = vst [vmem:[#allocation2 + $0xe8] sm:$0x3] %v3052_v0  ;;  %302 = vst [vmem:[#allocation2 + $0xf0] sm:$0xff] %v3052_v0  ;;  %v3422_v8 = vld [vmem:[%s3273_s12 + $0x98] sm:$0xff]  ;;  %v3440_v14 = vld [vmem:[%s3273_s12 + $0xa8] sm:$0xff] }
  0x7d   : > { %303 = vst [vmem:[#allocation2 + $0xf8] sm:$0xff] %v3052_v0  ;;  %304 = vst [vmem:[#allocation2 + $0x100] sm:$0x3] %v3052_v0  ;;  %v3443_v15 = vld [vmem:[%s3273_s12 + $0xb0] sm:$0xff]  ;;  %p2985_p1 = pnand %p2984_p12, %p2978_p3 }
  0x7e   : > { %305 = vst [vmem:[#allocation2 + $0x108] sm:$0xff] %v3052_v0  ;;  %306 = vst [vmem:[#allocation2 + $0x110] sm:$0xff] %v3052_v0 }
  0x7f   : > { %307 = vst [vmem:[#allocation2 + $0x118] sm:$0x3] %v3052_v0  ;;  %308 = vst [vmem:[#allocation2 + $0x120] sm:$0xff] %v3052_v0 }
  0x80   : > { %309 = vst [vmem:[#allocation2 + $0x128] sm:$0xff] %v3052_v0  ;;  %310 = vst [vmem:[#allocation2 + $0x130] sm:$0x3] %v3052_v0 }
  0x81   : > { %311 = vst [vmem:[#allocation2 + $0x138] sm:$0xff] %v3052_v0  ;;  %312 = vst [vmem:[#allocation2 + $0x140] sm:$0xff] %v3052_v0 }
  0x82   : > { %313 = vst [vmem:[#allocation2 + $0x148] sm:$0x3] %v3052_v0  ;;  %314 = vst [vmem:[#allocation2 + $0x150] sm:$0xff] %v3052_v0 }
  0x83   : > { %315 = vst [vmem:[#allocation2 + $0x158] sm:$0xff] %v3052_v0  ;;  %316 = vst [vmem:[#allocation2 + $0x160] sm:$0x3] %v3052_v0 }
  0x84   : > { %317 = vst [vmem:[#allocation2 + $0x168] sm:$0xff] %v3052_v0  ;;  %318 = vst [vmem:[#allocation2 + $0x170] sm:$0xff] %v3052_v0 }
  0x85   : > { %319 = vst [vmem:[#allocation2 + $0x178] sm:$0x3] %v3052_v0  ;;  %320 = vst [vmem:[#allocation2 + $0x180] sm:$0xff] %v3052_v0 }
  0x86   : > { %321 = vst [vmem:[#allocation2 + $0x188] sm:$0xff] %v3052_v0  ;;  %322 = vst [vmem:[#allocation2 + $0x190] sm:$0x3] %v3052_v0 }
  0x87   : > { %323 = vst [vmem:[#allocation2 + $0x198] sm:$0xff] %v3052_v0  ;;  %324 = vst [vmem:[#allocation2 + $0x1a0] sm:$0xff] %v3052_v0 }
  0x88   : > { %325 = vst [vmem:[#allocation2 + $0x1a8] sm:$0x3] %v3052_v0  ;;  %359 = vst [vmem:[#allocation2 + $0x19] sm:$0xff] %v326_v13  ;;  %v3404_v0 = vmul.f32 %v3285_v2, %v333_v38  ;;  %v3437_v13 = vld [vmem:[%s3273_s12 + $0xa0] sm:$0xff] }
  0x89   : > { %360 = vst [vmem:[#allocation2 + $0x21] sm:$0xff] %v327_v17  ;;  %361 = vst [vmem:[#allocation2 + $0x31] sm:$0xff] %v328_v18 }
  0x8a   : > { %4732 = vst [vmem:[#allocation13_spill] sm:$0xff] %v3312_v28  ;;  %4733 = vst [vmem:[#allocation14_spill] sm:$0xff] %v3315_v29 }
  0x8b   : > { %362 = vst [vmem:[#allocation2 + $0x39] sm:$0xff] %v329_v25  ;;  %4734 = vst [vmem:[#allocation15_spill] sm:$0xff] %v3321_v33  ;;  %v3452_v25 = vmul.f32 %v3302_v23, %v335_v45 }
  0x8c   : > { %363 = vst [vmem:[#allocation2 + $0x49] sm:$0xff] %v330_v30  ;;  %364 = vst [vmem:[#allocation2 + $0x51] sm:$0xff] %v331_v31  ;;  %v3455_v30 = vmul.f32 %v3297_v21, %v335_v45 }
  0x8d   : > { %365 = vst [vmem:[#allocation2 + $0x61] sm:$0xff] %v332_v32  ;;  %4737 = vst [vmem:[#allocation18_spill] sm:$0xff] %v3339_v41 }
  0x8e   : > { %v1097_v16 = vld [vmem:[#allocation2 + $0x199] sm:$0xff]  ;;  %4738 = vst [vmem:[#allocation19_spill] sm:$0xff] %v3342_v42  ;;  %366 = vst [vmem:[#allocation2 + $0x69] sm:$0xff] %v333_v38 }
  0x8f   : > { %v1098_v19 = vld [vmem:[#allocation2 + $0x1a1] sm:$0xff]  ;;  %v3324_v34 = vmul.f32 %v3297_v21, %v1097_v16  ;;  %367 = vst [vmem:[#allocation2 + $0x79] sm:$0xff] %v334_v39  ;;  %4740 = vst [vmem:[#allocation21_spill] sm:$0xff] %v3359_v49 }
  0x90   : > { %v1198_v20 = vld [vmem:[#allocation2 + $0x19a] sm:$0xff]  ;;  %v3327_v35 = vmul.f32 %v3297_v21, %v1098_v19  ;;  %368 = vst [vmem:[#allocation2 + $0x81] sm:$0xff] %v335_v45  ;;  %369 = vst [vmem:[#allocation2 + $0x91] sm:$0xff] %v336_v46  ;;  %v395_v62 = vld [vmem:[#allocation2 + $0x30] sm:$0xff] }
  0x91   : > { %4735 = vst [vmem:[#allocation16_spill] sm:$0xff] %v3324_v34  ;;  %v3345_v43 = vmul.f32 %v3332_v37, %v1198_v20  ;;  %370 = vst [vmem:[#allocation2 + $0x99] sm:$0xff] %v3353_v47  ;;  %v432_v9 = vmul.f32 %v3283_v1, %v395_v62  ;;  %v3446_v16 = vmul.f32 %v3336_v40, %v395_v62 }
  0x92   : > { %4736 = vst [vmem:[#allocation17_spill] sm:$0xff] %v3327_v35  ;;  %4741 = vst [vmem:[#allocation22_spill] sm:$0xff] %v3378_v55  ;;  %v3449_v17 = vmul.f32 %v3304_v24, %v395_v62  ;;  %v396_v18 = vld [vmem:[#allocation2 + $0x38] sm:$0xff]  ;;  %v3464_v35 = vmul.f32 %v3285_v2, %v336_v46  ;;  %v3471_v34 = vmul.f32 %v3302_v23, %v336_v46 }
  0x93   : > { %4739 = vst [vmem:[#allocation20_spill] sm:$0xff] %v3345_v43  ;;  %371 = vst [vmem:[#allocation2 + $0xa9] sm:$0xff] %v3369_v52  ;;  %v565_v19 = vld [vmem:[#allocation2 + $0x32] sm:$0xff]  ;;  %v566_v20 = vld [vmem:[#allocation2 + $0x3a] sm:$0xff]  ;;  %v533_v31 = vadd.f32 %v3300_v22, %v432_v9  ;;  %v433_v32 = vmul.f32 %v3283_v1, %v396_v18  ;;  %v3468_v43 = vmul.f32 %v3336_v40, %v396_v18 }
  0x94   : > { %372 = vst [vmem:[#allocation2 + $0xb1] sm:$0xff] %v3372_v53  ;;  %373 = vst [vmem:[#allocation2 + $0xc1] sm:$0xff] %v3375_v54  ;;  %v602_v38 = vmul.f32 %v3287_v3, %v565_v19  ;;  %v397_v39 = vld [vmem:[#allocation2 + $0x48] sm:$0xff]  ;;  %v398_v62 = vld [vmem:[#allocation2 + $0x50] sm:$0xff]  ;;  %v603_v45 = vmul.f32 %v3287_v3, %v566_v20  ;;  %v3474_v55 = vmul.f32 %v3297_v21, %v336_v46 }
  0x95   : > { %374 = vst [vmem:[#allocation2 + $0xc9] sm:$0xff] %v3393_v59  ;;  %375 = vst [vmem:[#allocation2 + $0xd9] sm:$0xff] %v3396_v60  ;;  %v534_v22 = vadd.f32 %v3330_v36, %v433_v32  ;;  %v3478_v33 = vmul.f32 %v3401_v63, %v565_v19  ;;  %v3481_v42 = vmul.f32 %v3401_v63, %v566_v20  ;;  %v567_v41 = vld [vmem:[#allocation2 + $0x4a] sm:$0xff] }
  0x96   : > { %376 = vst [vmem:[#allocation2 + $0xe1] sm:$0xff] %v3399_v61  ;;  %377 = vst [vmem:[#allocation2 + $0xf1] sm:$0xff] %v3419_v7  ;;  %v634_v9 = vadd.f32 %v602_v38, %v533_v31  ;;  %v3484_v29 = vmul.f32 %v3304_v24, %v396_v18  ;;  %v703_v49 = vmul.f32 %v3336_v40, %v397_v39 }
  0x97   : > { %378 = vst [vmem:[#allocation2 + $0xf9] sm:$0xff] %v3422_v8  ;;  %4742 = vst [vmem:[#allocation23_spill] sm:$0xff] %v3446_v16  ;;  %v435_v46 = vmul.f32 %v3283_v1, %v398_v62  ;;  %v635_v28 = vadd.f32 %v603_v45, %v534_v22  ;;  %v3490_v36 = vmul.f32 %v3332_v37, %v565_v19 }
  0x98   : > { %4743 = vst [vmem:[#allocation24_spill] sm:$0xff] %v3449_v17  ;;  %379 = vst [vmem:[#allocation2 + $0x109] sm:$0xff] %v3437_v13  ;;  %v568_v17 = vld [vmem:[#allocation2 + $0x52] sm:$0xff]  ;;  %v3493_v31 = vmul.f32 %v3332_v37, %v566_v20  ;;  %v704_v32 = vmul.f32 %v3336_v40, %v398_v62  ;;  %v735_v18 = vadd.f32 %v703_v49, %v634_v9  ;;  %v400_v20 = vld [vmem:[#allocation2 + $0x68] sm:$0xff] }
  0x99   : > { %380 = vst [vmem:[#allocation2 + $0x111] sm:$0xff] %v3440_v14  ;;  %381 = vst [vmem:[#allocation2 + $0x121] sm:$0xff] %v3443_v15  ;;  %v3500_v16 = vmul.f32 %v3304_v24, %v397_v39  ;;  %v605_v45 = vmul.f32 %v3287_v3, %v568_v17  ;;  %v905_v22 = vmul.f32 %v3401_v63, %v567_v41 }
  0x9a   : > { %4744 = vst [vmem:[#allocation25_spill] sm:$0xff] %v3468_v43  ;;  %4745 = vst [vmem:[#allocation26_spill] sm:$0xff] %v3478_v33  ;;  %v434_v43 = vmul.f32 %v3283_v1, %v397_v39  ;;  %v399_v33 = vld [vmem:[#allocation2 + $0x60] sm:$0xff]  ;;  %v736_v19 = vadd.f32 %v704_v32, %v635_v28  ;;  %v3513_v32 = vmul.f32 %v3332_v37, %v567_v41 }
  0x9b   : > { %4746 = vst [vmem:[#allocation27_spill] sm:$0xff] %v3481_v42  ;;  %4747 = vst [vmem:[#allocation28_spill] sm:$0xff] %v3484_v29  ;;  %v536_v42 = vadd.f32 %v3362_v50, %v435_v46  ;;  %v604_v29 = vmul.f32 %v3287_v3, %v567_v41  ;;  %v436_v39 = vmul.f32 %v3283_v1, %v399_v33  ;;  %v569_v46 = vld [vmem:[#allocation2 + $0x62] sm:$0xff] }
  0x9c   : > { %4748 = vst [vmem:[#allocation29_spill] sm:$0xff] %v3490_v36  ;;  %4749 = vst [vmem:[#allocation30_spill] sm:$0xff] %v3493_v31  ;;  %v535_v38 = vadd.f32 %v3348_v44, %v434_v43  ;;  %v836_v31 = vadd.f32 %v3356_v48, %v735_v18  ;;  %v906_v43 = vmul.f32 %v3401_v63, %v568_v17 }
  0x9d   : > { %v3507_v44 = vmul.f32 %v3304_v24, %v398_v62  ;;  %v637_v49 = vadd.f32 %v605_v45, %v536_v42  ;;  %v837_v50 = vadd.f32 %v3365_v51, %v736_v19  ;;  %v705_v9 = vmul.f32 %v3336_v40, %v399_v33  ;;  %4751 = vst [vmem:[#allocation32_spill] sm:$0xff] %v3513_v32  ;;  %v570_v51 = vld [vmem:[#allocation2 + $0x6a] sm:$0xff]  ;;  %v401_v19 = vld [vmem:[#allocation2 + $0x78] sm:$0xff] }
  0x9e   : > { %v636_v36 = vadd.f32 %v604_v29, %v535_v38  ;;  %v937_v28 = vadd.f32 %v905_v22, %v836_v31  ;;  %v1007_v48 = vmul.f32 %v3304_v24, %v399_v33  ;;  %v437_v29 = vmul.f32 %v3283_v1, %v400_v20  ;;  %v571_v32 = vld [vmem:[#allocation2 + $0x7a] sm:$0xff] }
  0x9f   : > { %4750 = vst [vmem:[#allocation31_spill] sm:$0xff] %v3507_v44  ;;  %v938_v38 = vadd.f32 %v906_v43, %v837_v50  ;;  %v537_v42 = vadd.f32 %v3381_v56, %v436_v39  ;;  %v706_v18 = vmul.f32 %v3336_v40, %v400_v20  ;;  %v3520_v45 = vmul.f32 %v3332_v37, %v568_v17  ;;  %v402_v50 = vld [vmem:[#allocation2 + $0x80] sm:$0xff]  ;;  %v3528_v39 = vld [vmem:[%s3273_s12 + $0xb8] sm:$0xff]  ;;  %v3531_v17 = vld [vmem:[%s3273_s12 + $0xc0] sm:$0xff] }
  0xa0   : > { %v737_v62 = vadd.f32 %v705_v9, %v636_v36  ;;  %v1039_v31 = vadd.f32 %v1007_v48, %v937_v28  ;;  %v538_v41 = vadd.f32 %v3404_v0, %v437_v29  ;;  %v606_v33 = vmul.f32 %v3287_v3, %v569_v46  ;;  %382 = vst [vmem:[#allocation2 + $0x129] sm:$0xff] %v3528_v39 }
  0xa1   : > { %4752 = vst [vmem:[#allocation33_spill] sm:$0xff] %v3520_v45  ;;  %v738_v43 = vadd.f32 %v706_v18, %v637_v49  ;;  %v907_v56 = vmul.f32 %v3401_v63, %v569_v46  ;;  %v1008_v36 = vmul.f32 %v3304_v24, %v400_v20  ;;  %v607_v9 = vmul.f32 %v3287_v3, %v570_v51  ;;  %v352_v20 = vld [vmem:[%s3273_s12 + $0xd0] sm:$0xff]  ;;  %v353_v49 = vld [vmem:[%s3273_s12 + $0xd8] sm:$0xff] }
  0xa2   : > { %v838_v22 = vadd.f32 %v3384_v57, %v737_v62  ;;  %v1140_v0 = vadd.f32 %v3387_v58, %v1039_v31  ;;  %v638_v28 = vadd.f32 %v606_v33, %v537_v42  ;;  %v1209_v48 = vmul.f32 %v3332_v37, %v569_v46  ;;  %383 = vst [vmem:[#allocation2 + $0x139] sm:$0xff] %v3531_v17  ;;  %v351_v57 = vld [vmem:[%s3273_s12 + $0xc8] sm:$0xff]  ;;  %v354_v31 = vld [vmem:[%s3273_s12 + $0xe0] sm:$0xff] }
  0xa3   : > { %v839_v29 = vadd.f32 %v3407_v4, %v738_v43  ;;  %v1040_v18 = vadd.f32 %v1008_v36, %v938_v38  ;;  %v438_v58 = vmul.f32 %v3283_v1, %v401_v19  ;;  %384 = vst [vmem:[#allocation2 + $0x141] sm:$0xff] %v351_v57  ;;  %385 = vst [vmem:[#allocation2 + $0x151] sm:$0xff] %v352_v20  ;;  %v355_v42 = vld [vmem:[%s3273_s12 + $0xe8] sm:$0xff]  ;;  %v3553_v43 = vld [vmem:[%s4698_s2] ss:$0 sm:$0xff] }
  0xa4   : > { %v939_v62 = vadd.f32 %v907_v56, %v838_v22  ;;  %386 = vst [vmem:[#allocation2 + $0x159] sm:$0xff] %v353_v49  ;;  %v1241_v33 = vadd.f32 %v1209_v48, %v1140_v0  ;;  %v707_v46 = vmul.f32 %v3336_v40, %v401_v19  ;;  %v1009_v45 = vmul.f32 %v3304_v24, %v401_v19  ;;  %v572_v36 = vld [vmem:[#allocation2 + $0x82] sm:$0xff] }
  0xa5   : > { %v439_v44 = vmul.f32 %v3283_v1, %v402_v50  ;;  %387 = vst [vmem:[#allocation2 + $0x169] sm:$0xff] %v354_v31  ;;  %388 = vst [vmem:[#allocation2 + $0x171] sm:$0xff] %v355_v42  ;;  %v639_v4 = vadd.f32 %v607_v9, %v538_v41  ;;  %v1141_v38 = vadd.f32 %v3410_v5, %v1040_v18 }
  0xa6   : > { %v1210_v22 = vmul.f32 %v3332_v37, %v570_v51  ;;  %v539_v56 = vadd.f32 %v3413_v6, %v438_v58  ;;  %v908_v19 = vmul.f32 %v3401_v63, %v570_v51  ;;  %v1280_v0 = vadd.f32 %v3553_v43, %v1241_v33  ;;  %v403_v33 = vld [vmem:[#allocation2 + $0x90] sm:$0xff] }
  0xa7   : > { %v739_v48 = vadd.f32 %v707_v46, %v638_v28  ;;  %v1041_v57 = vadd.f32 %v1009_v45, %v939_v62  ;;  %v540_v41 = vadd.f32 %v3432_v12, %v439_v44  ;;  %v608_v5 = vmul.f32 %v3287_v3, %v571_v32 }
  0xa8   : > { %v1242_v20 = vadd.f32 %v1210_v22, %v1141_v38  ;;  %v708_v9 = vmul.f32 %v3336_v40, %v402_v50  ;;  %v940_v49 = vadd.f32 %v908_v19, %v839_v29  ;;  %v1344_v18 = vmul.f32 0.044715, %v1280_v0 }
  0xa9   : > { %v1142_v31 = vadd.f32 %v3429_v11, %v1041_v57  ;;  %v609_v6 = vmul.f32 %v3287_v3, %v572_v36  ;;  %v840_v51 = vadd.f32 %v3426_v10, %v739_v48  ;;  %v640_v42 = vadd.f32 %v608_v5, %v539_v56 }
  0xaa   : > { %v1281_v58 = vadd.f32 %v3553_v43, %v1242_v20  ;;  %v740_v28 = vadd.f32 %v708_v9, %v639_v4  ;;  %v3565_v45 = vmul.f32 0.5, %v1280_v0  ;;  %v1376_v62 = vmul.f32 %v1344_v18, %v1280_v0  ;;  %v404_v20 = vld [vmem:[#allocation2 + $0x98] sm:$0xff]  ;;  %v356_v18 = vld [vmem:[%s3273_s12 + $0xf0] sm:$0xff] }
  0xab   : > { %v1010_v12 = vmul.f32 %v3304_v24, %v402_v50  ;;  %v1211_v44 = vmul.f32 %v3332_v37, %v571_v32  ;;  %v641_v46 = vadd.f32 %v609_v6, %v540_v41  ;;  %v909_v11 = vmul.f32 %v3401_v63, %v571_v32  ;;  %v357_v6 = vld [vmem:[%s3273_s12 + $0xf8] sm:$0xff]  ;;  %389 = vst [vmem:[#allocation2 + $0x181] sm:$0xff] %v356_v18  ;;  %s2577_s12 = scalar_lea.sflag [#allocation5], %s3267_s14 }
  0xac   : > { %v1345_v29 = vmul.f32 0.044715, %v1281_v58  ;;  %v910_v38 = vmul.f32 %v3401_v63, %v572_v36  ;;  %v1408_v22 = vmul.f32 %v1376_v62, %v1280_v0  ;;  %v841_v10 = vadd.f32 %v3452_v25, %v740_v28  ;;  %390 = vst [vmem:[#allocation2 + $0x189] sm:$0xff] %v357_v6 }
  0xad   : > { %v1042_v4 = vadd.f32 %v1010_v12, %v940_v49  ;;  %v1243_v56 = vadd.f32 %v1211_v44, %v1142_v31  ;;  %v941_v48 = vadd.f32 %v909_v11, %v840_v51  ;;  %v1212_v50 = vmul.f32 %v3332_v37, %v572_v36 }
  0xae   : > { %v1377_v19 = vmul.f32 %v1345_v29, %v1281_v58  ;;  %v709_v57 = vmul.f32 %v3336_v40, %v403_v33  ;;  %v1440_v5 = vadd.f32 %v1408_v22, %v1280_v0  ;;  %v440_v9 = vmul.f32 %v3283_v1, %v403_v33 }
  0xaf   : > { %v1143_v41 = vadd.f32 %v3455_v30, %v1042_v4  ;;  %v1282_v32 = vadd.f32 %v3553_v43, %v1243_v56  ;;  %v3579_v62 = vmul.f32 0.5, %v1281_v58  ;;  %v1011_v31 = vmul.f32 %v3304_v24, %v403_v33  ;;  %v573_v30 = vld [vmem:[#allocation2 + $0x92] sm:$0xff]  ;;  %v574_v4 = vld [vmem:[#allocation2 + $0x9a] sm:$0xff] }
  0xb0   : > { %v1409_v25 = vmul.f32 %v1377_v19, %v1281_v58  ;;  %v741_v49 = vadd.f32 %v709_v57, %v640_v42  ;;  %v1472_v36 = vmul.f32 0.7978846, %v1440_v5  ;;  %v441_v0 = vmul.f32 %v3283_v1, %v404_v20 }
  0xb1   : > { %v1244_v51 = vadd.f32 %v1212_v50, %v1143_v41  ;;  %v1346_v28 = vmul.f32 0.044715, %v1282_v32  ;;  %v942_v44 = vadd.f32 %v910_v38, %v841_v10  ;;  %v1043_v29 = vadd.f32 %v1011_v31, %v941_v48 }
  0xb2   : > { %v1441_v12 = vadd.f32 %v1409_v25, %v1281_v58  ;;  %v510_v11 = vmul.f32 %v3285_v2, %v3353_v47  ;;  %2794 = vtanh.f32 %v1472_v36  ;;  %v541_v33 = vadd.f32 %v3464_v35, %v440_v9 }
  0xb3   : > { %v1283_v22 = vadd.f32 %v3553_v43, %v1244_v51  ;;  %v1378_v42 = vmul.f32 %v1346_v28, %v1282_v32  ;;  %v3587_v19 = vmul.f32 0.5, %v1282_v32  ;;  %v842_v50 = vadd.f32 %v3471_v34, %v741_v49 }
  0xb4   : > { %v1473_v56 = vmul.f32 0.7978846, %v1441_v12  ;;  %v610_v57 = vmul.f32 %v3287_v3, %v573_v30  ;;  %v1144_v10 = vadd.f32 %v3474_v55, %v1043_v29  ;;  %v542_v48 = vadd.f32 %v510_v11, %v441_v0  ;;  %v405_v12 = vld [vmem:[#allocation2 + $0xa8] sm:$0xff] }
  0xb5   : > { %v1347_v58 = vmul.f32 0.044715, %v1283_v22  ;;  %v1410_v38 = vmul.f32 %v1378_v42, %v1282_v32  ;;  %v3592_v5 = vmul.f32 0.5, %v1283_v22  ;;  %v611_v41 = vmul.f32 %v3287_v3, %v574_v4 }
  0xb6   : > { %2796 = vtanh.f32 %v1473_v56  ;;  %v710_v35 = vmul.f32 %v3336_v40, %v404_v20  ;;  %v811_v6 = vmul.f32 %v3302_v23, %v3353_v47  ;;  %v911_v34 = vmul.f32 %v3401_v63, %v573_v30 }
  0xb7   : > { %v1379_v9 = vmul.f32 %v1347_v58, %v1283_v22  ;;  %v1442_v18 = vadd.f32 %v1410_v38, %v1282_v32  ;;  %v1012_v49 = vmul.f32 %v3304_v24, %v404_v20  ;;  %v1113_v55 = vmul.f32 %v3297_v21, %v3353_v47 }
  0xb8   : > { %v742_v25 = vadd.f32 %v710_v35, %v641_v46  ;;  %v1213_v31 = vmul.f32 %v3332_v37, %v573_v30  ;;  %v642_v28 = vadd.f32 %v610_v57, %v541_v33  ;;  %v643_v0 = vadd.f32 %v611_v41, %v542_v48 }
  0xb9   : > { %v1411_v36 = vmul.f32 %v1379_v9, %v1283_v22  ;;  %v1474_v51 = vmul.f32 0.7978846, %v1442_v18  ;;  %v912_v32 = vmul.f32 %v3401_v63, %v574_v4  ;;  %v943_v29 = vadd.f32 %v911_v34, %v842_v50  ;;  %v406_v50 = vld [vmem:[#allocation2 + $0xb0] sm:$0xff] }
  0xba   : > { %v1044_v11 = vadd.f32 %v1012_v49, %v942_v44  ;;  %v1245_v42 = vadd.f32 %v1213_v31, %v1144_v10  ;;  %v843_v46 = vadd.f32 %v811_v6, %v742_v25  ;;  %v1214_v20 = vmul.f32 %v3332_v37, %v574_v4 }
  0xbb   : > { %v1443_v56 = vadd.f32 %v1411_v36, %v1283_v22  ;;  %2798 = vtanh.f32 %v1474_v51  ;;  %v442_v30 = vmul.f32 %v3283_v1, %v405_v12  ;;  %v711_v38 = vmul.f32 %v3336_v40, %v405_v12  ;;  %v575_v36 = vld [vmem:[#allocation2 + $0xaa] sm:$0xff] }
  0xbc   : > { %v1145_v58 = vadd.f32 %v1113_v55, %v1044_v11  ;;  %v1284_v47 = vadd.f32 %v3553_v43, %v1245_v42  ;;  %v2795_v33 = vpop.eup %2794  ;;  %v511_v48 = vmul.f32 %v3285_v2, %v3369_v52  ;;  %v812_v44 = vmul.f32 %v3302_v23, %v3369_v52 }
  0xbd   : > { %v1475_v57 = vmul.f32 0.7978846, %v1443_v56  ;;  %v1013_v22 = vmul.f32 %v3304_v24, %v405_v12  ;;  %v1536_v10 = vadd.f32 1.0, %v2795_v33  ;;  %v743_v35 = vadd.f32 %v711_v38, %v642_v28 }
  0xbe   : > { %v1246_v4 = vadd.f32 %v1214_v20, %v1145_v58  ;;  %v1348_v41 = vmul.f32 0.044715, %v1284_v47  ;;  %v944_v9 = vadd.f32 %v912_v32, %v843_v46  ;;  %v1114_v6 = vmul.f32 %v3297_v21, %v3369_v52 }
  0xbf   : > { %2800 = vtanh.f32 %v1475_v57  ;;  %v1045_v18 = vadd.f32 %v1013_v22, %v943_v29  ;;  %v1568_v25 = vmul.f32 %v1536_v10, %v3565_v45  ;;  %v443_v31 = vmul.f32 %v3283_v1, %v406_v50  ;;  %v576_v29 = vld [vmem:[#allocation2 + $0xb2] sm:$0xff] }
  0xc0   : > { %v2797_v34 = vpop.eup %2796  ;;  %v3617_v49 = vadd.f32 %v3553_v43, %v1246_v4  ;;  %v1380_v55 = vmul.f32 %v1348_v41, %v1284_v47  ;;  %v3620_v12 = vmul.f32 0.5, %v1284_v47  ;;  %v543_v28 = vadd.f32 %v511_v48, %v442_v30 }
  0xc1   : > { %v1537_v51 = vadd.f32 1.0, %v2797_v34  ;;  %v512_v32 = vmul.f32 %v3285_v2, %v3372_v53  ;;  %1600 = vst [vmem:[#allocation2 + $0x49] sm:$0xff] %v1568_v25  ;;  %v844_v45 = vadd.f32 %v812_v44, %v743_v35  ;;  %v1146_v42 = vadd.f32 %v1114_v6, %v1045_v18  ;;  %v407_v6 = vld [vmem:[#allocation2 + $0xc0] sm:$0xff] }
  0xc2   : > { %v1349_v52 = vmul.f32 0.044715, %v3617_v49  ;;  %v1412_v11 = vmul.f32 %v1380_v55, %v1284_v47  ;;  %v612_v20 = vmul.f32 %v3287_v3, %v575_v36  ;;  %v712_v58 = vmul.f32 %v3336_v40, %v406_v50 }
  0xc3   : > { %v1569_v56 = vmul.f32 %v1537_v51, %v3579_v62  ;;  %v544_v46 = vadd.f32 %v512_v32, %v443_v31  ;;  %v613_v33 = vmul.f32 %v3287_v3, %v576_v29  ;;  %v813_v57 = vmul.f32 %v3302_v23, %v3372_v53 }
  0xc4   : > { %v1381_v38 = vmul.f32 %v1349_v52, %v3617_v49  ;;  %v1444_v30 = vadd.f32 %v1412_v11, %v1284_v47  ;;  %v644_v22 = vadd.f32 %v612_v20, %v543_v28  ;;  %v744_v44 = vadd.f32 %v712_v58, %v643_v0  ;;  %v408_v58 = vld [vmem:[#allocation2 + $0xc8] sm:$0xff] }
  0xc5   : > { %v2799_v48 = vpop.eup %2798  ;;  %1601 = vst [vmem:[#allocation2 + $0x51] sm:$0xff] %v1569_v56  ;;  %v913_v10 = vmul.f32 %v3401_v63, %v575_v36  ;;  %v1014_v62 = vmul.f32 %v3304_v24, %v406_v50  ;;  %v645_v18 = vadd.f32 %v613_v33, %v544_v46  ;;  %v1115_v25 = vmul.f32 %v3297_v21, %v3372_v53 }
  0xc6   : > { %v1538_v4 = vadd.f32 1.0, %v2799_v48  ;;  %v1413_v41 = vmul.f32 %v1381_v38, %v3617_v49  ;;  %v1476_v35 = vmul.f32 0.7978846, %v1444_v30  ;;  %v1215_v55 = vmul.f32 %v3332_v37, %v575_v36 }
  0xc7   : > { %v945_v47 = vadd.f32 %v913_v10, %v844_v45  ;;  %v1046_v34 = vadd.f32 %v1014_v62, %v944_v9  ;;  %v845_v51 = vadd.f32 %v813_v57, %v744_v44  ;;  %v1216_v32 = vmul.f32 %v3332_v37, %v576_v29  ;;  %v577_v10 = vld [vmem:[#allocation2 + $0xc2] sm:$0xff] }
  0xc8   : > { %v1570_v31 = vmul.f32 %v1538_v4, %v3587_v19  ;;  %v1445_v0 = vadd.f32 %v1413_v41, %v3617_v49  ;;  %2802 = vtanh.f32 %v1476_v35  ;;  %v1247_v52 = vadd.f32 %v1215_v55, %v1146_v42 }
  0xc9   : > { %v2801_v50 = vpop.eup %2800  ;;  %v1147_v28 = vadd.f32 %v1115_v25, %v1046_v34  ;;  %v444_v11 = vmul.f32 %v3283_v1, %v407_v6  ;;  %v513_v53 = vmul.f32 %v3285_v2, %v3375_v54  ;;  %v713_v36 = vmul.f32 %v3336_v40, %v407_v6  ;;  %v578_v34 = vld [vmem:[#allocation2 + $0xca] sm:$0xff] }
  0xca   : > { %v1539_v45 = vadd.f32 1.0, %v2801_v50  ;;  %1602 = vst [vmem:[#allocation2 + $0x61] sm:$0xff] %v1570_v31  ;;  %v1477_v9 = vmul.f32 0.7978846, %v1445_v0  ;;  %v1286_v56 = vadd.f32 %v3553_v43, %v1247_v52  ;;  %v814_v46 = vmul.f32 %v3302_v23, %v3375_v54 }
  0xcb   : > { %v1248_v19 = vadd.f32 %v1216_v32, %v1147_v28  ;;  %v1015_v20 = vmul.f32 %v3304_v24, %v407_v6  ;;  %v914_v38 = vmul.f32 %v3401_v63, %v576_v29  ;;  %v745_v30 = vadd.f32 %v713_v36, %v644_v22 }
  0xcc   : > { %v1571_v42 = vmul.f32 %v1539_v45, %v3592_v5  ;;  %2804 = vtanh.f32 %v1477_v9  ;;  %v1350_v57 = vmul.f32 0.044715, %v1286_v56  ;;  %v545_v48 = vadd.f32 %v513_v53, %v444_v11 }
  0xcd   : > { %v1287_v33 = vadd.f32 %v3553_v43, %v1248_v19  ;;  %v1047_v44 = vadd.f32 %v1015_v20, %v945_v47  ;;  %v846_v62 = vadd.f32 %v814_v46, %v745_v30  ;;  %v1116_v4 = vmul.f32 %v3297_v21, %v3375_v54  ;;  %v409_v19 = vld [vmem:[#allocation2 + $0xd8] sm:$0xff] }
  0xce   : > { %1603 = vst [vmem:[#allocation2 + $0x69] sm:$0xff] %v1571_v42  ;;  %v445_v41 = vmul.f32 %v3283_v1, %v408_v58  ;;  %v514_v5 = vmul.f32 %v3285_v2, %v3393_v59  ;;  %v1317_v35 = vmul.f32 0.5, %v3617_v49  ;;  %v946_v29 = vadd.f32 %v914_v38, %v845_v51 }
  0xcf   : > { %v1351_v22 = vmul.f32 0.044715, %v1287_v33  ;;  %v1382_v6 = vmul.f32 %v1350_v57, %v1286_v56  ;;  %v3658_v25 = vmul.f32 0.5, %v1286_v56  ;;  %v3660_v47 = vmul.f32 0.5, %v1287_v33 }
  0xd0   : > { %v614_v55 = vmul.f32 %v3287_v3, %v577_v10  ;;  %v714_v31 = vmul.f32 %v3336_v40, %v408_v58  ;;  %v1148_v50 = vadd.f32 %v1116_v4, %v1047_v44  ;;  %v815_v28 = vmul.f32 %v3302_v23, %v3393_v59 }
  0xd1   : > { %v1383_v54 = vmul.f32 %v1351_v22, %v1287_v33  ;;  %v1414_v0 = vmul.f32 %v1382_v6, %v1286_v56  ;;  %v546_v49 = vadd.f32 %v514_v5, %v445_v41  ;;  %v615_v51 = vmul.f32 %v3287_v3, %v578_v34 }
  0xd2   : > { %v2803_v32 = vpop.eup %2802  ;;  %v646_v52 = vadd.f32 %v614_v55, %v545_v48  ;;  %v746_v11 = vadd.f32 %v714_v31, %v645_v18  ;;  %v1016_v36 = vmul.f32 %v3304_v24, %v408_v58  ;;  %v915_v20 = vmul.f32 %v3401_v63, %v577_v10 }
  0xd3   : > { %v1540_v45 = vadd.f32 1.0, %v2803_v32  ;;  %v1415_v9 = vmul.f32 %v1383_v54, %v1287_v33  ;;  %v1446_v53 = vadd.f32 %v1414_v0, %v1286_v56  ;;  %v1117_v42 = vmul.f32 %v3297_v21, %v3393_v59  ;;  %v579_v32 = vld [vmem:[#allocation2 + $0xda] sm:$0xff] }
  0xd4   : > { %v847_v46 = vadd.f32 %v815_v28, %v746_v11  ;;  %v1217_v38 = vmul.f32 %v3332_v37, %v577_v10  ;;  %v1048_v48 = vadd.f32 %v1016_v36, %v946_v29  ;;  %v947_v4 = vadd.f32 %v915_v20, %v846_v62  ;;  %v410_v62 = vld [vmem:[#allocation2 + $0xe0] sm:$0xff] }
  0xd5   : > { %v1572_v30 = vmul.f32 %v1540_v45, %v3620_v12  ;;  %v1447_v57 = vadd.f32 %v1415_v9, %v1287_v33  ;;  %v1478_v44 = vmul.f32 0.7978846, %v1446_v53  ;;  %v1218_v56 = vmul.f32 %v3332_v37, %v578_v34 }
  0xd6   : > { %v2805_v18 = vpop.eup %2804  ;;  %v1249_v41 = vadd.f32 %v1217_v38, %v1148_v50  ;;  %v446_v58 = vmul.f32 %v3283_v1, %v409_v19  ;;  %v1149_v6 = vadd.f32 %v1117_v42, %v1048_v48  ;;  %v515_v12 = vmul.f32 %v3285_v2, %v3396_v60 }
  0xd7   : > { %v1541_v5 = vadd.f32 1.0, %v2805_v18  ;;  %1604 = vst [vmem:[#allocation2 + $0x79] sm:$0xff] %v1572_v30  ;;  %v1479_v22 = vmul.f32 0.7978846, %v1447_v57  ;;  %2806 = vtanh.f32 %v1478_v44  ;;  %v715_v33 = vmul.f32 %v3336_v40, %v409_v19 }
  0xd8   : > { %v1288_v59 = vadd.f32 %v3553_v43, %v1249_v41  ;;  %v816_v10 = vmul.f32 %v3302_v23, %v3396_v60  ;;  %v1250_v55 = vadd.f32 %v1218_v56, %v1149_v6  ;;  %v1017_v31 = vmul.f32 %v3304_v24, %v409_v19 }
  0xd9   : > { %v1573_v29 = vmul.f32 %v1541_v5, %v1317_v35  ;;  %2808 = vtanh.f32 %v1479_v22  ;;  %v647_v54 = vadd.f32 %v615_v51, %v546_v49  ;;  %v916_v0 = vmul.f32 %v3401_v63, %v578_v34  ;;  %v580_v34 = vld [vmem:[#allocation2 + $0xe2] sm:$0xff] }
  0xda   : > { %v1352_v50 = vmul.f32 0.044715, %v1288_v59  ;;  %v747_v28 = vadd.f32 %v715_v33, %v646_v52  ;;  %v1289_v11 = vadd.f32 %v3553_v43, %v1250_v55  ;;  %v1049_v45 = vadd.f32 %v1017_v31, %v947_v4 }
  0xdb   : > { %1605 = vst [vmem:[#allocation2 + $0x81] sm:$0xff] %v1573_v29  ;;  %v1118_v9 = vmul.f32 %v3297_v21, %v3396_v60  ;;  %v447_v53 = vmul.f32 %v3283_v1, %v410_v62  ;;  %v948_v35 = vadd.f32 %v916_v0, %v847_v46  ;;  %v3687_v36 = vmul.f32 0.5, %v1288_v59 }
  0xdc   : > { %v1384_v20 = vmul.f32 %v1352_v50, %v1288_v59  ;;  %v516_v49 = vmul.f32 %v3285_v2, %v3399_v61  ;;  %v1353_v51 = vmul.f32 0.044715, %v1289_v11  ;;  %v547_v52 = vadd.f32 %v515_v12, %v446_v58 }
  0xdd   : > { %v848_v19 = vadd.f32 %v816_v10, %v747_v28  ;;  %v616_v42 = vmul.f32 %v3287_v3, %v579_v32  ;;  %v3692_v38 = vmul.f32 0.5, %v1289_v11  ;;  %v1150_v57 = vadd.f32 %v1118_v9, %v1049_v45  ;;  %v411_v10 = vld [vmem:[#allocation2 + $0xf0] sm:$0xff] }
  0xde   : > { %v1416_v30 = vmul.f32 %v1384_v20, %v1288_v59  ;;  %v716_v60 = vmul.f32 %v3336_v40, %v410_v62  ;;  %v1385_v44 = vmul.f32 %v1353_v51, %v1289_v11  ;;  %v548_v46 = vadd.f32 %v516_v49, %v447_v53  ;;  %v412_v51 = vld [vmem:[#allocation2 + $0xf8] sm:$0xff] }
  0xdf   : > { %v617_v48 = vmul.f32 %v3287_v3, %v580_v34  ;;  %v817_v18 = vmul.f32 %v3302_v23, %v3399_v61  ;;  %v917_v41 = vmul.f32 %v3401_v63, %v579_v32  ;;  %v1018_v58 = vmul.f32 %v3304_v24, %v410_v62 }
  0xe0   : > { %v1448_v4 = vadd.f32 %v1416_v30, %v1288_v59  ;;  %v748_v56 = vadd.f32 %v716_v60, %v647_v54  ;;  %v1417_v22 = vmul.f32 %v1385_v44, %v1289_v11  ;;  %v648_v6 = vadd.f32 %v616_v42, %v547_v52  ;;  %v581_v44 = vld [vmem:[#allocation2 + $0xf2] sm:$0xff] }
  0xe1   : > { %v2807_v5 = vpop.eup %2806  ;;  %v1119_v12 = vmul.f32 %v3297_v21, %v3399_v61  ;;  %v1219_v33 = vmul.f32 %v3332_v37, %v579_v32  ;;  %v949_v55 = vadd.f32 %v917_v41, %v848_v19  ;;  %v1050_v31 = vadd.f32 %v1018_v58, %v948_v35  ;;  %v582_v58 = vld [vmem:[#allocation2 + $0xfa] sm:$0xff] }
  0xe2   : > { %v1542_v29 = vadd.f32 1.0, %v2807_v5  ;;  %v1480_v3 = vmul.f32 0.7978846, %v1448_v4  ;;  %v1449_v59 = vadd.f32 %v1417_v22, %v1289_v11  ;;  %v849_v54 = vadd.f32 %v817_v18, %v748_v56 }
  0xe3   : > { %v2809_v0 = vpop.eup %2808  ;;  %v1220_v50 = vmul.f32 %v3332_v37, %v580_v34  ;;  %v1251_v28 = vadd.f32 %v1219_v33, %v1150_v57  ;;  %v448_v9 = vmul.f32 %v3283_v1, %v411_v10  ;;  %v1151_v53 = vadd.f32 %v1119_v12, %v1050_v31 }
  0xe4   : > { %v1543_v62 = vadd.f32 1.0, %v2809_v0  ;;  %v1574_v45 = vmul.f32 %v1542_v29, %v3658_v25  ;;  %2810 = vtanh.f32 %v1480_v3  ;;  %v1481_v61 = vmul.f32 0.7978846, %v1449_v59  ;;  %v3723_v29 = vld [vmem:[#allocation6 + $0x2] ss:$0 sm:$0xff] }
  0xe5   : > { %v1290_v32 = vadd.f32 %v3553_v43, %v1251_v28  ;;  %v517_v20 = vmul.f32 %v3285_v2, %v3419_v7  ;;  %v717_v11 = vmul.f32 %v3336_v40, %v411_v10  ;;  %v818_v49 = vmul.f32 %v3302_v23, %v3419_v7 }
  0xe6   : > { %v1575_v35 = vmul.f32 %v1543_v62, %v3660_v47  ;;  %1606 = vst [vmem:[#allocation2 + $0x91] sm:$0xff] %v1574_v45  ;;  %v1019_v25 = vmul.f32 %v3304_v24, %v411_v10  ;;  %2812 = vtanh.f32 %v1481_v61  ;;  %v918_v52 = vmul.f32 %v3401_v63, %v580_v34 }
  0xe7   : > { %v1252_v19 = vadd.f32 %v1220_v50, %v1151_v53  ;;  %v1354_v42 = vmul.f32 0.044715, %v1290_v32  ;;  %v549_v30 = vadd.f32 %v517_v20, %v448_v9  ;;  %v749_v57 = vadd.f32 %v717_v11, %v648_v6 }
  0xe8   : > { %1607 = vst [vmem:[#allocation2 + $0x99] sm:$0xff] %v1575_v35  ;;  %v1051_v60 = vadd.f32 %v1019_v25, %v949_v55  ;;  %v1120_v47 = vmul.f32 %v3297_v21, %v3419_v7  ;;  %v449_v56 = vmul.f32 %v3283_v1, %v412_v51  ;;  %v518_v41 = vmul.f32 %v3285_v2, %v3422_v8 }
  0xe9   : > { %v1291_v18 = vadd.f32 %v3553_v43, %v1252_v19  ;;  %v1386_v4 = vmul.f32 %v1354_v42, %v1290_v32  ;;  %v649_v34 = vadd.f32 %v617_v48, %v548_v46  ;;  %v950_v5 = vadd.f32 %v918_v52, %v849_v54 }
  0xea   : > { %v3721_v22 = vmul.f32 0.5, %v1290_v32  ;;  %v850_v12 = vadd.f32 %v818_v49, %v749_v57  ;;  %v1152_v10 = vadd.f32 %v1120_v47, %v1051_v60  ;;  %v618_v7 = vmul.f32 %v3723_v29, %v581_v44  ;;  %v3743_v60 = vld [vmem:[#allocation6 + $0x1] ss:$0 sm:$0xff] }
  0xeb   : > { %v1355_v6 = vmul.f32 0.044715, %v1291_v18  ;;  %v1418_v33 = vmul.f32 %v1386_v4, %v1290_v32  ;;  %v550_v3 = vadd.f32 %v518_v41, %v449_v56  ;;  %v619_v55 = vmul.f32 %v3723_v29, %v582_v58  ;;  %v3753_v41 = vld [vmem:[#allocation6 + $0x6] ss:$0 sm:$0xff] }
  0xec   : > { %v718_v1 = vmul.f32 %v3336_v40, %v412_v51  ;;  %v819_v2 = vmul.f32 %v3302_v23, %v3422_v8  ;;  %v3730_v46 = vmul.f32 0.5, %v1291_v18  ;;  %v650_v0 = vadd.f32 %v618_v7, %v549_v30  ;;  %v413_v23 = vld [vmem:[#allocation2 + $0x108] sm:$0xff] }
  0xed   : > { %v1387_v48 = vmul.f32 %v1355_v6, %v1291_v18  ;;  %v1450_v31 = vadd.f32 %v1418_v33, %v1290_v32  ;;  %v919_v50 = vmul.f32 %v3401_v63, %v581_v44  ;;  %v1020_v28 = vmul.f32 %v3304_v24, %v412_v51  ;;  %v583_v33 = vld [vmem:[#allocation2 + $0x10a] sm:$0xff] }
  0xee   : > { %v2811_v59 = vpop.eup %2810  ;;  %v750_v54 = vadd.f32 %v718_v1, %v649_v34  ;;  %v1121_v62 = vmul.f32 %v3297_v21, %v3422_v8  ;;  %v1221_v53 = vmul.f32 %v3332_v37, %v581_v44  ;;  %v651_v20 = vadd.f32 %v619_v55, %v550_v3  ;;  %v3739_v8 = vld [vmem:[#allocation6] ss:$0 sm:$0xff] }
  0xef   : > { %v1544_v45 = vadd.f32 1.0, %v2811_v59  ;;  %v1419_v9 = vmul.f32 %v1387_v48, %v1291_v18  ;;  %v1482_v61 = vmul.f32 0.7978846, %v1450_v31  ;;  %v951_v11 = vadd.f32 %v919_v50, %v850_v12  ;;  %v414_v44 = vld [vmem:[#allocation2 + $0x110] sm:$0xff] }
  0xf0   : > { %v851_v35 = vadd.f32 %v819_v2, %v750_v54  ;;  %v1052_v32 = vadd.f32 %v1020_v28, %v950_v5  ;;  %v2813_v49 = vpop.eup %2812  ;;  %v1253_v19 = vadd.f32 %v1221_v53, %v1152_v10  ;;  %v1222_v21 = vmul.f32 %v3332_v37, %v582_v58  ;;  %v3749_v37 = vld [vmem:[#allocation6 + $0x4] ss:$0 sm:$0xff]  ;;  %v3758_v10 = vld [vmem:[#allocation6 + $0x7] ss:$0 sm:$0xff] }
  0xf1   : > { %v1576_v25 = vmul.f32 %v1544_v45, %v3687_v36  ;;  %v1451_v52 = vadd.f32 %v1419_v9, %v1291_v18  ;;  %2814 = vtanh.f32 %v1482_v61  ;;  %v1545_v24 = vadd.f32 1.0, %v2813_v49 }
  0xf2   : > { %v1153_v51 = vadd.f32 %v1121_v62, %v1052_v32  ;;  %v450_v42 = vmul.f32 %v3739_v8, %v413_v23  ;;  %v1292_v57 = vadd.f32 %v3553_v43, %v1253_v19  ;;  %v519_v36 = vmul.f32 %v3743_v60, %v3437_v13  ;;  %v3777_v19 = vld [vmem:[#allocation6 + $0x5] ss:$0 sm:$0xff] }
  0xf3   : > { %1608 = vst [vmem:[#allocation2 + $0xa9] sm:$0xff] %v1576_v25  ;;  %v1483_v30 = vmul.f32 0.7978846, %v1451_v52  ;;  %v719_v47 = vmul.f32 %v3336_v40, %v413_v23  ;;  %v1577_v18 = vmul.f32 %v1545_v24, %v3692_v38  ;;  %v820_v56 = vmul.f32 %v3749_v37, %v3437_v13 }
  0xf4   : > { %v1254_v4 = vadd.f32 %v1222_v21, %v1153_v51  ;;  %v1021_v34 = vmul.f32 %v3753_v41, %v413_v23  ;;  %v920_v5 = vmul.f32 %v3401_v63, %v582_v58  ;;  %v1356_v12 = vmul.f32 0.044715, %v1292_v57  ;;  %v584_v58 = vld [vmem:[#allocation2 + $0x112] sm:$0xff] }
  0xf5   : > { %2816 = vtanh.f32 %v1483_v30  ;;  %v751_v6 = vadd.f32 %v719_v47, %v650_v0  ;;  %1609 = vst [vmem:[#allocation2 + $0xb1] sm:$0xff] %v1577_v18  ;;  %v1122_v7 = vmul.f32 %v3758_v10, %v3437_v13  ;;  %v451_v3 = vmul.f32 %v3739_v8, %v414_v44  ;;  %v3770_v13 = vld [vmem:[#allocation6 + $0x3] ss:$0 sm:$0xff] }
  0xf6   : > { %v1293_v40 = vadd.f32 %v3553_v43, %v1254_v4  ;;  %v1053_v38 = vadd.f32 %v1021_v34, %v951_v11  ;;  %v952_v55 = vadd.f32 %v920_v5, %v851_v35  ;;  %v1388_v1 = vmul.f32 %v1356_v12, %v1292_v57 }
  0xf7   : > { %v551_v2 = vadd.f32 %v519_v36, %v450_v42  ;;  %v520_v63 = vmul.f32 %v3743_v60, %v3440_v14  ;;  %v3765_v48 = vmul.f32 0.5, %v1292_v57  ;;  %v852_v0 = vadd.f32 %v820_v56, %v751_v6  ;;  %v3783_v36 = vld [vmem:[#allocation6 + $0x8] ss:$0 sm:$0xff] }
  0xf8   : > { %v1357_v31 = vmul.f32 0.044715, %v1293_v40  ;;  %v620_v59 = vmul.f32 %v3723_v29, %v583_v33  ;;  %v3768_v54 = vmul.f32 0.5, %v1293_v40  ;;  %v1420_v50 = vmul.f32 %v1388_v1, %v1292_v57 }
  0xf9   : > { %v1154_v28 = vadd.f32 %v1122_v7, %v1053_v38  ;;  %v720_v62 = vmul.f32 %v3770_v13, %v414_v44  ;;  %v552_v9 = vadd.f32 %v520_v63, %v451_v3  ;;  %v621_v61 = vmul.f32 %v3723_v29, %v584_v58  ;;  %v2867_v63 = vld [vmem:[#allocation2 + $0x121] sm:$0xff] }
  0xfa   : > { %v1389_v45 = vmul.f32 %v1357_v31, %v1293_v40  ;;  %v821_v53 = vmul.f32 %v3749_v37, %v3440_v14  ;;  %v1452_v35 = vadd.f32 %v1420_v50, %v1292_v57  ;;  %v652_v11 = vadd.f32 %v620_v59, %v551_v2 }
  0xfb   : > { %v2815_v23 = vpop.eup %2814  ;;  %v752_v32 = vadd.f32 %v720_v62, %v651_v20  ;;  %v1022_v49 = vmul.f32 %v3753_v41, %v414_v44  ;;  %v921_v24 = vmul.f32 %v3777_v19, %v583_v33  ;;  %v1123_v51 = vmul.f32 %v3758_v10, %v3440_v14  ;;  %v415_v20 = vld [vmem:[#allocation2 + $0x120] sm:$0xff] }
  0xfc   : > { %v1546_v25 = vadd.f32 1.0, %v2815_v23  ;;  %v1421_v52 = vmul.f32 %v1389_v45, %v1293_v40  ;;  %v1484_v21 = vmul.f32 0.7978846, %v1452_v35  ;;  %v922_v42 = vmul.f32 %v3777_v19, %v584_v58 }
  0xfd   : > { %v1054_v30 = vadd.f32 %v1022_v49, %v952_v55  ;;  %v1223_v57 = vmul.f32 %v3783_v36, %v583_v33  ;;  %v853_v18 = vadd.f32 %v821_v53, %v752_v32  ;;  %v953_v4 = vadd.f32 %v921_v24, %v852_v0  ;;  %v416_v55 = vld [vmem:[#allocation2 + $0x128] sm:$0xff] }
  0xfe   : > { %v1578_v47 = vmul.f32 %v1546_v25, %v3721_v22  ;;  %v1453_v44 = vadd.f32 %v1421_v52, %v1293_v40  ;;  %2818 = vtanh.f32 %v1484_v21  ;;  %v1224_v5 = vmul.f32 %v3783_v36, %v584_v58 }
  0xff   : > { %v2817_v56 = vpop.eup %2816  ;;  %v1155_v34 = vadd.f32 %v1123_v51, %v1054_v30  ;;  %v1255_v14 = vadd.f32 %v1223_v57, %v1154_v28  ;;  %v452_v38 = vmul.f32 %v3739_v8, %v415_v20  ;;  %v721_v7 = vmul.f32 %v3770_v13, %v415_v20  ;;  %v585_v28 = vld [vmem:[#allocation2 + $0x122] sm:$0xff] }
 0x100   : > { %v1547_v12 = vadd.f32 1.0, %v2817_v56  ;;  %1610 = vst [vmem:[#allocation2 + $0xc1] sm:$0xff] %v1578_v47  ;;  %v1485_v6 = vmul.f32 0.7978846, %v1453_v44  ;;  %v521_v22 = vmul.f32 %v3743_v60, %v3443_v15  ;;  %v1023_v40 = vmul.f32 %v3753_v41, %v415_v20 }
 0x101   : > { %v1256_v33 = vadd.f32 %v1224_v5, %v1155_v34  ;;  %v1294_v3 = vadd.f32 %v3553_v43, %v1255_v14  ;;  %v753_v2 = vadd.f32 %v721_v7, %v652_v11  ;;  %v822_v58 = vmul.f32 %v2867_v63, %v3749_v37  ;;  %v417_v34 = vld [vmem:[#allocation2 + $0x138] sm:$0xff] }
 0x102   : > { %v1579_v1 = vmul.f32 %v1547_v12, %v3730_v46  ;;  %2820 = vtanh.f32 %v1485_v6  ;;  %v653_v31 = vadd.f32 %v621_v61, %v552_v9  ;;  %v1055_v50 = vadd.f32 %v1023_v40, %v953_v4  ;;  %v586_v9 = vld [vmem:[#allocation2 + $0x12a] sm:$0xff] }
 0x103   : > { %v1295_v0 = vadd.f32 %v3553_v43, %v1256_v33  ;;  %v1358_v59 = vmul.f32 0.044715, %v1294_v3  ;;  %v954_v62 = vadd.f32 %v922_v42, %v853_v18  ;;  %v1124_v15 = vmul.f32 %v2867_v63, %v3758_v10 }
 0x104   : > { %1611 = vst [vmem:[#allocation2 + $0xc9] sm:$0xff] %v1579_v1  ;;  %v453_v45 = vmul.f32 %v3739_v8, %v416_v55  ;;  %v522_v46 = vmul.f32 %v3743_v60, %v3528_v39  ;;  %v3801_v53 = vmul.f32 0.5, %v1294_v3  ;;  %v553_v11 = vadd.f32 %v521_v22, %v452_v38 }
 0x105   : > { %v1359_v23 = vmul.f32 0.044715, %v1295_v0  ;;  %v1390_v35 = vmul.f32 %v1358_v59, %v1294_v3  ;;  %v3803_v61 = vmul.f32 0.5, %v1295_v0  ;;  %v854_v32 = vadd.f32 %v822_v58, %v753_v2 }
 0x106   : > { %v622_v49 = vmul.f32 %v3723_v29, %v585_v28  ;;  %v722_v25 = vmul.f32 %v3770_v13, %v416_v55  ;;  %v1156_v51 = vadd.f32 %v1124_v15, %v1055_v50  ;;  %v823_v21 = vmul.f32 %v3749_v37, %v3528_v39  ;;  %v418_v50 = vld [vmem:[#allocation2 + $0x140] sm:$0xff] }
 0x107   : > { %v1391_v52 = vmul.f32 %v1359_v23, %v1295_v0  ;;  %v1422_v24 = vmul.f32 %v1390_v35, %v1294_v3  ;;  %v554_v42 = vadd.f32 %v522_v46, %v453_v45  ;;  %v623_v30 = vmul.f32 %v3723_v29, %v586_v9 }
 0x108   : > { %v754_v57 = vadd.f32 %v722_v25, %v653_v31  ;;  %v923_v20 = vmul.f32 %v3777_v19, %v585_v28  ;;  %v2819_v47 = vpop.eup %2818  ;;  %v1024_v4 = vmul.f32 %v3753_v41, %v416_v55  ;;  %v1125_v56 = vmul.f32 %v3758_v10, %v3528_v39  ;;  %v2868_v25 = vld [vmem:[#allocation2 + $0x139] sm:$0xff] }
 0x109   : > { %v1423_v44 = vmul.f32 %v1391_v52, %v1295_v0  ;;  %v1454_v18 = vadd.f32 %v1422_v24, %v1294_v3  ;;  %v1548_v5 = vadd.f32 1.0, %v2819_v47  ;;  %v654_v14 = vadd.f32 %v622_v49, %v553_v11  ;;  %v587_v11 = vld [vmem:[#allocation2 + $0x13a] sm:$0xff] }
 0x10a   : > { %v855_v12 = vadd.f32 %v823_v21, %v754_v57  ;;  %v1225_v6 = vmul.f32 %v3783_v36, %v585_v28  ;;  %v955_v33 = vadd.f32 %v923_v20, %v854_v32  ;;  %v1056_v22 = vadd.f32 %v1024_v4, %v954_v62  ;;  %v2869_v21 = vld [vmem:[#allocation2 + $0x141] sm:$0xff] }
 0x10b   : > { %v1455_v38 = vadd.f32 %v1423_v44, %v1295_v0  ;;  %v1486_v7 = vmul.f32 0.7978846, %v1454_v18  ;;  %v1580_v1 = vmul.f32 %v1548_v5, %v3765_v48  ;;  %v1226_v3 = vmul.f32 %v3783_v36, %v586_v9 }
 0x10c   : > { %v2821_v40 = vpop.eup %2820  ;;  %v1257_v2 = vadd.f32 %v1225_v6, %v1156_v51  ;;  %v454_v55 = vmul.f32 %v3739_v8, %v417_v34  ;;  %v1157_v58 = vadd.f32 %v1125_v56, %v1056_v22  ;;  %v523_v0 = vmul.f32 %v3743_v60, %v3531_v17 }
 0x10d   : > { %v1549_v63 = vadd.f32 1.0, %v2821_v40  ;;  %v1487_v39 = vmul.f32 0.7978846, %v1455_v38  ;;  %2822 = vtanh.f32 %v1486_v7  ;;  %1612 = vst [vmem:[#allocation2 + $0xd9] sm:$0xff] %v1580_v1  ;;  %v723_v59 = vmul.f32 %v3770_v13, %v417_v34 }
 0x10e   : > { %v1296_v31 = vadd.f32 %v3553_v43, %v1257_v2  ;;  %v824_v48 = vmul.f32 %v3749_v37, %v3531_v17  ;;  %v1258_v62 = vadd.f32 %v1226_v3, %v1157_v58  ;;  %v1025_v15 = vmul.f32 %v3753_v41, %v417_v34  ;;  %v419_v2 = vld [vmem:[#allocation2 + $0x150] sm:$0xff] }
 0x10f   : > { %v1581_v28 = vmul.f32 %v1549_v63, %v3768_v54  ;;  %2824 = vtanh.f32 %v1487_v39  ;;  %v655_v45 = vadd.f32 %v623_v30, %v554_v42  ;;  %v924_v46 = vmul.f32 %v3777_v19, %v586_v9  ;;  %v588_v9 = vld [vmem:[#allocation2 + $0x142] sm:$0xff] }
 0x110   : > { %v1360_v23 = vmul.f32 0.044715, %v1296_v31  ;;  %v755_v35 = vadd.f32 %v723_v59, %v654_v14  ;;  %v1297_v32 = vadd.f32 %v3553_v43, %v1258_v62  ;;  %v1057_v49 = vadd.f32 %v1025_v15, %v955_v33 }
 0x111   : > { %1613 = vst [vmem:[#allocation2 + $0xe1] sm:$0xff] %v1581_v28  ;;  %v1126_v17 = vmul.f32 %v2868_v25, %v3758_v10  ;;  %v455_v52 = vmul.f32 %v3739_v8, %v418_v50  ;;  %v956_v54 = vadd.f32 %v924_v46, %v855_v12  ;;  %v3830_v24 = vmul.f32 0.5, %v1296_v31 }
 0x112   : > { %v1392_v51 = vmul.f32 %v1360_v23, %v1296_v31  ;;  %v524_v42 = vmul.f32 %v2869_v21, %v3743_v60  ;;  %v1361_v30 = vmul.f32 0.044715, %v1297_v32  ;;  %v555_v57 = vadd.f32 %v523_v0, %v454_v55  ;;  %v3849_v23 = vld [vmem:[%s4698_s2] ss:$0 sm:$0xff] }
 0x113   : > { %v856_v20 = vadd.f32 %v824_v48, %v755_v35  ;;  %v624_v47 = vmul.f32 %v3723_v29, %v587_v11  ;;  %v3834_v43 = vmul.f32 0.5, %v1297_v32  ;;  %v1158_v18 = vadd.f32 %v1126_v17, %v1057_v49 }
 0x114   : > { %v1424_v44 = vmul.f32 %v1392_v51, %v1296_v31  ;;  %v724_v4 = vmul.f32 %v3770_v13, %v418_v50  ;;  %v1393_v56 = vmul.f32 %v1361_v30, %v1297_v32  ;;  %v556_v34 = vadd.f32 %v524_v42, %v455_v52  ;;  %v420_v52 = vld [vmem:[#allocation2 + $0x158] sm:$0xff] }
 0x115   : > { %v625_v5 = vmul.f32 %v3723_v29, %v588_v9  ;;  %v825_v14 = vmul.f32 %v2869_v21, %v3749_v37  ;;  %v925_v38 = vmul.f32 %v3777_v19, %v587_v11  ;;  %v1026_v7 = vmul.f32 %v3753_v41, %v418_v50 }
 0x116   : > { %v1456_v12 = vadd.f32 %v1424_v44, %v1296_v31  ;;  %v756_v6 = vadd.f32 %v724_v4, %v655_v45  ;;  %v1425_v22 = vmul.f32 %v1393_v56, %v1297_v32  ;;  %v656_v40 = vadd.f32 %v624_v47, %v555_v57  ;;  %v2872_v4 = vld [vmem:[#allocation2 + $0x159] sm:$0xff] }
 0x117   : > { %v2823_v33 = vpop.eup %2822  ;;  %v1127_v1 = vmul.f32 %v2869_v21, %v3758_v10  ;;  %v1227_v3 = vmul.f32 %v3783_v36, %v587_v11  ;;  %v957_v39 = vadd.f32 %v925_v38, %v856_v20  ;;  %v1058_v58 = vadd.f32 %v1026_v7, %v956_v54  ;;  %v2871_v11 = vld [vmem:[#allocation2 + $0x151] sm:$0xff] }
 0x118   : > { %v1550_v55 = vadd.f32 1.0, %v2823_v33  ;;  %v1488_v63 = vmul.f32 0.7978846, %v1456_v12  ;;  %v1457_v59 = vadd.f32 %v1425_v22, %v1297_v32  ;;  %v857_v31 = vadd.f32 %v825_v14, %v756_v6  ;;  %v590_v14 = vld [vmem:[#allocation2 + $0x15a] sm:$0xff] }
 0x119   : > { %v2825_v0 = vpop.eup %2824  ;;  %v1228_v48 = vmul.f32 %v3783_v36, %v588_v9  ;;  %v1259_v28 = vadd.f32 %v1227_v3, %v1158_v18  ;;  %v456_v15 = vmul.f32 %v3739_v8, %v419_v2  ;;  %v1159_v46 = vadd.f32 %v1127_v1, %v1058_v58 }
 0x11a   : > { %v1551_v62 = vadd.f32 1.0, %v2825_v0  ;;  %v1582_v50 = vmul.f32 %v1550_v55, %v3801_v53  ;;  %2826 = vtanh.f32 %v1488_v63  ;;  %v1489_v45 = vmul.f32 0.7978846, %v1457_v59 }
 0x11b   : > { %v1298_v35 = vadd.f32 %v3849_v23, %v1259_v28  ;;  %v525_v32 = vmul.f32 %v2871_v11, %v3743_v60  ;;  %v725_v53 = vmul.f32 %v3770_v13, %v419_v2  ;;  %v826_v25 = vmul.f32 %v2871_v11, %v3749_v37 }
 0x11c   : > { %v1583_v49 = vmul.f32 %v1551_v62, %v3803_v61  ;;  %1614 = vst [vmem:[#allocation2 + $0xf1] sm:$0xff] %v1582_v50  ;;  %v1027_v17 = vmul.f32 %v3753_v41, %v419_v2  ;;  %2828 = vtanh.f32 %v1489_v45  ;;  %v926_v54 = vmul.f32 %v3777_v19, %v588_v9  ;;  %v589_v61 = vld [vmem:[#allocation2 + $0x152] sm:$0xff]  ;;  %v421_v45 = vld [vmem:[#allocation2 + $0x168] sm:$0xff] }
 0x11d   : > { %v1260_v51 = vadd.f32 %v1228_v48, %v1159_v46  ;;  %v1362_v21 = vmul.f32 0.044715, %v1298_v35  ;;  %v557_v42 = vadd.f32 %v525_v32, %v456_v15  ;;  %v757_v30 = vadd.f32 %v725_v53, %v656_v40 }
 0x11e   : > { %1615 = vst [vmem:[#allocation2 + $0xf9] sm:$0xff] %v1583_v49  ;;  %v1059_v57 = vadd.f32 %v1027_v17, %v957_v39  ;;  %v1128_v20 = vmul.f32 %v2871_v11, %v3758_v10  ;;  %v457_v18 = vmul.f32 %v3739_v8, %v420_v52  ;;  %v526_v56 = vmul.f32 %v2872_v4, %v3743_v60 }
 0x11f   : > { %v1299_v47 = vadd.f32 %v3849_v23, %v1260_v51  ;;  %v1394_v44 = vmul.f32 %v1362_v21, %v1298_v35  ;;  %v657_v12 = vadd.f32 %v625_v5, %v556_v34  ;;  %v958_v9 = vadd.f32 %v926_v54, %v857_v31 }
 0x120   : > { %v3862_v6 = vmul.f32 0.5, %v1298_v35  ;;  %v858_v38 = vadd.f32 %v826_v25, %v757_v30  ;;  %v1160_v22 = vadd.f32 %v1128_v20, %v1059_v57  ;;  %v626_v40 = vmul.f32 %v3723_v29, %v589_v61  ;;  %v2873_v57 = vld [vmem:[#allocation2 + $0x169] sm:$0xff] }
 0x121   : > { %v1363_v7 = vmul.f32 0.044715, %v1299_v47  ;;  %v1426_v33 = vmul.f32 %v1394_v44, %v1298_v35  ;;  %v558_v1 = vadd.f32 %v526_v56, %v457_v18  ;;  %v627_v3 = vmul.f32 %v3723_v29, %v590_v14  ;;  %v422_v44 = vld [vmem:[#allocation2 + $0x170] sm:$0xff] }
 0x122   : > { %v726_v2 = vmul.f32 %v3770_v13, %v420_v52  ;;  %v827_v55 = vmul.f32 %v2872_v4, %v3749_v37  ;;  %v3868_v63 = vmul.f32 0.5, %v1299_v47  ;;  %v658_v5 = vadd.f32 %v626_v40, %v557_v42 }
 0x123   : > { %v1395_v39 = vmul.f32 %v1363_v7, %v1299_v47  ;;  %v1458_v34 = vadd.f32 %v1426_v33, %v1298_v35  ;;  %v927_v59 = vmul.f32 %v3777_v19, %v589_v61  ;;  %v1028_v31 = vmul.f32 %v3753_v41, %v420_v52 }
 0x124   : > { %v2827_v58 = vpop.eup %2826  ;;  %v758_v0 = vadd.f32 %v726_v2, %v657_v12  ;;  %v1129_v48 = vmul.f32 %v2872_v4, %v3758_v10  ;;  %v1229_v15 = vmul.f32 %v3783_v36, %v589_v61  ;;  %v659_v46 = vadd.f32 %v627_v3, %v558_v1  ;;  %v2874_v2 = vld [vmem:[#allocation2 + $0x171] sm:$0xff] }
 0x125   : > { %v1552_v28 = vadd.f32 1.0, %v2827_v58  ;;  %v1427_v62 = vmul.f32 %v1395_v39, %v1299_v47  ;;  %v1490_v50 = vmul.f32 0.7978846, %v1458_v34  ;;  %v959_v32 = vadd.f32 %v927_v59, %v858_v38 }
 0x126   : > { %v859_v11 = vadd.f32 %v827_v55, %v758_v0  ;;  %v1060_v49 = vadd.f32 %v1028_v31, %v958_v9  ;;  %v2829_v35 = vpop.eup %2828  ;;  %v1261_v17 = vadd.f32 %v1229_v15, %v1160_v22  ;;  %v1230_v51 = vmul.f32 %v3783_v36, %v590_v14  ;;  %v591_v0 = vld [vmem:[#allocation2 + $0x16a] sm:$0xff] }
 0x127   : > { %v1584_v53 = vmul.f32 %v1552_v28, %v3830_v24  ;;  %v1459_v25 = vadd.f32 %v1427_v62, %v1299_v47  ;;  %2830 = vtanh.f32 %v1490_v50  ;;  %v1553_v54 = vadd.f32 1.0, %v2829_v35 }
 0x128   : > { %v1161_v52 = vadd.f32 %v1129_v48, %v1060_v49  ;;  %v458_v21 = vmul.f32 %v3739_v8, %v421_v45  ;;  %v1300_v30 = vadd.f32 %v3849_v23, %v1261_v17  ;;  %v527_v20 = vmul.f32 %v2873_v57, %v3743_v60 }
 0x129   : > { %1616 = vst [vmem:[#allocation2 + $0x109] sm:$0xff] %v1584_v53  ;;  %v1491_v42 = vmul.f32 0.7978846, %v1459_v25  ;;  %v727_v61 = vmul.f32 %v3770_v13, %v421_v45  ;;  %v1585_v24 = vmul.f32 %v1553_v54, %v3834_v43  ;;  %v828_v18 = vmul.f32 %v2873_v57, %v3749_v37  ;;  %v592_v43 = vld [vmem:[#allocation2 + $0x172] sm:$0xff] }
 0x12a   : > { %v1262_v47 = vadd.f32 %v1230_v51, %v1161_v52  ;;  %v1029_v4 = vmul.f32 %v3753_v41, %v421_v45  ;;  %v928_v56 = vmul.f32 %v3777_v19, %v590_v14  ;;  %v1364_v12 = vmul.f32 0.044715, %v1300_v30 }
 0x12b   : > { %2832 = vtanh.f32 %v1491_v42  ;;  %v759_v9 = vadd.f32 %v727_v61, %v658_v5  ;;  %1617 = vst [vmem:[#allocation2 + $0x111] sm:$0xff] %v1585_v24  ;;  %v1130_v33 = vmul.f32 %v2873_v57, %v3758_v10  ;;  %v459_v22 = vmul.f32 %v3739_v8, %v422_v44  ;;  %v3906_v57 = vld [vmem:[#allocation2 + $0x180] sm:$0xff] }
 0x12c   : > { %v3885_v38 = vadd.f32 %v3849_v23, %v1262_v47  ;;  %v1061_v7 = vadd.f32 %v1029_v4, %v959_v32  ;;  %v960_v40 = vadd.f32 %v928_v56, %v859_v11  ;;  %v1396_v1 = vmul.f32 %v1364_v12, %v1300_v30  ;;  %v3914_v4 = vld [vmem:[#allocation2 + $0x181] sm:$0xff] }
 0x12d   : > { %v3889_v3 = vadd.f32 %v527_v20, %v458_v21  ;;  %v528_v55 = vmul.f32 %v2874_v2, %v3743_v60  ;;  %v3892_v14 = vmul.f32 0.5, %v1300_v30  ;;  %v860_v34 = vadd.f32 %v828_v18, %v759_v9 }
 0x12e   : > { %v1365_v39 = vmul.f32 0.044715, %v3885_v38  ;;  %v1162_v5 = vadd.f32 %v1130_v33, %v1061_v7  ;;  %v1428_v58 = vmul.f32 %v1396_v1, %v1300_v30  ;;  %v629_v59 = vmul.f32 %v3723_v29, %v592_v43  ;;  %v3918_v33 = vld [vmem:[#allocation2 + $0x188] sm:$0xff] }
 0x12f   : > { %v728_v31 = vmul.f32 %v3770_v13, %v422_v44  ;;  %v829_v48 = vmul.f32 %v2874_v2, %v3749_v37  ;;  %v560_v62 = vadd.f32 %v528_v55, %v459_v22  ;;  %v929_v50 = vmul.f32 %v3777_v19, %v591_v0  ;;  %v393_v55 = vld [vmem:[#allocation2 + $0x18] sm:$0xff] }
 0x130   : > { %v1397_v28 = vmul.f32 %v1365_v39, %v3885_v38  ;;  %v1030_v15 = vmul.f32 %v3753_v41, %v422_v44  ;;  %v1460_v11 = vadd.f32 %v1428_v58, %v1300_v30  ;;  %v930_v49 = vmul.f32 %v3777_v19, %v592_v43  ;;  %v3912_v44 = vld [vmem:[#allocation2 + $0x182] sm:$0xff]  ;;  %v3933_v58 = vld [vmem:[#allocation2 + $0x18a] sm:$0xff] }
 0x131   : > { %v2831_v45 = vpop.eup %2830  ;;  %v760_v32 = vadd.f32 %v728_v31, %v659_v46  ;;  %v1131_v35 = vmul.f32 %v2874_v2, %v3758_v10  ;;  %v961_v17 = vadd.f32 %v929_v50, %v860_v34  ;;  %v1231_v21 = vmul.f32 %v3783_v36, %v591_v0  ;;  %v462_v31 = vld [vmem:[#allocation2 + $0x19] sm:$0xff] }
 0x132   : > { %v1554_v53 = vadd.f32 1.0, %v2831_v45  ;;  %v1429_v25 = vmul.f32 %v1397_v28, %v3885_v38  ;;  %v1062_v54 = vadd.f32 %v1030_v15, %v960_v40  ;;  %v1492_v52 = vmul.f32 0.7978846, %v1460_v11  ;;  %v3923_v40 = vld [vmem:[#allocation2 + $0x189] sm:$0xff]  ;;  %v563_v50 = vld [vmem:[#allocation2 + $0x1a] sm:$0xff] }
 0x133   : > { %v861_v51 = vadd.f32 %v829_v48, %v760_v32  ;;  %v1232_v42 = vmul.f32 %v3783_v36, %v592_v43  ;;  %v1031_v61 = vmul.f32 %v3753_v41, %v3906_v57  ;;  %v1263_v18 = vadd.f32 %v1231_v21, %v1162_v5  ;;  %v394_v11 = vld [vmem:[#allocation2 + $0x20] sm:$0xff] }
 0x134   : > { %v1586_v30 = vmul.f32 %v1554_v53, %v3862_v6  ;;  %v1461_v46 = vadd.f32 %v1429_v25, %v3885_v38  ;;  %v1163_v20 = vadd.f32 %v1131_v35, %v1062_v54  ;;  %2834 = vtanh.f32 %v1492_v52 }
 0x135   : > { %v2833_v24 = vpop.eup %2832  ;;  %v962_v47 = vadd.f32 %v930_v49, %v861_v51  ;;  %v1132_v56 = vmul.f32 %v3914_v4, %v3758_v10  ;;  %v1063_v7 = vadd.f32 %v1031_v61, %v961_v17  ;;  %v1302_v22 = vadd.f32 %v3849_v23, %v1263_v18 }
 0x136   : > { %v1555_v12 = vadd.f32 1.0, %v2833_v24  ;;  %1618 = vst [vmem:[#allocation2 + $0x121] sm:$0xff] %v1586_v30  ;;  %v1493_v6 = vmul.f32 0.7978846, %v1461_v46  ;;  %v1264_v9 = vadd.f32 %v1232_v42, %v1163_v20  ;;  %v1032_v43 = vmul.f32 %v3753_v41, %v3918_v33 }
 0x137   : > { %v1133_v1 = vmul.f32 %v3923_v40, %v3758_v10  ;;  %v1233_v2 = vmul.f32 %v3783_v36, %v3912_v44  ;;  %v1164_v5 = vadd.f32 %v1132_v56, %v1063_v7  ;;  %v1333_v41 = vmul.f32 0.5, %v3885_v38 }
 0x138   : > { %v1587_v39 = vmul.f32 %v1555_v12, %v3868_v63  ;;  %2836 = vtanh.f32 %v1493_v6  ;;  %v3931_v34 = vadd.f32 %v3849_v23, %v1264_v9  ;;  %v3937_v48 = vmul.f32 %v3723_v29, %v591_v0 }
 0x139   : > { %v1366_v10 = vmul.f32 0.044715, %v1302_v22  ;;  %v1064_v28 = vadd.f32 %v1032_v43, %v962_v47  ;;  %v3939_v15 = vadd.f32 %v629_v59, %v560_v62  ;;  %v1265_v45 = vadd.f32 %v1233_v2, %v1164_v5  ;;  %v463_v2 = vld [vmem:[#allocation2 + $0x21] sm:$0xff] }
 0x13a   : > { %1619 = vst [vmem:[#allocation2 + $0x129] sm:$0xff] %v1587_v39  ;;  %v1367_v63 = vmul.f32 0.044715, %v3931_v34  ;;  %v430_v32 = vmul.f32 %v3739_v8, %v393_v55  ;;  %v1234_v38 = vmul.f32 %v3783_v36, %v3933_v58  ;;  %v499_v0 = vmul.f32 %v3743_v60, %v462_v31 }
 0x13b   : > { %v1398_v49 = vmul.f32 %v1366_v10, %v1302_v22  ;;  %v1165_v35 = vadd.f32 %v1133_v1, %v1064_v28  ;;  %v3948_v25 = vadd.f32 %v3849_v23, %v1265_v45  ;;  %v600_v59 = vmul.f32 %v3723_v29, %v563_v50  ;;  %v4753_v1 = vld [vmem:[#allocation23_spill] sm:$0xff]  ;;  %v4754_v45 = vld [vmem:[#allocation13_spill] sm:$0xff] }
 0x13c   : > { %v1399_v53 = vmul.f32 %v1367_v63, %v3931_v34  ;;  %v699_v62 = vmul.f32 %v3770_v13, %v393_v55  ;;  %v531_v52 = vadd.f32 %v499_v0, %v430_v32  ;;  %v700_v51 = vmul.f32 %v3770_v13, %v394_v11  ;;  %v564_v28 = vld [vmem:[#allocation2 + $0x22] sm:$0xff] }
 0x13d   : > { %v1430_v17 = vmul.f32 %v1398_v49, %v1302_v22  ;;  %v1266_v54 = vadd.f32 %v1234_v38, %v1165_v35  ;;  %v3953_v21 = vmul.f32 0.5, %v1302_v22  ;;  %v1368_v30 = vmul.f32 0.044715, %v3948_v25  ;;  %v4755_v38 = vld [vmem:[#allocation26_spill] sm:$0xff] }
 0x13e   : > { %v1431_v42 = vmul.f32 %v1399_v53, %v3931_v34  ;;  %v731_v46 = vadd.f32 %v699_v62, %v3307_v26  ;;  %v2835_v20 = vpop.eup %2834  ;;  %v431_v47 = vmul.f32 %v3739_v8, %v394_v11  ;;  %v632_v18 = vadd.f32 %v600_v59, %v531_v52 }
 0x13f   : > { %v1462_v61 = vadd.f32 %v1430_v17, %v1302_v22  ;;  %v3959_v24 = vadd.f32 %v3849_v23, %v1266_v54  ;;  %v1556_v56 = vadd.f32 1.0, %v2835_v20  ;;  %v1400_v6 = vmul.f32 %v1368_v30, %v3948_v25  ;;  %v4757_v20 = vld [vmem:[#allocation21_spill] sm:$0xff] }
 0x140   : > { %v1463_v12 = vadd.f32 %v1431_v42, %v3931_v34  ;;  %v800_v9 = vmul.f32 %v3749_v37, %v462_v31  ;;  %v732_v26 = vadd.f32 %v700_v51, %v3309_v27  ;;  %v733_v22 = vadd.f32 %v4753_v1, %v632_v18  ;;  %v4761_v1 = vld [vmem:[#allocation29_spill] sm:$0xff] }
 0x141   : > { %v1494_v7 = vmul.f32 0.7978846, %v1462_v61  ;;  %v1369_v43 = vmul.f32 0.044715, %v3959_v24  ;;  %v1588_v39 = vmul.f32 %v1556_v56, %v3892_v14  ;;  %v1432_v5 = vmul.f32 %v1400_v6, %v3948_v25 }
 0x142   : > { %v2837_v55 = vpop.eup %2836  ;;  %v1495_v8 = vmul.f32 0.7978846, %v1463_v12  ;;  %v832_v10 = vadd.f32 %v800_v9, %v731_v46  ;;  %v834_v11 = vadd.f32 %v4754_v45, %v733_v22  ;;  %v901_v32 = vmul.f32 %v3777_v19, %v563_v50  ;;  %v4759_v12 = vld [vmem:[#allocation25_spill] sm:$0xff] }
 0x143   : > { %v1557_v63 = vadd.f32 1.0, %v2837_v55  ;;  %2838 = vtanh.f32 %v1494_v7  ;;  %v1401_v31 = vmul.f32 %v1369_v43, %v3959_v24  ;;  %1620 = vst [vmem:[#allocation2 + $0x139] sm:$0xff] %v1588_v39  ;;  %v1464_v27 = vadd.f32 %v1432_v5, %v3948_v25  ;;  %v4760_v7 = vld [vmem:[#allocation32_spill] sm:$0xff] }
 0x144   : > { %2840 = vtanh.f32 %v1495_v8  ;;  %v500_v49 = vmul.f32 %v3743_v60, %v463_v2  ;;  %v935_v0 = vadd.f32 %v4755_v38, %v834_v11  ;;  %v601_v53 = vmul.f32 %v3723_v29, %v564_v28  ;;  %v4763_v55 = vld [vmem:[#allocation28_spill] sm:$0xff]  ;;  %v4765_v11 = vld [vmem:[#allocation19_spill] sm:$0xff] }
 0x145   : > { %v1589_v14 = vmul.f32 %v1557_v63, %v1333_v41  ;;  %v1433_v35 = vmul.f32 %v1401_v31, %v3959_v24  ;;  %v1496_v59 = vmul.f32 0.7978846, %v1464_v27  ;;  %v933_v62 = vadd.f32 %v901_v32, %v832_v10  ;;  %v4756_v41 = vld [vmem:[#allocation24_spill] sm:$0xff]  ;;  %v4764_v31 = vld [vmem:[#allocation27_spill] sm:$0xff] }
 0x146   : > { %v532_v17 = vadd.f32 %v500_v49, %v431_v47  ;;  %v801_v54 = vmul.f32 %v3749_v37, %v463_v2  ;;  %v1037_v51 = vadd.f32 %v3500_v16, %v935_v0  ;;  %v902_v50 = vmul.f32 %v3777_v19, %v564_v28  ;;  %v4758_v16 = vld [vmem:[#allocation14_spill] sm:$0xff] }
 0x147   : > { %1621 = vst [vmem:[#allocation2 + $0x141] sm:$0xff] %v1589_v14  ;;  %v1465_v52 = vadd.f32 %v1433_v35, %v3959_v24  ;;  %v660_v60 = vadd.f32 %v3937_v48, %v3889_v3  ;;  %2842 = vtanh.f32 %v1496_v59  ;;  %v1035_v42 = vadd.f32 %v4756_v41, %v933_v62  ;;  %v4767_v62 = vld [vmem:[#allocation30_spill] sm:$0xff] }
 0x148   : > { %v633_v30 = vadd.f32 %v601_v53, %v532_v17  ;;  %v833_v29 = vadd.f32 %v801_v54, %v732_v26  ;;  %v1138_v61 = vadd.f32 %v4757_v20, %v1037_v51  ;;  %v729_v47 = vmul.f32 %v3770_v13, %v3906_v57  ;;  %v4762_v57 = vld [vmem:[#allocation18_spill] sm:$0xff]  ;;  %v4024_v51 = vld [vmem:[#allocation8 + $0x1] ss:$0 sm:$0xff]  ;;  %v4770_v20 = vld [vmem:[#allocation16_spill] sm:$0xff] }
 0x149   : > { %v1497_v46 = vmul.f32 0.7978846, %v1465_v52  ;;  %v730_v18 = vmul.f32 %v3770_v13, %v3918_v33  ;;  %v1136_v56 = vadd.f32 %v4758_v16, %v1035_v42  ;;  %v830_v3 = vmul.f32 %v3914_v4, %v3749_v37  ;;  %v1697_v52 = vld [vmem:[#allocation2 + $0x1] sm:$0xff]  ;;  %v4771_v16 = vld [vmem:[#allocation33_spill] sm:$0xff] }
 0x14a   : > { %v734_v6 = vadd.f32 %v4759_v12, %v633_v30  ;;  %v934_v9 = vadd.f32 %v902_v50, %v833_v29  ;;  %v1335_v48 = vmul.f32 0.5, %v3931_v34  ;;  %v1239_v43 = vadd.f32 %v4760_v7, %v1138_v61  ;;  %v2877_v30 = vld [vmem:[#allocation2] sm:$0xff] }
 0x14b   : > { %2844 = vtanh.f32 %v1497_v46  ;;  %v761_v26 = vadd.f32 %v729_v47, %v660_v60  ;;  %v1237_v22 = vadd.f32 %v4761_v1, %v1136_v56  ;;  %v931_v33 = vmul.f32 %v3777_v19, %v3912_v44  ;;  %v4769_v60 = vld [vmem:[#allocation22_spill] sm:$0xff]  ;;  %v1199_v47 = vld [vmem:[#allocation2 + $0x1a2] sm:$0xff] }
 0x14c   : > { %v835_v2 = vadd.f32 %v4762_v57, %v734_v6  ;;  %v1036_v13 = vadd.f32 %v4763_v55, %v934_v9  ;;  %v4002_v8 = vadd.f32 %v3849_v23, %v1239_v43  ;;  %v762_v4 = vadd.f32 %v730_v18, %v3939_v15  ;;  %v4014_v15 = vld [vmem:[#allocation8] ss:$0 sm:$0xff]  ;;  %v4772_v57 = vld [vmem:[#allocation20_spill] sm:$0xff] }
 0x14d   : > { %v2839_v39 = vpop.eup %2838  ;;  %v862_v34 = vadd.f32 %v830_v3, %v761_v26  ;;  %v831_v5 = vmul.f32 %v3923_v40, %v3749_v37  ;;  %v4008_v63 = vadd.f32 %v3849_v23, %v1237_v22  ;;  %v1336_v32 = vmul.f32 0.5, %v3948_v25  ;;  %v4766_v40 = vld [vmem:[#allocation31_spill] sm:$0xff] }
 0x14e   : > { %v2841_v10 = vpop.eup %2840  ;;  %v1558_v28 = vadd.f32 1.0, %v2839_v39  ;;  %v936_v45 = vadd.f32 %v4764_v31, %v835_v2  ;;  %v1137_v27 = vadd.f32 %v4765_v11, %v1036_v13  ;;  %v1342_v49 = vmul.f32 0.044715, %v4002_v8  ;;  %v4768_v25 = vld [vmem:[#allocation15_spill] sm:$0xff] }
 0x14f   : > { %v1559_v44 = vadd.f32 1.0, %v2841_v10  ;;  %v963_v14 = vadd.f32 %v931_v33, %v862_v34  ;;  %v1340_v37 = vmul.f32 0.044715, %v4008_v63  ;;  %v932_v0 = vmul.f32 %v3777_v19, %v3933_v58  ;;  %v1698_v34 = vld [vmem:[#allocation2 + $0x9] sm:$0xff] }
 0x150   : > { %v1590_v35 = vmul.f32 %v1558_v28, %v3953_v21  ;;  %v1038_v38 = vadd.f32 %v4766_v40, %v936_v45  ;;  %v1374_v59 = vmul.f32 %v1342_v49, %v4002_v8  ;;  %v1238_v17 = vadd.f32 %v4767_v62, %v1137_v27  ;;  %v4773_v27 = vld [vmem:[#allocation17_spill] sm:$0xff] }
 0x151   : > { %v1591_v53 = vmul.f32 %v1559_v44, %v1335_v48  ;;  %v1065_v54 = vadd.f32 %v4768_v25, %v963_v14  ;;  %v2843_v50 = vpop.eup %2842  ;;  %v1372_v21 = vmul.f32 %v1340_v37, %v4008_v63  ;;  %v863_v42 = vadd.f32 %v831_v5, %v762_v4  ;;  %v1798_v4 = vld [vmem:[#allocation2 + $0x2] sm:$0xff] }
 0x152   : > { %1622 = vst [vmem:[#allocation2 + $0x151] sm:$0xff] %v1590_v35  ;;  %v1139_v41 = vadd.f32 %v4769_v60, %v1038_v38  ;;  %v1665_v19 = vmul.f32 %v2877_v30, %v4014_v15  ;;  %v1560_v58 = vadd.f32 1.0, %v2843_v50  ;;  %v1406_v29 = vmul.f32 %v1374_v59, %v4002_v8  ;;  %v4050_v59 = vld [vmem:[#allocation8 + $0x6] ss:$0 sm:$0xff]  ;;  %v2305_v60 = vld [vmem:[#allocation2 + $0x49] sm:$0xff] }
 0x153   : > { %1623 = vst [vmem:[#allocation2 + $0x159] sm:$0xff] %v1591_v53  ;;  %v1277_v46 = vadd.f32 %v3849_v23, %v1238_v17  ;;  %v1166_v61 = vadd.f32 %v4770_v20, %v1065_v54  ;;  %v1404_v18 = vmul.f32 %v1372_v21, %v4008_v63  ;;  %v964_v12 = vadd.f32 %v932_v0, %v863_v42  ;;  %v4066_v20 = vld [vmem:[#allocation8 + $0x8] ss:$0 sm:$0xff] }
 0x154   : > { %v1240_v56 = vadd.f32 %v4771_v16, %v1139_v41  ;;  %v1734_v6 = vmul.f32 %v4024_v51, %v1697_v52  ;;  %v1337_v3 = vmul.f32 0.5, %v3959_v24  ;;  %v1592_v48 = vmul.f32 %v1560_v58, %v1336_v32  ;;  %v4042_v24 = vld [vmem:[#allocation8 + $0x2] ss:$0 sm:$0xff]  ;;  %v4062_v58 = vld [vmem:[#allocation8 + $0x7] ss:$0 sm:$0xff] }
 0x155   : > { %v2845_v9 = vpop.eup %2844  ;;  %v1438_v7 = vadd.f32 %v1406_v29, %v4002_v8  ;;  %v1341_v43 = vmul.f32 0.044715, %v1277_v46  ;;  %v1436_v1 = vadd.f32 %v1404_v18, %v4008_v63  ;;  %v1267_v2 = vadd.f32 %v4772_v57, %v1166_v61  ;;  %4774 = vst [vmem:[#allocation23_spill] sm:$0xff] %v4062_v58  ;;  %v4071_v61 = vld [vmem:[#allocation2 + $0x51] sm:$0xff]  ;;  %v4075_v16 = vld [vmem:[#allocation8 + $0x3] ss:$0 sm:$0xff] }
 0x156   : > { %v1561_v26 = vadd.f32 1.0, %v2845_v9  ;;  %v1279_v22 = vadd.f32 %v3849_v23, %v1240_v56  ;;  %v1236_v55 = vmul.f32 %v3783_v36, %v1199_v47  ;;  %1624 = vst [vmem:[#allocation2 + $0x169] sm:$0xff] %v1592_v48  ;;  %v1066_v39 = vadd.f32 %v4768_v25, %v964_v12  ;;  %v1799_v36 = vld [vmem:[#allocation2 + $0xa] sm:$0xff]  ;;  %v4073_v47 = vld [vmem:[#allocation2 + $0x52] sm:$0xff]  ;;  %v4099_v57 = vld [vmem:[#allocation8 + $0x5] ss:$0 sm:$0xff] }
 0x157   : > { %v1470_v13 = vmul.f32 0.7978846, %v1438_v7  ;;  %v1373_v33 = vmul.f32 %v1341_v43, %v1277_v46  ;;  %v1468_v10 = vmul.f32 0.7978846, %v1436_v1  ;;  %v1766_v31 = vadd.f32 %v1734_v6, %v1665_v19  ;;  %v2204_v25 = vld [vmem:[#allocation2 + $0x48] sm:$0xff]  ;;  %v4091_v43 = vld [vmem:[#allocation2 + $0x60] sm:$0xff] }
 0x158   : > { %v1593_v5 = vmul.f32 %v1561_v26, %v1337_v3  ;;  %v1343_v28 = vmul.f32 0.044715, %v1279_v22  ;;  %v1306_v11 = vadd.f32 %v3849_v23, %v1267_v2  ;;  %v1167_v44 = vadd.f32 %v4773_v27, %v1066_v39  ;;  %v4093_v26 = vld [vmem:[#allocation2 + $0x61] sm:$0xff] }
 0x159   : > { %2846 = vtanh.f32 %v1470_v13  ;;  %v1405_v45 = vmul.f32 %v1373_v33, %v1277_v46  ;;  %v1835_v49 = vmul.f32 %v4042_v24, %v1798_v4  ;;  %v1735_v14 = vmul.f32 %v4024_v51, %v1698_v34  ;;  %v4095_v1 = vld [vmem:[#allocation2 + $0x62] sm:$0xff] }
 0x15a   : > { %1625 = vst [vmem:[#allocation2 + $0x171] sm:$0xff] %v1593_v5  ;;  %2848 = vtanh.f32 %v1468_v10  ;;  %v1375_v32 = vmul.f32 %v1343_v28, %v1279_v22  ;;  %v1310_v35 = vmul.f32 0.5, %v4002_v8  ;;  %v1370_v40 = vmul.f32 0.044715, %v1306_v11  ;;  %v2406_v8 = vld [vmem:[#allocation2 + $0x4a] sm:$0xff] }
 0x15b   : > { %v1437_v37 = vadd.f32 %v1405_v45, %v1277_v46  ;;  %v1268_v38 = vadd.f32 %v1236_v55, %v1167_v44  ;;  %v1308_v0 = vmul.f32 0.5, %v4008_v63  ;;  %v1767_v62 = vadd.f32 %v1735_v14, %v1665_v19  ;;  %v4064_v19 = vld [vmem:[#allocation2 + $0x50] sm:$0xff] }
 0x15c   : > { %v1407_v53 = vmul.f32 %v1375_v32, %v1279_v22  ;;  %v1836_v17 = vmul.f32 %v4042_v24, %v1799_v36  ;;  %v4053_v54 = vmul.f32 0.5, %v1277_v46  ;;  %v1402_v50 = vmul.f32 %v1370_v40, %v1306_v11 }
 0x15d   : > { %v1469_v52 = vmul.f32 0.7978846, %v1437_v37  ;;  %v1307_v21 = vadd.f32 %v3849_v23, %v1268_v38  ;;  %v4056_v41 = vmul.f32 0.5, %v1279_v22  ;;  %v4058_v30 = vmul.f32 0.5, %v1306_v11 }
 0x15e   : > { %v1439_v42 = vadd.f32 %v1407_v53, %v1279_v22  ;;  %v4060_v63 = vadd.f32 %v1835_v49, %v1766_v31  ;;  %v1434_v29 = vmul.f32 %v1402_v50, %v1306_v11  ;;  %v4069_v23 = vmul.f32 %v4050_v59, %v2204_v25  ;;  %v4097_v22 = vld [vmem:[#allocation8 + $0x4] ss:$0 sm:$0xff]  ;;  %v4153_v50 = vld [vmem:[#allocation2 + $0x78] sm:$0xff] }
 0x15f   : > { %2850 = vtanh.f32 %v1469_v52  ;;  %v1371_v46 = vmul.f32 0.044715, %v1307_v21  ;;  %v4077_v56 = vadd.f32 %v1836_v17, %v1767_v62  ;;  %v4080_v12 = vmul.f32 %v4062_v58, %v2305_v60 }
 0x160   : > { %v1471_v18 = vmul.f32 0.7978846, %v1439_v42  ;;  %v4083_v6 = vmul.f32 %v4066_v20, %v2406_v8  ;;  %v1466_v9 = vadd.f32 %v1434_v29, %v1306_v11  ;;  %v4085_v3 = vmul.f32 0.5, %v1307_v21  ;;  %v4160_v29 = vld [vmem:[#allocation2 + $0x7a] sm:$0xff] }
 0x161   : > { %v1403_v48 = vmul.f32 %v1371_v46, %v1307_v21  ;;  %v4089_v7 = vmul.f32 %v4050_v59, %v4064_v19  ;;  %v4103_v2 = vmul.f32 %v4062_v58, %v4071_v61  ;;  %v4107_v55 = vmul.f32 %v4066_v20, %v4073_v47  ;;  %4783 = vst [vmem:[#allocation18_spill] sm:$0xff] %v4160_v29 }
 0x162   : > { %4775 = vst [vmem:[#allocation13_spill] sm:$0xff] %v4083_v6  ;;  %2852 = vtanh.f32 %v1471_v18  ;;  %v4110_v13 = vmul.f32 %v4075_v16, %v2204_v25  ;;  %v1498_v39 = vmul.f32 0.7978846, %v1466_v9  ;;  %v4113_v34 = vmul.f32 %v4097_v22, %v2305_v60  ;;  %v4162_v18 = vld [vmem:[#allocation2 + $0x68] sm:$0xff] }
 0x163   : > { %4776 = vst [vmem:[#allocation26_spill] sm:$0xff] %v4103_v2  ;;  %4777 = vst [vmem:[#allocation24_spill] sm:$0xff] %v4107_v55  ;;  %v2847_v33 = vpop.eup %2846  ;;  %v1435_v4 = vmul.f32 %v1403_v48, %v1307_v21  ;;  %v4116_v5 = vmul.f32 %v4099_v57, %v2406_v8  ;;  %v4120_v31 = vmul.f32 %v4050_v59, %v4091_v43  ;;  %v4164_v9 = vld [vmem:[#allocation2 + $0x69] sm:$0xff] }
 0x164   : > { %v2849_v10 = vpop.eup %2848  ;;  %v1534_v28 = vadd.f32 1.0, %v2847_v33  ;;  %v4124_v45 = vmul.f32 %v4062_v58, %v4093_v26  ;;  %v4128_v11 = vmul.f32 %v4066_v20, %v4095_v1  ;;  %2854 = vtanh.f32 %v1498_v39  ;;  %4784 = vst [vmem:[#allocation28_spill] sm:$0xff] %v4162_v18  ;;  %4785 = vst [vmem:[#allocation27_spill] sm:$0xff] %v4164_v9 }
 0x165   : > { %4778 = vst [vmem:[#allocation21_spill] sm:$0xff] %v4120_v31  ;;  %v1532_v27 = vadd.f32 1.0, %v2849_v10  ;;  %v1467_v44 = vadd.f32 %v1435_v4, %v1307_v21  ;;  %v4132_v36 = vmul.f32 %v4075_v16, %v4064_v19  ;;  %v4136_v49 = vmul.f32 %v4097_v22, %v4071_v61  ;;  %v4170_v4 = vld [vmem:[#allocation2 + $0x6a] sm:$0xff] }
 0x166   : > { %4779 = vst [vmem:[#allocation14_spill] sm:$0xff] %v4124_v45  ;;  %4780 = vst [vmem:[#allocation25_spill] sm:$0xff] %v4128_v11  ;;  %v1566_v32 = vmul.f32 %v1534_v28, %v1310_v35  ;;  %v1671_v14 = vmul.f32 %v4014_v15, %v2204_v25  ;;  %v1740_v37 = vmul.f32 %v4024_v51, %v2305_v60 }
 0x167   : > { %4781 = vst [vmem:[#allocation32_spill] sm:$0xff] %v4136_v49  ;;  %v1564_v40 = vmul.f32 %v1532_v27, %v1308_v0  ;;  %v1499_v38 = vmul.f32 0.7978846, %v1467_v44  ;;  %v4142_v53 = vmul.f32 %v4099_v57, %v4073_v47  ;;  %v1841_v62 = vmul.f32 %v4042_v24, %v2406_v8  ;;  %v4155_v0 = vld [vmem:[#allocation2 + $0x79] sm:$0xff]  ;;  %4786 = vst [vmem:[#allocation19_spill] sm:$0xff] %v4170_v4 }
 0x168   : > { %1598 = vst [vmem:[#allocation2 + $0x31] sm:$0xff] %v1566_v32  ;;  %v4146_v17 = vmul.f32 %v4062_v58, %v1566_v32  ;;  %v4149_v35 = vmul.f32 %v4097_v22, %v1566_v32  ;;  %v1772_v52 = vadd.f32 %v1740_v37, %v1671_v14  ;;  %v1942_v25 = vmul.f32 %v4075_v16, %v4091_v43 }
 0x169   : > { %4782 = vst [vmem:[#allocation29_spill] sm:$0xff] %v4142_v53  ;;  %v2851_v21 = vpop.eup %2850  ;;  %1596 = vst [vmem:[#allocation2 + $0x19] sm:$0xff] %v1564_v40  ;;  %2856 = vtanh.f32 %v1499_v38  ;;  %v2037_v60 = vmul.f32 %v4097_v22, %v1564_v40  ;;  %v1736_v8 = vmul.f32 %v4024_v51, %v1564_v40  ;;  %v1738_v42 = vmul.f32 %v4024_v51, %v1566_v32 }
 0x16a   : > { %v1533_v46 = vadd.f32 1.0, %v2851_v21  ;;  %v1873_v48 = vadd.f32 %v1841_v62, %v1772_v52  ;;  %v2043_v33 = vmul.f32 %v4097_v22, %v4093_v26  ;;  %v2144_v39 = vmul.f32 %v4099_v57, %v4095_v1  ;;  %v4189_v62 = vld [vmem:[#allocation2 + $0x80] sm:$0xff] }
 0x16b   : > { %v2245_v10 = vmul.f32 %v4050_v59, %v4153_v50  ;;  %v4176_v28 = vmul.f32 %v4062_v58, %v4155_v0  ;;  %v1672_v27 = vmul.f32 %v4014_v15, %v4064_v19  ;;  %v1741_v44 = vmul.f32 %v4024_v51, %v4071_v61  ;;  %4787 = vst [vmem:[#allocation31_spill] sm:$0xff] %v4189_v62  ;;  %v4191_v52 = vld [vmem:[#allocation2 + $0x81] sm:$0xff] }
 0x16c   : > { %v2853_v32 = vpop.eup %2852  ;;  %v1565_v14 = vmul.f32 %v1533_v46, %v4053_v54  ;;  %v1974_v37 = vadd.f32 %v1942_v25, %v1873_v48  ;;  %v4185_v40 = vmul.f32 %v4066_v20, %v4160_v29  ;;  %v1842_v38 = vmul.f32 %v4042_v24, %v4073_v47  ;;  %4788 = vst [vmem:[#allocation30_spill] sm:$0xff] %v4191_v52  ;;  %v4197_v25 = vld [vmem:[#allocation2 + $0x82] sm:$0xff] }
 0x16d   : > { %v1535_v21 = vadd.f32 1.0, %v2853_v32  ;;  %v1773_v19 = vadd.f32 %v1741_v44, %v1672_v27  ;;  %v1943_v61 = vmul.f32 %v4075_v16, %v4162_v18  ;;  %v2044_v54 = vmul.f32 %v4097_v22, %v4164_v9  ;;  %4789 = vst [vmem:[#allocation15_spill] sm:$0xff] %v4197_v25 }
 0x16e   : > { %1597 = vst [vmem:[#allocation2 + $0x21] sm:$0xff] %v1565_v14  ;;  %v2038_v46 = vmul.f32 %v4097_v22, %v1565_v14  ;;  %v4201_v48 = vmul.f32 %v4024_v51, %v1565_v14  ;;  %v2075_v47 = vadd.f32 %v2043_v33, %v1974_v37  ;;  %v2145_v11 = vmul.f32 %v4099_v57, %v4170_v4  ;;  %v2855_v32 = vpop.eup %2854 }
 0x16f   : > { %v1567_v27 = vmul.f32 %v1535_v21, %v4056_v41  ;;  %v2202_v44 = vld [vmem:[#allocation2 + $0x30] sm:$0xff]  ;;  %v1874_v55 = vadd.f32 %v1842_v38, %v1773_v19  ;;  %v4208_v9 = vmul.f32 %v4050_v59, %v4189_v62  ;;  %v4212_v45 = vmul.f32 %v4062_v58, %v4191_v52 }
 0x170   : > { %v1562_v18 = vadd.f32 1.0, %v2855_v32  ;;  %v1899_v14 = vld [vmem:[#allocation2 + $0x18] sm:$0xff]  ;;  %v2239_v33 = vmul.f32 %v4050_v59, %v2202_v44  ;;  %v1669_v37 = vmul.f32 %v4014_v15, %v2202_v44  ;;  %v4218_v4 = vmul.f32 %v4066_v20, %v4197_v25 }
 0x171   : > { %1599 = vst [vmem:[#allocation2 + $0x39] sm:$0xff] %v1567_v27  ;;  %v1936_v41 = vmul.f32 %v4075_v16, %v1899_v14  ;;  %v4222_v38 = vmul.f32 %v4062_v58, %v1567_v27  ;;  %v1667_v21 = vmul.f32 %v4014_v15, %v1899_v14  ;;  %v1938_v19 = vmul.f32 %v4075_v16, %v2202_v44 }
 0x172   : > { %v1594_v32 = vmul.f32 %v1562_v18, %v4058_v30  ;;  %v4228_v52 = vmul.f32 %v4097_v22, %v1567_v27  ;;  %v1770_v62 = vadd.f32 %v1738_v42, %v1669_v37  ;;  %v2176_v53 = vadd.f32 %v2144_v39, %v2075_v47 }
 0x173   : > { %v2857_v2 = vpop.eup %2856  ;;  %v1968_v25 = vadd.f32 %v1936_v41, %v4060_v63  ;;  %v1768_v31 = vadd.f32 %v1736_v8, %v1667_v21  ;;  %v1739_v6 = vmul.f32 %v4024_v51, %v1567_v27  ;;  %v1975_v29 = vadd.f32 %v1943_v61, %v1874_v55 }
 0x174   : > { %1626 = vst [vmem:[#allocation2 + $0x181] sm:$0xff] %v1594_v32  ;;  %v1563_v58 = vadd.f32 1.0, %v2857_v2  ;;  %v2277_v49 = vadd.f32 %v2245_v10, %v2176_v53  ;;  %v1673_v44 = vmul.f32 %v4014_v15, %v4091_v43  ;;  %v1742_v30 = vmul.f32 %v4024_v51, %v4093_v26 }
 0x175   : > { %v2069_v18 = vadd.f32 %v2037_v60, %v1968_v25  ;;  %v2101_v14 = vld [vmem:[#allocation2 + $0x1a] sm:$0xff]  ;;  %v2102_v39 = vld [vmem:[#allocation2 + $0x22] sm:$0xff]  ;;  %v2076_v47 = vadd.f32 %v2044_v54, %v1975_v29  ;;  %v1843_v63 = vmul.f32 %v4042_v24, %v4095_v1  ;;  %v4240_v55 = vmul.f32 %v4075_v16, %v4153_v50 }
 0x176   : > { %v1900_v42 = vld [vmem:[#allocation2 + $0x20] sm:$0xff]  ;;  %v1595_v2 = vmul.f32 %v1563_v58, %v4085_v3  ;;  %v2138_v53 = vmul.f32 %v4099_v57, %v2101_v14  ;;  %v2139_v26 = vmul.f32 %v4099_v57, %v2102_v39  ;;  %v1837_v60 = vmul.f32 %v4042_v24, %v2101_v14 }
 0x177   : > { %v1937_v43 = vmul.f32 %v4075_v16, %v1900_v42  ;;  %v1668_v8 = vmul.f32 %v4014_v15, %v1900_v42  ;;  %v1838_v29 = vmul.f32 %v4042_v24, %v2102_v39  ;;  %v2378_v1 = vadd.f32 %v4176_v28, %v2277_v49 }
 0x178   : > { %1627 = vst [vmem:[#allocation2 + $0x189] sm:$0xff] %v1595_v2  ;;  %v2170_v10 = vadd.f32 %v2138_v53, %v2069_v18  ;;  %v2404_v61 = vld [vmem:[#allocation2 + $0x32] sm:$0xff]  ;;  %v2405_v3 = vld [vmem:[#allocation2 + $0x3a] sm:$0xff]  ;;  %v2177_v25 = vadd.f32 %v2145_v11, %v2076_v47  ;;  %v1774_v27 = vadd.f32 %v1742_v30, %v1673_v44  ;;  %v1869_v32 = vadd.f32 %v1837_v60, %v1768_v31 }
 0x179   : > { %v1969_v54 = vadd.f32 %v1937_v43, %v4077_v56  ;;  %v2203_v58 = vld [vmem:[#allocation2 + $0x38] sm:$0xff]  ;;  %v2441_v37 = vmul.f32 %v4066_v20, %v2404_v61  ;;  %v2442_v21 = vmul.f32 %v4066_v20, %v2405_v3  ;;  %v2140_v49 = vmul.f32 %v4099_v57, %v2404_v61  ;;  %v4264_v31 = vld [vmem:[%s4700_s4] ss:$0 sm:$0xff] }
 0x17a   : > { %v2240_v41 = vmul.f32 %v4050_v59, %v2203_v58  ;;  %v2271_v14 = vadd.f32 %v2239_v33, %v2170_v10  ;;  %v1769_v28 = vadd.f32 %v4201_v48, %v1668_v8  ;;  %v1970_v18 = vadd.f32 %v1938_v19, %v1869_v32  ;;  %v4792_v32 = vld [vmem:[#allocation13_spill] sm:$0xff] }
 0x17b   : > { %v2070_v42 = vadd.f32 %v2038_v46, %v1969_v54  ;;  %v1939_v56 = vmul.f32 %v4075_v16, %v2203_v58  ;;  %v2141_v39 = vmul.f32 %v4099_v57, %v2405_v3  ;;  %v1839_v11 = vmul.f32 %v4042_v24, %v2404_v61 }
 0x17c   : > { %v2372_v44 = vadd.f32 %v4146_v17, %v2271_v14  ;;  %v1870_v47 = vadd.f32 %v1838_v29, %v1769_v28  ;;  %v1670_v2 = vmul.f32 %v4014_v15, %v2203_v58  ;;  %v2071_v46 = vadd.f32 %v4149_v35, %v1970_v18  ;;  %v4793_v14 = vld [vmem:[#allocation21_spill] sm:$0xff] }
 0x17d   : > { %v2171_v30 = vadd.f32 %v2139_v26, %v2070_v42  ;;  %v1871_v48 = vadd.f32 %v1839_v11, %v1770_v62  ;;  %v1840_v33 = vmul.f32 %v4042_v24, %v2405_v3  ;;  %v2479_v19 = vadd.f32 %v4185_v40, %v2378_v1  ;;  %v4795_v28 = vld [vmem:[#allocation29_spill] sm:$0xff] }
 0x17e   : > { %v2473_v53 = vadd.f32 %v2441_v37, %v2372_v44  ;;  %v1971_v17 = vadd.f32 %v1939_v56, %v1870_v47  ;;  %v1771_v26 = vadd.f32 %v1739_v6, %v1670_v2  ;;  %v2172_v60 = vadd.f32 %v2140_v49, %v2071_v46  ;;  %v4291_v37 = vld [vmem:[#allocation2 + $0x90] sm:$0xff]  ;;  %v4796_v56 = vld [vmem:[#allocation28_spill] sm:$0xff] }
 0x17f   : > { %v2272_v43 = vadd.f32 %v2240_v41, %v2171_v30  ;;  %v1972_v8 = vadd.f32 %v4110_v13, %v1871_v48  ;;  %v2518_v29 = vadd.f32 %v4264_v31, %v2479_v19  ;;  %v2278_v10 = vadd.f32 %v4208_v9, %v2177_v25  ;;  %v4791_v41 = vld [vmem:[#allocation18_spill] sm:$0xff]  ;;  %v4798_v48 = vld [vmem:[#allocation24_spill] sm:$0xff] }
 0x180   : > { %v2512_v61 = vadd.f32 %v4264_v31, %v2473_v53  ;;  %v2072_v62 = vadd.f32 %v4228_v52, %v1971_v17  ;;  %v1872_v54 = vadd.f32 %v1840_v33, %v1771_v26  ;;  %v2273_v40 = vadd.f32 %v4069_v23, %v2172_v60  ;;  %v4308_v11 = vld [vmem:[#allocation2 + $0x91] sm:$0xff]  ;;  %v4799_v53 = vld [vmem:[#allocation27_spill] sm:$0xff] }
 0x181   : > { %v2373_v35 = vadd.f32 %v4222_v38, %v2272_v43  ;;  %v2073_v1 = vadd.f32 %v4113_v34, %v1972_v8  ;;  %2550 = vst [vmem:[%s4279_s13 + $0x30] sm:$0xff] %v2518_v29  ;;  %v2379_v6 = vadd.f32 %v4212_v45, %v2278_v10  ;;  %v1875_v13 = vadd.f32 %v1843_v63, %v1774_v27  ;;  %v4790_v27 = vld [vmem:[#allocation32_spill] sm:$0xff]  ;;  %v4797_v30 = vld [vmem:[#allocation14_spill] sm:$0xff]  ;;  %v4800_v43 = vld [vmem:[#allocation23_spill] sm:$0xff] }
 0x182   : > { %2544 = vst [vmem:[%s4279_s13] sm:$0xff] %v2512_v61  ;;  %v2173_v58 = vadd.f32 %v2141_v39, %v2072_v62  ;;  %v1973_v52 = vadd.f32 %v4132_v36, %v1872_v54  ;;  %v2045_v23 = vmul.f32 %v4097_v22, %v4155_v0  ;;  %v2374_v34 = vadd.f32 %v4080_v12, %v2273_v40  ;;  %v4318_v26 = vld [vmem:[#allocation2 + $0x92] sm:$0xff]  ;;  %v4802_v10 = vld [vmem:[#allocation19_spill] sm:$0xff] }
 0x183   : > { %v2474_v9 = vadd.f32 %v2442_v21, %v2373_v35  ;;  %v2174_v38 = vadd.f32 %v4116_v5, %v2073_v1  ;;  %v2480_v3 = vadd.f32 %v4218_v4, %v2379_v6  ;;  %v1976_v25 = vadd.f32 %v4240_v55, %v1875_v13  ;;  %v4794_v55 = vld [vmem:[#allocation26_spill] sm:$0xff]  ;;  %v4801_v8 = vld [vmem:[#allocation25_spill] sm:$0xff] }
 0x184   : > { %v2274_v63 = vadd.f32 %v4089_v7, %v2173_v58  ;;  %v2074_v36 = vadd.f32 %v4790_v27, %v1973_v52  ;;  %v2146_v21 = vmul.f32 %v4099_v57, %v4791_v41  ;;  %v2475_v12 = vadd.f32 %v4792_v32, %v2374_v34  ;;  %v4803_v34 = vld [vmem:[#allocation31_spill] sm:$0xff]  ;;  %v4804_v32 = vld [vmem:[#allocation30_spill] sm:$0xff] }
 0x185   : > { %v2513_v45 = vadd.f32 %v4264_v31, %v2474_v9  ;;  %v2275_v5 = vadd.f32 %v4793_v14, %v2174_v38  ;;  %v2519_v4 = vadd.f32 %v4264_v31, %v2480_v3  ;;  %v2077_v42 = vadd.f32 %v2045_v23, %v1976_v25  ;;  %v2211_v3 = vld [vmem:[#allocation2 + $0x98] sm:$0xff]  ;;  %v4805_v14 = vld [vmem:[#allocation15_spill] sm:$0xff] }
 0x186   : > { %v2375_v49 = vadd.f32 %v4794_v55, %v2274_v63  ;;  %v2175_v18 = vadd.f32 %v4795_v28, %v2074_v36  ;;  %v2244_v7 = vmul.f32 %v4050_v59, %v4796_v56  ;;  %v2247_v39 = vmul.f32 %v4050_v59, %v4291_v37  ;;  %v2312_v63 = vld [vmem:[#allocation2 + $0x99] sm:$0xff] }
 0x187   : > { %2545 = vst [vmem:[%s4279_s13 + $0x8] sm:$0xff] %v2513_v45  ;;  %v2514_v44 = vadd.f32 %v4264_v31, %v2475_v12  ;;  %v2376_v47 = vadd.f32 %v4797_v30, %v2275_v5  ;;  %2551 = vst [vmem:[%s4279_s13 + $0x38] sm:$0xff] %v2519_v4  ;;  %v2178_v2 = vadd.f32 %v2146_v21, %v2077_v42  ;;  %v2413_v4 = vld [vmem:[#allocation2 + $0x9a] sm:$0xff] }
 0x188   : > { %v1674_v46 = vmul.f32 %v4014_v15, %v4796_v56  ;;  %v2476_v33 = vadd.f32 %v4798_v48, %v2375_v49  ;;  %v2276_v19 = vadd.f32 %v2244_v7, %v2175_v18  ;;  %v2345_v17 = vmul.f32 %v4800_v43, %v4799_v53  ;;  %v4353_v18 = vld [vmem:[#allocation2 + $0xa8] sm:$0xff] }
 0x189   : > { %v1743_v60 = vmul.f32 %v4024_v51, %v4799_v53  ;;  %2546 = vst [vmem:[%s4279_s13 + $0x10] sm:$0xff] %v2514_v44  ;;  %v2477_v29 = vadd.f32 %v4801_v8, %v2376_v47  ;;  %v2446_v61 = vmul.f32 %v4066_v20, %v4802_v10  ;;  %v2279_v35 = vadd.f32 %v2247_v39, %v2178_v2  ;;  %v4355_v56 = vld [vmem:[#allocation2 + $0xa9] sm:$0xff] }
 0x18a   : > { %v2348_v62 = vmul.f32 %v4800_v43, %v4308_v11  ;;  %v2515_v54 = vadd.f32 %v4264_v31, %v2476_v33  ;;  %v2377_v40 = vadd.f32 %v2345_v17, %v2276_v19  ;;  %v1844_v6 = vmul.f32 %v4042_v24, %v4802_v10  ;;  %v2414_v48 = vld [vmem:[#allocation2 + $0xaa] sm:$0xff] }
 0x18b   : > { %v1775_v1 = vadd.f32 %v1743_v60, %v1674_v46  ;;  %v2516_v13 = vadd.f32 %v4264_v31, %v2477_v29  ;;  %v2449_v58 = vmul.f32 %v4066_v20, %v4318_v26  ;;  %v1945_v38 = vmul.f32 %v4075_v16, %v4803_v34 }
 0x18c   : > { %v2380_v9 = vadd.f32 %v2348_v62, %v2279_v35  ;;  %2547 = vst [vmem:[%s4279_s13 + $0x18] sm:$0xff] %v2515_v54  ;;  %v2478_v52 = vadd.f32 %v2446_v61, %v2377_v40  ;;  %v1675_v25 = vmul.f32 %v4014_v15, %v4153_v50  ;;  %v1744_v27 = vmul.f32 %v4024_v51, %v4155_v0  ;;  %v2213_v35 = vld [vmem:[#allocation2 + $0xb0] sm:$0xff] }
 0x18d   : > { %v1876_v23 = vadd.f32 %v1844_v6, %v1775_v1  ;;  %2548 = vst [vmem:[%s4279_s13 + $0x20] sm:$0xff] %v2516_v13  ;;  %v2046_v12 = vmul.f32 %v4097_v22, %v4804_v32  ;;  %v2147_v5 = vmul.f32 %v4099_v57, %v4805_v14  ;;  %v2248_v50 = vmul.f32 %v4050_v59, %v2211_v3 }
 0x18e   : > { %v2481_v45 = vadd.f32 %v2449_v58, %v2380_v9  ;;  %v2517_v36 = vadd.f32 %v4264_v31, %v2478_v52  ;;  %v1776_v55 = vadd.f32 %v1744_v27, %v1675_v25  ;;  %v1845_v49 = vmul.f32 %v4042_v24, %v4791_v41  ;;  %v2314_v58 = vld [vmem:[#allocation2 + $0xb1] sm:$0xff] }
 0x18f   : > { %v1977_v21 = vadd.f32 %v1945_v38, %v1876_v23  ;;  %v2349_v28 = vmul.f32 %v4800_v43, %v2312_v63  ;;  %v1676_v7 = vmul.f32 %v4014_v15, %v4803_v34  ;;  %v1745_v39 = vmul.f32 %v4024_v51, %v4804_v32  ;;  %v2415_v27 = vld [vmem:[#allocation2 + $0xb2] sm:$0xff] }
 0x190   : > { %v2520_v42 = vadd.f32 %v4264_v31, %v2481_v45  ;;  %2549 = vst [vmem:[%s4279_s13 + $0x28] sm:$0xff] %v2517_v36  ;;  %v2450_v44 = vmul.f32 %v4066_v20, %v2413_v4  ;;  %v1877_v30 = vadd.f32 %v1845_v49, %v1776_v55  ;;  %v1946_v41 = vmul.f32 %v4075_v16, %v4291_v37  ;;  %v2315_v55 = vld [vmem:[#allocation2 + $0xc1] sm:$0xff] }
 0x191   : > { %v2078_v0 = vadd.f32 %v2046_v12, %v1977_v21  ;;  %v2047_v47 = vmul.f32 %v4097_v22, %v4308_v11  ;;  %v2148_v46 = vmul.f32 %v4099_v57, %v4318_v26  ;;  %v1777_v33 = vadd.f32 %v1745_v39, %v1676_v7  ;;  %v4389_v21 = vld [vmem:[#allocation2 + $0xc0] sm:$0xff] }
 0x192   : > { %2552 = vst [vmem:[%s4279_s13 + $0x40] sm:$0xff] %v2520_v42  ;;  %v1846_v19 = vmul.f32 %v4042_v24, %v4805_v14  ;;  %v1978_v53 = vadd.f32 %v1946_v41, %v1877_v30  ;;  %v2249_v17 = vmul.f32 %v4050_v59, %v4353_v18  ;;  %v2350_v60 = vmul.f32 %v4800_v43, %v4355_v56  ;;  %v4402_v30 = vld [vmem:[#allocation2 + $0xc2] sm:$0xff] }
 0x193   : > { %v2179_v2 = vadd.f32 %v2147_v5, %v2078_v0  ;;  %v1677_v8 = vmul.f32 %v4014_v15, %v4291_v37  ;;  %v1947_v61 = vmul.f32 %v4075_v16, %v2211_v3  ;;  %v1746_v62 = vmul.f32 %v4024_v51, %v4308_v11 }
 0x194   : > { %v1878_v10 = vadd.f32 %v1846_v19, %v1777_v33  ;;  %v2079_v54 = vadd.f32 %v2047_v47, %v1978_v53  ;;  %v2451_v40 = vmul.f32 %v4066_v20, %v2414_v48  ;;  %v2048_v1 = vmul.f32 %v4097_v22, %v2312_v63 }
 0x195   : > { %v2280_v29 = vadd.f32 %v2248_v50, %v2179_v2  ;;  %v2149_v6 = vmul.f32 %v4099_v57, %v2413_v4  ;;  %v1778_v52 = vadd.f32 %v1746_v62, %v1677_v8  ;;  %v1847_v37 = vmul.f32 %v4042_v24, %v4318_v26  ;;  %v2215_v8 = vld [vmem:[#allocation2 + $0xc8] sm:$0xff] }
 0x196   : > { %v1979_v9 = vadd.f32 %v1947_v61, %v1878_v10  ;;  %v2180_v23 = vadd.f32 %v2148_v46, %v2079_v54  ;;  %v2250_v34 = vmul.f32 %v4050_v59, %v2213_v35  ;;  %v1948_v11 = vmul.f32 %v4075_v16, %v4353_v18 }
 0x197   : > { %v2381_v13 = vadd.f32 %v2349_v28, %v2280_v29  ;;  %v1678_v38 = vmul.f32 %v4014_v15, %v2211_v3  ;;  %v1879_v36 = vadd.f32 %v1847_v37, %v1778_v52  ;;  %v1747_v32 = vmul.f32 %v4024_v51, %v2312_v63 }
 0x198   : > { %v2080_v45 = vadd.f32 %v2048_v1, %v1979_v9  ;;  %v2281_v12 = vadd.f32 %v2249_v17, %v2180_v23  ;;  %v2351_v26 = vmul.f32 %v4800_v43, %v2314_v58  ;;  %v2049_v14 = vmul.f32 %v4097_v22, %v4355_v56  ;;  %v2316_v1 = vld [vmem:[#allocation2 + $0xc9] sm:$0xff] }
 0x199   : > { %v2482_v25 = vadd.f32 %v2450_v44, %v2381_v13  ;;  %v1848_v5 = vmul.f32 %v4042_v24, %v2413_v4  ;;  %v1980_v50 = vadd.f32 %v1948_v11, %v1879_v36  ;;  %v1779_v49 = vadd.f32 %v1747_v32, %v1678_v38 }
 0x19a   : > { %v2181_v3 = vadd.f32 %v2149_v6, %v2080_v45  ;;  %v2382_v0 = vadd.f32 %v2350_v60, %v2281_v12  ;;  %v2452_v28 = vmul.f32 %v4066_v20, %v2415_v27  ;;  %v2150_v7 = vmul.f32 %v4099_v57, %v2414_v48  ;;  %v2216_v12 = vld [vmem:[#allocation2 + $0xd8] sm:$0xff] }
 0x19b   : > { %v2521_v42 = vadd.f32 %v4264_v31, %v2482_v25  ;;  %v2251_v63 = vmul.f32 %v4050_v59, %v4389_v21  ;;  %v2081_v44 = vadd.f32 %v2049_v14, %v1980_v50  ;;  %v1880_v4 = vadd.f32 %v1848_v5, %v1779_v49 }
 0x19c   : > { %v2282_v39 = vadd.f32 %v2250_v34, %v2181_v3  ;;  %v1949_v41 = vmul.f32 %v4075_v16, %v2213_v35  ;;  %v2483_v47 = vadd.f32 %v2451_v40, %v2382_v0  ;;  %v2352_v2 = vmul.f32 %v4800_v43, %v2315_v55  ;;  %v2417_v34 = vld [vmem:[#allocation2 + $0xca] sm:$0xff]  ;;  %v2418_v0 = vld [vmem:[#allocation2 + $0xda] sm:$0xff] }
 0x19d   : > { %2553 = vst [vmem:[%s4279_s13 + $0x48] sm:$0xff] %v2521_v42  ;;  %v1679_v46 = vmul.f32 %v4014_v15, %v4353_v18  ;;  %v1748_v33 = vmul.f32 %v4024_v51, %v4355_v56  ;;  %v2182_v53 = vadd.f32 %v2150_v7, %v2081_v44  ;;  %v2050_v60 = vmul.f32 %v4097_v22, %v2314_v58 }
 0x19e   : > { %v2383_v19 = vadd.f32 %v2351_v26, %v2282_v39  ;;  %v1981_v17 = vadd.f32 %v1949_v41, %v1880_v4  ;;  %v2522_v29 = vadd.f32 %v4264_v31, %v2483_v47  ;;  %v2453_v10 = vmul.f32 %v4066_v20, %v4402_v30 }
 0x19f   : > { %v1780_v61 = vadd.f32 %v1748_v33, %v1679_v46  ;;  %v1849_v62 = vmul.f32 %v4042_v24, %v2414_v48  ;;  %v2283_v18 = vadd.f32 %v2251_v63, %v2182_v53  ;;  %v2151_v56 = vmul.f32 %v4099_v57, %v2415_v27  ;;  %v2217_v33 = vld [vmem:[#allocation2 + $0xe0] sm:$0xff] }
 0x1a0   : > { %v2484_v54 = vadd.f32 %v2452_v28, %v2383_v19  ;;  %v2082_v40 = vadd.f32 %v2050_v60, %v1981_v17  ;;  %2554 = vst [vmem:[%s4279_s13 + $0x50] sm:$0xff] %v2522_v29  ;;  %v2252_v6 = vmul.f32 %v4050_v59, %v2215_v8  ;;  %v1950_v9 = vmul.f32 %v4075_v16, %v4389_v21  ;;  %v2318_v19 = vld [vmem:[#allocation2 + $0xe1] sm:$0xff] }
 0x1a1   : > { %v1881_v13 = vadd.f32 %v1849_v62, %v1780_v61  ;;  %v1680_v52 = vmul.f32 %v4014_v15, %v2213_v35  ;;  %v2384_v23 = vadd.f32 %v2352_v2, %v2283_v18  ;;  %v1749_v11 = vmul.f32 %v4024_v51, %v2314_v58  ;;  %v2317_v58 = vld [vmem:[#allocation2 + $0xd9] sm:$0xff] }
 0x1a2   : > { %v2523_v37 = vadd.f32 %v4264_v31, %v2484_v54  ;;  %v2183_v48 = vadd.f32 %v2151_v56, %v2082_v40  ;;  %v2353_v38 = vmul.f32 %v4800_v43, %v2316_v1  ;;  %v2051_v45 = vmul.f32 %v4097_v22, %v2315_v55 }
 0x1a3   : > { %v1982_v25 = vadd.f32 %v1950_v9, %v1881_v13  ;;  %v2485_v36 = vadd.f32 %v2453_v10, %v2384_v23  ;;  %v1781_v26 = vadd.f32 %v1749_v11, %v1680_v52  ;;  %v1850_v35 = vmul.f32 %v4042_v24, %v2415_v27  ;;  %v2419_v13 = vld [vmem:[#allocation2 + $0xe2] sm:$0xff]  ;;  %v2218_v52 = vld [vmem:[#allocation2 + $0xf0] sm:$0xff] }
 0x1a4   : > { %2555 = vst [vmem:[%s4279_s13 + $0x58] sm:$0xff] %v2523_v37  ;;  %v2284_v32 = vadd.f32 %v2252_v6, %v2183_v48  ;;  %v2454_v14 = vmul.f32 %v4066_v20, %v2417_v34  ;;  %v2152_v42 = vmul.f32 %v4099_v57, %v4402_v30  ;;  %v1951_v3 = vmul.f32 %v4075_v16, %v2215_v8 }
 0x1a5   : > { %v2083_v5 = vadd.f32 %v2051_v45, %v1982_v25  ;;  %v2524_v50 = vadd.f32 %v4264_v31, %v2485_v36  ;;  %v1882_v28 = vadd.f32 %v1850_v35, %v1781_v26  ;;  %v1681_v7 = vmul.f32 %v4014_v15, %v4389_v21  ;;  %v2319_v45 = vld [vmem:[#allocation2 + $0xf1] sm:$0xff] }
 0x1a6   : > { %v2385_v49 = vadd.f32 %v2353_v38, %v2284_v32  ;;  %v2253_v27 = vmul.f32 %v4050_v59, %v2216_v12  ;;  %v1750_v39 = vmul.f32 %v4024_v51, %v2315_v55  ;;  %v2354_v4 = vmul.f32 %v4800_v43, %v2317_v58 }
 0x1a7   : > { %v2184_v63 = vadd.f32 %v2152_v42, %v2083_v5  ;;  %2556 = vst [vmem:[%s4279_s13 + $0x60] sm:$0xff] %v2524_v50  ;;  %v1983_v41 = vadd.f32 %v1951_v3, %v1882_v28  ;;  %v2052_v47 = vmul.f32 %v4097_v22, %v2316_v1  ;;  %v2455_v46 = vmul.f32 %v4066_v20, %v2418_v0  ;;  %v2420_v42 = vld [vmem:[#allocation2 + $0xf2] sm:$0xff] }
 0x1a8   : > { %v2486_v44 = vadd.f32 %v2454_v14, %v2385_v49  ;;  %v1782_v53 = vadd.f32 %v1750_v39, %v1681_v7  ;;  %v1851_v21 = vmul.f32 %v4042_v24, %v4402_v30  ;;  %v2153_v60 = vmul.f32 %v4099_v57, %v2417_v34  ;;  %v2219_v50 = vld [vmem:[#allocation2 + $0xf8] sm:$0xff] }
 0x1a9   : > { %v2285_v2 = vadd.f32 %v2253_v27, %v2184_v63  ;;  %v2084_v55 = vadd.f32 %v2052_v47, %v1983_v41  ;;  %v1682_v29 = vmul.f32 %v4014_v15, %v2215_v8  ;;  %v1952_v62 = vmul.f32 %v4075_v16, %v2216_v12 }
 0x1aa   : > { %v2525_v17 = vadd.f32 %v4264_v31, %v2486_v44  ;;  %v1883_v61 = vadd.f32 %v1851_v21, %v1782_v53  ;;  %v1751_v54 = vmul.f32 %v4024_v51, %v2316_v1  ;;  %v2254_v40 = vmul.f32 %v4050_v59, %v2217_v33  ;;  %v2320_v44 = vld [vmem:[#allocation2 + $0xf9] sm:$0xff] }
 0x1ab   : > { %v2386_v10 = vadd.f32 %v2354_v4, %v2285_v2  ;;  %v2185_v18 = vadd.f32 %v2153_v60, %v2084_v55  ;;  %v2355_v56 = vmul.f32 %v4800_v43, %v2318_v19  ;;  %v2053_v30 = vmul.f32 %v4097_v22, %v2317_v58  ;;  %v4465_v4 = vld [vmem:[#allocation2 + $0xfa] sm:$0xff] }
 0x1ac   : > { %2557 = vst [vmem:[%s4279_s13 + $0x68] sm:$0xff] %v2525_v17  ;;  %v1984_v9 = vadd.f32 %v1952_v62, %v1883_v61  ;;  %v1783_v8 = vadd.f32 %v1751_v54, %v1682_v29  ;;  %v1852_v37 = vmul.f32 %v4042_v24, %v2417_v34  ;;  %v2154_v48 = vmul.f32 %v4099_v57, %v2418_v0 }
 0x1ad   : > { %v2487_v6 = vadd.f32 %v2455_v46, %v2386_v10  ;;  %v2286_v23 = vadd.f32 %v2254_v40, %v2185_v18  ;;  %v1953_v1 = vmul.f32 %v4075_v16, %v2217_v33  ;;  %v1683_v11 = vmul.f32 %v4014_v15, %v2216_v12 }
 0x1ae   : > { %v2085_v25 = vadd.f32 %v2053_v30, %v1984_v9  ;;  %v1884_v36 = vadd.f32 %v1852_v37, %v1783_v8  ;;  %v1752_v32 = vmul.f32 %v4024_v51, %v2317_v58  ;;  %v2456_v35 = vmul.f32 %v4066_v20, %v2419_v13  ;;  %v4480_v30 = vld [vmem:[#allocation8] ss:$0 sm:$0xff]  ;;  %v4483_v9 = vld [vmem:[#allocation8 + $0x1] ss:$0 sm:$0xff] }
 0x1af   : > { %v2526_v38 = vadd.f32 %v4264_v31, %v2487_v6  ;;  %v2387_v26 = vadd.f32 %v2355_v56, %v2286_v23  ;;  %v2255_v14 = vmul.f32 %v4050_v59, %v2218_v52  ;;  %v2054_v34 = vmul.f32 %v4097_v22, %v2318_v19 }
 0x1b0   : > { %v2186_v5 = vadd.f32 %v2154_v48, %v2085_v25  ;;  %v1985_v3 = vadd.f32 %v1953_v1, %v1884_v36  ;;  %v1784_v12 = vadd.f32 %v1752_v32, %v1683_v11  ;;  %v1853_v49 = vmul.f32 %v4042_v24, %v2418_v0  ;;  %v2422_v1 = vld [vmem:[#allocation2 + $0x10a] sm:$0xff] }
 0x1b1   : > { %2558 = vst [vmem:[%s4279_s13 + $0x70] sm:$0xff] %v2526_v38  ;;  %v2488_v28 = vadd.f32 %v2456_v35, %v2387_v26  ;;  %v2356_v7 = vmul.f32 %v4800_v43, %v2319_v45  ;;  %v2155_v58 = vmul.f32 %v4099_v57, %v2419_v13  ;;  %v1954_v63 = vmul.f32 %v4075_v16, %v2218_v52  ;;  %v2221_v35 = vld [vmem:[#allocation2 + $0x110] sm:$0xff] }
 0x1b2   : > { %v2287_v27 = vadd.f32 %v2255_v14, %v2186_v5  ;;  %v2086_v39 = vadd.f32 %v2054_v34, %v1985_v3  ;;  %v1885_v41 = vadd.f32 %v1853_v49, %v1784_v12  ;;  %v1684_v47 = vmul.f32 %v4014_v15, %v2217_v33  ;;  %v2220_v15 = vld [vmem:[#allocation2 + $0x108] sm:$0xff]  ;;  %v2322_v34 = vld [vmem:[#allocation2 + $0x111] sm:$0xff] }
 0x1b3   : > { %v2527_v2 = vadd.f32 %v4264_v31, %v2488_v28  ;;  %v2457_v0 = vmul.f32 %v4066_v20, %v2420_v42  ;;  %v2256_v46 = vmul.f32 %v4050_v59, %v2219_v50  ;;  %v1753_v53 = vmul.f32 %v4024_v51, %v2318_v19  ;;  %v2321_v19 = vld [vmem:[#allocation2 + $0x109] sm:$0xff] }
 0x1b4   : > { %v2388_v21 = vadd.f32 %v2356_v7, %v2287_v27  ;;  %v2187_v17 = vadd.f32 %v2155_v58, %v2086_v39  ;;  %v1986_v55 = vadd.f32 %v1954_v63, %v1885_v41  ;;  %v2055_v60 = vmul.f32 %v4097_v22, %v2319_v45 }
 0x1b5   : > { %2559 = vst [vmem:[%s4279_s13 + $0x78] sm:$0xff] %v2527_v2  ;;  %v2357_v29 = vmul.f32 %v4800_v43, %v2320_v44  ;;  %v2458_v10 = vmul.f32 %v4066_v20, %v4465_v4  ;;  %v1785_v33 = vadd.f32 %v1753_v53, %v1684_v47  ;;  %v1854_v61 = vmul.f32 %v4042_v24, %v2419_v13  ;;  %v2423_v47 = vld [vmem:[#allocation2 + $0x112] sm:$0xff]  ;;  %v2222_v2 = vld [vmem:[#allocation2 + $0x120] sm:$0xff] }
 0x1b6   : > { %v2489_v62 = vadd.f32 %v2457_v0, %v2388_v21  ;;  %v2288_v54 = vadd.f32 %v2256_v46, %v2187_v17  ;;  %v2087_v18 = vadd.f32 %v2055_v60, %v1986_v55  ;;  %v2156_v51 = vmul.f32 %v4099_v57, %v2420_v42  ;;  %v4503_v0 = vld [vmem:[#allocation8 + $0x2] ss:$0 sm:$0xff] }
 0x1b7   : > { %v1886_v40 = vadd.f32 %v1854_v61, %v1785_v33  ;;  %v1955_v56 = vmul.f32 %v4075_v16, %v2219_v50  ;;  %v1685_v6 = vmul.f32 %v4480_v30, %v2218_v52  ;;  %v1754_v8 = vmul.f32 %v4483_v9, %v2319_v45  ;;  %v2323_v60 = vld [vmem:[#allocation2 + $0x121] sm:$0xff] }
 0x1b8   : > { %v2528_v13 = vadd.f32 %v4264_v31, %v2489_v62  ;;  %v2389_v37 = vadd.f32 %v2357_v29, %v2288_v54  ;;  %v2188_v23 = vadd.f32 %v2156_v51, %v2087_v18  ;;  %v2257_v48 = vmul.f32 %v4050_v59, %v2220_v15  ;;  %v2424_v18 = vld [vmem:[#allocation2 + $0x122] sm:$0xff] }
 0x1b9   : > { %v1987_v11 = vadd.f32 %v1955_v56, %v1886_v40  ;;  %v2056_v38 = vmul.f32 %v4097_v22, %v2320_v44  ;;  %v1786_v25 = vadd.f32 %v1754_v8, %v1685_v6  ;;  %v1855_v36 = vmul.f32 %v4042_v24, %v2420_v42 }
 0x1ba   : > { %2560 = vst [vmem:[%s4279_s13 + $0x80] sm:$0xff] %v2528_v13  ;;  %v2490_v32 = vadd.f32 %v2458_v10, %v2389_v37  ;;  %v2289_v52 = vadd.f32 %v2257_v48, %v2188_v23  ;;  %v2358_v26 = vmul.f32 %v4800_v43, %v2321_v19  ;;  %v2157_v45 = vmul.f32 %v4099_v57, %v4465_v4  ;;  %v2223_v37 = vld [vmem:[#allocation2 + $0x128] sm:$0xff] }
 0x1bb   : > { %v2088_v14 = vadd.f32 %v2056_v38, %v1987_v11  ;;  %v1887_v5 = vadd.f32 %v1855_v36, %v1786_v25  ;;  %v1956_v3 = vmul.f32 %v4075_v16, %v2220_v15  ;;  %v1686_v12 = vmul.f32 %v4480_v30, %v2219_v50  ;;  %v2324_v48 = vld [vmem:[#allocation2 + $0x129] sm:$0xff] }
 0x1bc   : > { %v2529_v49 = vadd.f32 %v4264_v31, %v2490_v32  ;;  %v2390_v24 = vadd.f32 %v2358_v26, %v2289_v52  ;;  %v2459_v42 = vmul.f32 %v4066_v20, %v2422_v1  ;;  %v1755_v28 = vmul.f32 %v4483_v9, %v2320_v44 }
 0x1bd   : > { %v2189_v7 = vadd.f32 %v2157_v45, %v2088_v14  ;;  %v2258_v58 = vmul.f32 %v4050_v59, %v2221_v35  ;;  %v1988_v63 = vadd.f32 %v1956_v3, %v1887_v5  ;;  %v2057_v27 = vmul.f32 %v4097_v22, %v2321_v19  ;;  %v2425_v3 = vld [vmem:[#allocation2 + $0x12a] sm:$0xff] }
 0x1be   : > { %2561 = vst [vmem:[%s4279_s13 + $0x88] sm:$0xff] %v2529_v49  ;;  %v2491_v39 = vadd.f32 %v2459_v42, %v2390_v24  ;;  %v2359_v41 = vmul.f32 %v4800_v43, %v2322_v34  ;;  %v1787_v50 = vadd.f32 %v1755_v28, %v1686_v12  ;;  %v1856_v46 = vmul.f32 %v4503_v0, %v4465_v4  ;;  %v2224_v12 = vld [vmem:[#allocation2 + $0x138] sm:$0xff]  ;;  %v4534_v28 = vld [vmem:[#allocation8 + $0x3] ss:$0 sm:$0xff] }
 0x1bf   : > { %v2290_v44 = vadd.f32 %v2258_v58, %v2189_v7  ;;  %v2089_v53 = vadd.f32 %v2057_v27, %v1988_v63  ;;  %v2158_v21 = vmul.f32 %v4099_v57, %v2422_v1  ;;  %v1957_v17 = vmul.f32 %v4075_v16, %v2221_v35  ;;  %v2325_v58 = vld [vmem:[#allocation2 + $0x139] sm:$0xff] }
 0x1c0   : > { %v2530_v55 = vadd.f32 %v4264_v31, %v2491_v39  ;;  %v1888_v29 = vadd.f32 %v1856_v46, %v1787_v50  ;;  %v1687_v10 = vmul.f32 %v4480_v30, %v2220_v15  ;;  %v1756_v33 = vmul.f32 %v4483_v9, %v2321_v19  ;;  %v4540_v50 = vld [vmem:[#allocation8 + $0x8] ss:$0 sm:$0xff] }
 0x1c1   : > { %v2391_v61 = vadd.f32 %v2359_v41, %v2290_v44  ;;  %v2460_v62 = vmul.f32 %v4066_v20, %v2423_v47  ;;  %v2190_v54 = vadd.f32 %v2158_v21, %v2089_v53  ;;  %v2259_v4 = vmul.f32 %v4050_v59, %v2222_v2  ;;  %v2426_v44 = vld [vmem:[#allocation2 + $0x13a] sm:$0xff]  ;;  %v4545_v21 = vld [vmem:[#allocation8 + $0x4] ss:$0 sm:$0xff] }
 0x1c2   : > { %2562 = vst [vmem:[%s4279_s13 + $0x90] sm:$0xff] %v2530_v55  ;;  %v1989_v51 = vadd.f32 %v1957_v17, %v1888_v29  ;;  %v2058_v40 = vmul.f32 %v4097_v22, %v2322_v34  ;;  %v1788_v56 = vadd.f32 %v1756_v33, %v1687_v10  ;;  %v1857_v6 = vmul.f32 %v4503_v0, %v2422_v1  ;;  %v4550_v33 = vld [vmem:[#allocation8 + $0x5] ss:$0 sm:$0xff] }
 0x1c3   : > { %v2492_v8 = vadd.f32 %v2460_v62, %v2391_v61  ;;  %v2291_v13 = vadd.f32 %v2259_v4, %v2190_v54  ;;  %v2360_v15 = vmul.f32 %v4800_v43, %v2323_v60  ;;  %v2159_v19 = vmul.f32 %v4099_v57, %v2423_v47  ;;  %v4524_v43 = vld [vmem:[#allocation8 + $0x6] ss:$0 sm:$0xff] }
 0x1c4   : > { %v2090_v23 = vadd.f32 %v2058_v40, %v1989_v51  ;;  %v1889_v11 = vadd.f32 %v1857_v6, %v1788_v56  ;;  %v1958_v59 = vmul.f32 %v4075_v16, %v2222_v2  ;;  %v1688_v38 = vmul.f32 %v4480_v30, %v2221_v35  ;;  %v4529_v16 = vld [vmem:[#allocation8 + $0x7] ss:$0 sm:$0xff] }
 0x1c5   : > { %v2531_v25 = vadd.f32 %v4264_v31, %v2492_v8  ;;  %v2392_v36 = vadd.f32 %v2360_v15, %v2291_v13  ;;  %v2461_v1 = vmul.f32 %v4066_v20, %v2424_v18  ;;  %v1757_v32 = vmul.f32 %v4483_v9, %v2322_v34  ;;  %v2225_v62 = vld [vmem:[#allocation2 + $0x140] sm:$0xff] }
 0x1c6   : > { %v2191_v52 = vadd.f32 %v2159_v19, %v2090_v23  ;;  %v2260_v26 = vmul.f32 %v4524_v43, %v2223_v37  ;;  %v1990_v45 = vadd.f32 %v1958_v59, %v1889_v11  ;;  %v2059_v14 = vmul.f32 %v4097_v22, %v2323_v60  ;;  %v2326_v4 = vld [vmem:[#allocation2 + $0x141] sm:$0xff] }
 0x1c7   : > { %2563 = vst [vmem:[%s4279_s13 + $0x98] sm:$0xff] %v2531_v25  ;;  %v2493_v5 = vadd.f32 %v2461_v1, %v2392_v36  ;;  %v2361_v35 = vmul.f32 %v4529_v16, %v2324_v48  ;;  %v1789_v49 = vadd.f32 %v1757_v32, %v1688_v38  ;;  %v1858_v20 = vmul.f32 %v4503_v0, %v2423_v47  ;;  %v2427_v25 = vld [vmem:[#allocation2 + $0x142] sm:$0xff]  ;;  %v2226_v36 = vld [vmem:[#allocation2 + $0x150] sm:$0xff] }
 0x1c8   : > { %v2292_v34 = vadd.f32 %v2260_v26, %v2191_v52  ;;  %v2091_v24 = vadd.f32 %v2059_v14, %v1990_v45  ;;  %v2160_v42 = vmul.f32 %v4099_v57, %v2424_v18  ;;  %v1959_v22 = vmul.f32 %v4534_v28, %v2223_v37  ;;  %v2327_v14 = vld [vmem:[#allocation2 + $0x151] sm:$0xff] }
 0x1c9   : > { %v2532_v7 = vadd.f32 %v4264_v31, %v2493_v5  ;;  %v1890_v63 = vadd.f32 %v1858_v20, %v1789_v49  ;;  %v1689_v27 = vmul.f32 %v4480_v30, %v2222_v2  ;;  %v1758_v39 = vmul.f32 %v4483_v9, %v2323_v60 }
 0x1ca   : > { %v2393_v41 = vadd.f32 %v2361_v35, %v2292_v34  ;;  %v2462_v47 = vmul.f32 %v4540_v50, %v2425_v3  ;;  %v2192_v46 = vadd.f32 %v2160_v42, %v2091_v24  ;;  %v2261_v57 = vmul.f32 %v4524_v43, %v2224_v12  ;;  %v2428_v42 = vld [vmem:[#allocation2 + $0x152] sm:$0xff] }
 0x1cb   : > { %2564 = vst [vmem:[%s4279_s13 + $0xa0] sm:$0xff] %v2532_v7  ;;  %v1991_v53 = vadd.f32 %v1959_v22, %v1890_v63  ;;  %v2060_v17 = vmul.f32 %v4545_v21, %v2324_v48  ;;  %v1790_v55 = vadd.f32 %v1758_v39, %v1689_v27  ;;  %v1859_v2 = vmul.f32 %v4503_v0, %v2424_v18 }
 0x1cc   : > { %v2494_v29 = vadd.f32 %v2462_v47, %v2393_v41  ;;  %v2293_v60 = vadd.f32 %v2261_v57, %v2192_v46  ;;  %v2362_v10 = vmul.f32 %v4529_v16, %v2325_v58  ;;  %v2161_v61 = vmul.f32 %v4550_v33, %v2425_v3  ;;  %v2227_v47 = vld [vmem:[#allocation2 + $0x158] sm:$0xff] }
 0x1cd   : > { %v2092_v54 = vadd.f32 %v2060_v17, %v1991_v53  ;;  %v1891_v51 = vadd.f32 %v1859_v2, %v1790_v55  ;;  %v1960_v40 = vmul.f32 %v4534_v28, %v2224_v12  ;;  %v1690_v56 = vmul.f32 %v4480_v30, %v2223_v37  ;;  %v2328_v57 = vld [vmem:[#allocation2 + $0x159] sm:$0xff] }
 0x1ce   : > { %v2533_v6 = vadd.f32 %v4264_v31, %v2494_v29  ;;  %v2394_v18 = vadd.f32 %v2362_v10, %v2293_v60  ;;  %v2463_v8 = vmul.f32 %v4540_v50, %v2426_v44  ;;  %v1759_v13 = vmul.f32 %v4483_v9, %v2324_v48 }
 0x1cf   : > { %v2193_v15 = vadd.f32 %v2161_v61, %v2092_v54  ;;  %v2262_v19 = vmul.f32 %v4524_v43, %v2225_v62  ;;  %v1992_v23 = vadd.f32 %v1960_v40, %v1891_v51  ;;  %v2061_v11 = vmul.f32 %v4545_v21, %v2325_v58 }
 0x1d0   : > { %2565 = vst [vmem:[%s4279_s13 + $0xa8] sm:$0xff] %v2533_v6  ;;  %v2495_v59 = vadd.f32 %v2463_v8, %v2394_v18  ;;  %v2363_v38 = vmul.f32 %v4529_v16, %v2326_v4  ;;  %v1791_v37 = vadd.f32 %v1759_v13, %v1690_v56  ;;  %v1860_v1 = vmul.f32 %v4503_v0, %v2425_v3  ;;  %v2429_v6 = vld [vmem:[#allocation2 + $0x15a] sm:$0xff]  ;;  %v2228_v18 = vld [vmem:[#allocation2 + $0x168] sm:$0xff] }
 0x1d1   : > { %v2294_v32 = vadd.f32 %v2262_v19, %v2193_v15  ;;  %v2093_v52 = vadd.f32 %v2061_v11, %v1992_v23  ;;  %v2162_v48 = vmul.f32 %v4550_v33, %v2426_v44  ;;  %v1961_v26 = vmul.f32 %v4534_v28, %v2225_v62  ;;  %v2329_v11 = vld [vmem:[#allocation2 + $0x169] sm:$0xff] }
 0x1d2   : > { %v2534_v45 = vadd.f32 %v4264_v31, %v2495_v59  ;;  %v1892_v5 = vadd.f32 %v1860_v1, %v1791_v37  ;;  %v1691_v35 = vmul.f32 %v4480_v30, %v2224_v12  ;;  %v1760_v49 = vmul.f32 %v4483_v9, %v2325_v58 }
 0x1d3   : > { %v2395_v20 = vadd.f32 %v2363_v38, %v2294_v32  ;;  %v2464_v34 = vmul.f32 %v4540_v50, %v2427_v25  ;;  %v2194_v24 = vadd.f32 %v2162_v48, %v2093_v52  ;;  %v2263_v3 = vmul.f32 %v4524_v43, %v2226_v36  ;;  %v2430_v48 = vld [vmem:[#allocation2 + $0x16a] sm:$0xff] }
 0x1d4   : > { %2566 = vst [vmem:[%s4279_s13 + $0xb0] sm:$0xff] %v2534_v45  ;;  %v1993_v22 = vadd.f32 %v1961_v26, %v1892_v5  ;;  %v2062_v7 = vmul.f32 %v4545_v21, %v2326_v4  ;;  %v1792_v63 = vadd.f32 %v1760_v49, %v1691_v35  ;;  %v1861_v27 = vmul.f32 %v4503_v0, %v2426_v44 }
 0x1d5   : > { %v2496_v39 = vadd.f32 %v2464_v34, %v2395_v20  ;;  %v2295_v41 = vadd.f32 %v2263_v3, %v2194_v24  ;;  %v2364_v12 = vmul.f32 %v4529_v16, %v2327_v14  ;;  %v2163_v58 = vmul.f32 %v4550_v33, %v2427_v25  ;;  %v2229_v34 = vld [vmem:[#allocation2 + $0x170] sm:$0xff] }
 0x1d6   : > { %v2094_v46 = vadd.f32 %v2062_v7, %v1993_v22  ;;  %v1893_v53 = vadd.f32 %v1861_v27, %v1792_v63  ;;  %v1962_v17 = vmul.f32 %v4534_v28, %v2226_v36  ;;  %v1692_v55 = vmul.f32 %v4480_v30, %v2225_v62  ;;  %v2330_v3 = vld [vmem:[#allocation2 + $0x171] sm:$0xff] }
 0x1d7   : > { %v2535_v2 = vadd.f32 %v4264_v31, %v2496_v39  ;;  %v2396_v29 = vadd.f32 %v2364_v12, %v2295_v41  ;;  %v2465_v44 = vmul.f32 %v4540_v50, %v2428_v42  ;;  %v1761_v60 = vmul.f32 %v4483_v9, %v2326_v4 }
 0x1d8   : > { %v2195_v10 = vadd.f32 %v2163_v58, %v2094_v46  ;;  %v2264_v61 = vmul.f32 %v4524_v43, %v2227_v47  ;;  %v1994_v54 = vadd.f32 %v1962_v17, %v1893_v53  ;;  %v2063_v51 = vmul.f32 %v4545_v21, %v2327_v14 }
 0x1d9   : > { %2567 = vst [vmem:[%s4279_s13 + $0xb8] sm:$0xff] %v2535_v2  ;;  %v2497_v40 = vadd.f32 %v2465_v44, %v2396_v29  ;;  %v2365_v56 = vmul.f32 %v4529_v16, %v2328_v57  ;;  %v1793_v62 = vadd.f32 %v1761_v60, %v1692_v55  ;;  %v1862_v8 = vmul.f32 %v4503_v0, %v2427_v25  ;;  %v2431_v2 = vld [vmem:[#allocation2 + $0x172] sm:$0xff]  ;;  %v2230_v29 = vld [vmem:[#allocation2 + $0x180] sm:$0xff] }
 0x1da   : > { %v2296_v13 = vadd.f32 %v2264_v61, %v2195_v10  ;;  %v2095_v15 = vadd.f32 %v2063_v51, %v1994_v54  ;;  %v2164_v4 = vmul.f32 %v4550_v33, %v2428_v42  ;;  %v1963_v19 = vmul.f32 %v4534_v28, %v2227_v47  ;;  %v2331_v51 = vld [vmem:[#allocation2 + $0x181] sm:$0xff] }
 0x1db   : > { %v2536_v23 = vadd.f32 %v4264_v31, %v2497_v40  ;;  %v1894_v59 = vadd.f32 %v1862_v8, %v1793_v62  ;;  %v1693_v38 = vmul.f32 %v4480_v30, %v2226_v36  ;;  %v1762_v37 = vmul.f32 %v4483_v9, %v2327_v14 }
 0x1dc   : > { %v2397_v1 = vadd.f32 %v2365_v56, %v2296_v13  ;;  %v2466_v32 = vmul.f32 %v4540_v50, %v2429_v6  ;;  %v2196_v52 = vadd.f32 %v2164_v4, %v2095_v15  ;;  %v2265_v25 = vmul.f32 %v4524_v43, %v2228_v18  ;;  %v2432_v4 = vld [vmem:[#allocation2 + $0x182] sm:$0xff] }
 0x1dd   : > { %2568 = vst [vmem:[%s4279_s13 + $0xc0] sm:$0xff] %v2536_v23  ;;  %v1995_v26 = vadd.f32 %v1963_v19, %v1894_v59  ;;  %v2064_v45 = vmul.f32 %v4545_v21, %v2328_v57  ;;  %v1794_v5 = vadd.f32 %v1762_v37, %v1693_v38  ;;  %v1863_v35 = vmul.f32 %v4503_v0, %v2428_v42 }
 0x1de   : > { %v2498_v49 = vadd.f32 %v2466_v32, %v2397_v1  ;;  %v2297_v20 = vadd.f32 %v2265_v25, %v2196_v52  ;;  %v2366_v36 = vmul.f32 %v4529_v16, %v2329_v11  ;;  %v2165_v14 = vmul.f32 %v4550_v33, %v2429_v6  ;;  %v2231_v1 = vld [vmem:[#allocation2 + $0x188] sm:$0xff] }
 0x1df   : > { %v2096_v24 = vadd.f32 %v2064_v45, %v1995_v26  ;;  %v1895_v22 = vadd.f32 %v1863_v35, %v1794_v5  ;;  %v1964_v7 = vmul.f32 %v4534_v28, %v2228_v18  ;;  %v1694_v63 = vmul.f32 %v4480_v30, %v2227_v47  ;;  %v2332_v52 = vld [vmem:[#allocation2 + $0x189] sm:$0xff]  ;;  %v2887_v5 = vld [vmem:[%s4700_s4] ss:$0 sm:$0xff] }
 0x1e0   : > { %v2537_v27 = vadd.f32 %v4264_v31, %v2498_v49  ;;  %v2398_v39 = vadd.f32 %v2366_v36, %v2297_v20  ;;  %v2467_v42 = vmul.f32 %v4540_v50, %v2430_v48  ;;  %v1763_v41 = vmul.f32 %v4483_v9, %v2328_v57 }
 0x1e1   : > { %v2197_v12 = vadd.f32 %v2165_v14, %v2096_v24  ;;  %v2266_v58 = vmul.f32 %v4524_v43, %v2229_v34  ;;  %v1996_v46 = vadd.f32 %v1964_v7, %v1895_v22  ;;  %v2065_v53 = vmul.f32 %v4545_v21, %v2329_v11 }
 0x1e2   : > { %2569 = vst [vmem:[%s4279_s13 + $0xc8] sm:$0xff] %v2537_v27  ;;  %v2499_v17 = vadd.f32 %v2467_v42, %v2398_v39  ;;  %v2367_v55 = vmul.f32 %v4529_v16, %v2330_v3  ;;  %v1795_v47 = vadd.f32 %v1763_v41, %v1694_v63  ;;  %v1864_v44 = vmul.f32 %v4503_v0, %v2429_v6 }
 0x1e3   : > { %v2298_v60 = vadd.f32 %v2266_v58, %v2197_v12  ;;  %v2097_v10 = vadd.f32 %v2065_v53, %v1996_v46  ;;  %v2166_v57 = vmul.f32 %v4550_v33, %v2430_v48  ;;  %v1965_v61 = vmul.f32 %v4534_v28, %v2229_v34  ;;  %v2333_v58 = vld [vmem:[#allocation2 + $0x199] sm:$0xff] }
 0x1e4   : > { %v2538_v54 = vadd.f32 %v4264_v31, %v2499_v17  ;;  %v1896_v40 = vadd.f32 %v1864_v44, %v1795_v47  ;;  %v1695_v56 = vmul.f32 %v4480_v30, %v2228_v18  ;;  %v1764_v62 = vmul.f32 %v4483_v9, %v2329_v11  ;;  %v2434_v47 = vld [vmem:[#allocation2 + $0x19a] sm:$0xff] }
 0x1e5   : > { %v2399_v8 = vadd.f32 %v2367_v55, %v2298_v60  ;;  %v2468_v13 = vmul.f32 %v4540_v50, %v2431_v2  ;;  %v2198_v15 = vadd.f32 %v2166_v57, %v2097_v10  ;;  %v2267_v6 = vmul.f32 %v4524_v43, %v2230_v29 }
 0x1e6   : > { %2570 = vst [vmem:[%s4279_s13 + $0xd0] sm:$0xff] %v2538_v54  ;;  %v1997_v19 = vadd.f32 %v1965_v61, %v1896_v40  ;;  %v2066_v23 = vmul.f32 %v4545_v21, %v2330_v3  ;;  %v1796_v59 = vadd.f32 %v1764_v62, %v1695_v56  ;;  %v1865_v31 = vmul.f32 %v4503_v0, %v2430_v48  ;;  %v2435_v56 = vld [vmem:[#allocation2 + $0x1a2] sm:$0xff] }
 0x1e7   : > { %v2500_v38 = vadd.f32 %v2468_v13, %v2399_v8  ;;  %v2299_v37 = vadd.f32 %v2267_v6, %v2198_v15  ;;  %v2368_v18 = vmul.f32 %v4529_v16, %v2331_v51  ;;  %v2167_v11 = vmul.f32 %v4550_v33, %v2431_v2 }
 0x1e8   : > { %v2098_v32 = vadd.f32 %v2066_v23, %v1997_v19  ;;  %v1897_v25 = vadd.f32 %v1865_v31, %v1796_v59  ;;  %v1966_v26 = vmul.f32 %v4534_v28, %v2230_v29  ;;  %v1696_v45 = vmul.f32 %v4480_v30, %v2229_v34  ;;  %v2433_v34 = vld [vmem:[#allocation2 + $0x18a] sm:$0xff] }
 0x1e9   : > { %v2539_v48 = vadd.f32 %v2887_v5, %v2500_v38  ;;  %v2400_v35 = vadd.f32 %v2368_v18, %v2299_v37  ;;  %v2469_v49 = vmul.f32 %v4540_v50, %v2432_v4  ;;  %v1765_v20 = vmul.f32 %v4483_v9, %v2330_v3  ;;  %v2888_v9 = vld [vmem:[#allocation2] sm:$0xff] }
 0x1ea   : > { %v2199_v36 = vadd.f32 %v2167_v11, %v2098_v32  ;;  %v2268_v14 = vmul.f32 %v4524_v43, %v2231_v1  ;;  %v1998_v24 = vadd.f32 %v1966_v26, %v1897_v25  ;;  %v2067_v22 = vmul.f32 %v4545_v21, %v2331_v51  ;;  %v2334_v51 = vld [vmem:[#allocation2 + $0x1a1] sm:$0xff] }
 0x1eb   : > { %2571 = vst [vmem:[%s4279_s13 + $0xd8] sm:$0xff] %v2539_v48  ;;  %v2501_v7 = vadd.f32 %v2469_v49, %v2400_v35  ;;  %v2369_v30 = vmul.f32 %v4529_v16, %v2332_v52  ;;  %v1797_v63 = vadd.f32 %v1765_v20, %v1696_v45  ;;  %v1866_v27 = vmul.f32 %v4503_v0, %v2431_v2 }
 0x1ec   : > { %v2300_v39 = vadd.f32 %v2268_v14, %v2199_v36  ;;  %v2099_v42 = vadd.f32 %v2067_v22, %v1998_v24  ;;  %v2168_v41 = vmul.f32 %v4550_v33, %v2432_v4  ;;  %v2269_v3 = vmul.f32 %v2888_v9, %v4524_v43 }
 0x1ed   : > { %v2540_v12 = vadd.f32 %v2887_v5, %v2501_v7  ;;  %v1898_v46 = vadd.f32 %v1866_v27, %v1797_v63  ;;  %v1967_v53 = vmul.f32 %v4534_v28, %v2231_v1  ;;  %v2470_v55 = vmul.f32 %v4540_v50, %v2433_v34 }
 0x1ee   : > { %v2401_v17 = vadd.f32 %v2369_v30, %v2300_v39  ;;  %v2200_v29 = vadd.f32 %v2168_v41, %v2099_v42  ;;  %v2068_v2 = vmul.f32 %v4545_v21, %v2332_v52  ;;  %v2370_v10 = vmul.f32 %v4529_v16, %v2333_v58 }
 0x1ef   : > { %2572 = vst [vmem:[%s4279_s13 + $0xe0] sm:$0xff] %v2540_v12  ;;  %v1999_v0 = vadd.f32 %v1967_v53, %v1898_v46  ;;  %v2169_v57 = vmul.f32 %v4550_v33, %v2433_v34  ;;  %v2471_v54 = vmul.f32 %v4540_v50, %v2434_v47  ;;  %v2371_v8 = vmul.f32 %v4529_v16, %v2334_v51 }
 0x1f0   : > { %v2502_v44 = vadd.f32 %v2470_v55, %v2401_v17  ;;  %v2301_v60 = vadd.f32 %v2269_v3, %v2200_v29  ;;  %v2472_v33 = vmul.f32 %v4540_v50, %v2435_v56 }
 0x1f1   : > { %v2100_v43 = vadd.f32 %v2068_v2, %v1999_v0 }
 0x1f2   : > { %v2541_v28 = vadd.f32 %v2887_v5, %v2502_v44  ;;  %v2402_v61 = vadd.f32 %v2370_v10, %v2301_v60 }
 0x1f3   : > { %v2201_v40 = vadd.f32 %v2169_v57, %v2100_v43 }
 0x1f4   : > { %2573 = vst [vmem:[%s4279_s13 + $0xe8] sm:$0xff] %v2541_v28  ;;  %v2503_v21 = vadd.f32 %v2471_v54, %v2402_v61 }
 0x1f5   : > { %v2302_v62 = vadd.f32 %v2269_v3, %v2201_v40 }
 0x1f6   : > { %v2542_v13 = vadd.f32 %v2887_v5, %v2503_v21 }
 0x1f7   : > { %v2403_v15 = vadd.f32 %v2371_v8, %v2302_v62 }
 0x1f8   : > { %2574 = vst [vmem:[%s4279_s13 + $0xf0] sm:$0xff] %v2542_v13 }
 0x1f9   : > { %v2504_v6 = vadd.f32 %v2472_v33, %v2403_v15 }
 0x1fb   : > { %v2543_v4 = vadd.f32 %v2887_v5, %v2504_v6 }
 0x1fd   : > { %2575 = vst [vmem:[%s4279_s13 + $0xf8] sm:$0xff] %v2543_v4 }
 0x1fe   : > { %2988 = shalt.err (!%p2985_p1)
}
 0x1ff   : > { %s2989_s16 = scalar_lea.hbm %s4649_s8, 4096  ;;  %s2993_s13 = scalar_lea.hbm %s4701_s5, 8192 }
 0x200   : > { %p2990_p13 = scmp.ne.s32.totalorder %s4649_s8, %s2989_s16  ;;  %p2994_p4 = scmp.lt.u32.totalorder %s4649_s8, %s4701_s5 }
 0x201   : > { %p2995_p5 = scmp.lt.u32.totalorder %s2993_s13, %s2989_s16  ;;  %p2997_p11 = scmp.lt.u32.totalorder %s2989_s16, %s4649_s8 }
 0x202   : > { %p2991_p6 = pnand %p2990_p13, %p4806_p0 }
 0x203   : > { %p2996_p8 = por %p2995_p5, %p2994_p4 }
 0x204   : > { %p2992_p10 = pneg %p2991_p6 }
 0x205   : > { %p2998_p2 = por %p2997_p11, %p2996_p8 }
 0x207   : > { %p2999_p3 = pnand %p2998_p2, %p2992_p10 }
 0x209   : > { %3002 = shalt.err (!%p2999_p3)
}
 0x20a   : > { %s3054_s11 = smov 128   ;;  %s3055_s7 = smov 8  }
 0x20b   : > { %2732 = dma.vmem_to_hbm [thread:$0]  (%p4806_p0), %s4651_s17, 4096, %s4649_s8, %s2577_s12, %s3054_s11, %s3054_s11, %s3055_s7  }
 0x20c PF: > { %s2605_s6 = sand.u32 1, %s3033_s18   ;;  %p4807_p7 = scmp.ne.s32.totalorder %s4723_s25, 0 }
 0x20d   : > { %p4808_p9 = scmp.ge.s32.totalorder %s3045_s21, 2  ;;  %s2606_s24 = scalar_lea.sflag [#allocation5], %s2605_s6 }
 0x20f   : > { %p2746_p12 = pnand %p4808_p9, %p4807_p7 }
 0x211   : > { %3028 = dma.done.wait (!%p2746_p12), %s2606_s24, 4096  }
 0x212   : > { %3030 = vsyncadd (!%p2746_p12), %s2606_s24, 4294963200  ;;  %p19_p1 = scmp.ge.s32.totalorder %s3202_s29, 4   ;;  %s4809_s18 = smov %s3037_s19 }
 0x213   : > { %s4810_s19 = smov %s3041_s20  ;;  %s4811_s20 = smov %s3218_s27 }
 0x214   : > { %s4812_s21 = smov %s3202_s29  ;;  %21 = sbr.rel (!%p19_p1) target bundleno = 6 (0x6), region = 95 }
 0x21b   :  { %2611 = vsyncpa [#allocation4], 1 }
 0x21c   :  { %2613 = vsyncpa [#allocation4 + $0x1], 1 }
 0x21d   :  { %2614 = vsyncpa [#allocation7], 1 }
 0x21e   :  { %2615 = vsyncpa [#allocation5], 1 }
 0x21f   :  { %2617 = vsyncpa [#allocation5 + $0x1], 1 }

</bundles_post_ra>
